<compile_context>
chip_gen: v7x
topology: tpu7x:2x2x1
jax: 0.10.0
libtpu: 0.0.40
codegen_flags: <defaults>
</compile_context>

<pallas_src>
import functools

import jax
import jax.numpy as jnp
from jax import lax
from jax.experimental import pallas as pl
from jax.experimental.pallas import tpu as pltpu


def _round_up(x, m):
    return ((x + m - 1) // m) * m


def _lstm_kernel(emb_ref, wih_ref, whh_ref, b_ref, wlin_ref, blin_ref,
                 out_ref, seq_ref, preact_ref, *,
                 num_layers, seq_len, batch_tile, hidden_pad,
                 matmul_dtype, unroll):
    """One batch tile: num_layers LSTM layers over the sequence + Linear.

    emb_ref   : [T*Bb, Hp]     embedded inputs, rows ordered (t, b), matmul_dtype
    wih_ref   : [L, Hp, 4Hp]   input->gates weights (gate blocks 128-aligned)
    whh_ref   : [L, Hp, 4Hp]   hidden->gates weights
    b_ref     : [L, 1, 4Hp]    b_ih + b_hh (zero in padded lanes), f32
    wlin_ref  : [Hp, Op]       linear weight
    blin_ref  : [1, Op]        linear bias, f32
    out_ref   : [T*Bb, Op]     f32 output
    seq_ref   : [T*Bb, Hp]     VMEM scratch: running layer activations (f32)
    preact_ref: [T*Bb, 4Hp]    VMEM scratch: hoisted input preactivations (f32)
    """
    T, Bb, Hp = seq_len, batch_tile, hidden_pad

    for l in range(num_layers):
        # ---- hoisted input projection for the whole sequence (bias folded) ----
        x2d = (emb_ref if l == 0 else seq_ref)[...].astype(matmul_dtype)
        preact_ref[...] = (
            jnp.dot(x2d, wih_ref[l], preferred_element_type=jnp.float32)
            + b_ref[l])                                            # [T*Bb, 4Hp] f32

        w_hh = whh_ref[l]                                          # [Hp, 4Hp] hoisted

        def step(t, carry, w_hh=w_hh):
            h, c = carry                                           # f32 [Bb, Hp]
            row = pl.multiple_of(t * Bb, Bb)                       # 8-sublane aligned
            gates = (preact_ref[pl.ds(row, Bb), :]
                     + jnp.dot(h.astype(matmul_dtype), w_hh,
                               preferred_element_type=jnp.float32))  # [Bb, 4Hp] f32
            # Gate slices are 128-lane aligned (Hp is a multiple of 128).
            i_g = jax.nn.sigmoid(gates[:, 0 * Hp:1 * Hp])
            f_g = jax.nn.sigmoid(gates[:, 1 * Hp:2 * Hp])
            g_g = jnp.tanh(gates[:, 2 * Hp:3 * Hp])
            o_g = jax.nn.sigmoid(gates[:, 3 * Hp:4 * Hp])
            c_new = f_g * c + i_g * g_g
            h_new = o_g * jnp.tanh(c_new)
            seq_ref[pl.ds(row, Bb), :] = h_new                     # next layer's input
            return (h_new, c_new)

        h0 = jnp.zeros((Bb, Hp), jnp.float32)
        c0 = jnp.zeros((Bb, Hp), jnp.float32)
        lax.fori_loop(0, T, step, (h0, c0), unroll=unroll)

    # ---- final Linear: one lane-dense 2D matmul, unmasked stores ----
    out_ref[...] = (
        jnp.dot(seq_ref[...].astype(matmul_dtype), wlin_ref[...],
                preferred_element_type=jnp.float32)
        + blin_ref[...])


def lstm_nn_forward(x, params, *, num_layers, hidden_size, output_size,
                    matmul_dtype=jnp.bfloat16):
    """x: int32 [B, T] token indices -> float32 [B, T, output_size]."""
    B, T = x.shape
    H, O = hidden_size, output_size
    Hp = _round_up(H, 128)                 # lane-aligned hidden / per-gate width
    Op = _round_up(O, 128)                 # lane-dense output features
    Bb = _round_up(min(B, 32), 8)          # batch tile: multiple of 8 sublanes
    nb = pl.cdiv(B, Bb)
    Bpad = nb * Bb
    unroll = T if T <= 8 else 4

    # --- glue: embedding gather + lane-aligned parameter packing (plain JAX) ---
    # TODO(synk): nn.Embedding gather stays in plain JAX (a data-dependent HBM
    # gather is not worth a manual-DMA kernel at these sizes).
    emb = params['embedding'][x]                                      # [B, T, H]
    emb = jnp.pad(emb, ((0, Bpad - B), (0, 0), (0, Hp - H)))          # [Bpad, T, Hp]
    # -> [nb, T*Bb, Hp], rows within a block ordered time-major, batch-minor.
    emb = emb.reshape(nb, Bb, T, Hp).transpose(0, 2, 1, 3).reshape(nb, T * Bb, Hp)
    emb = emb.astype(matmul_dtype)

    def pack_gate_w(w):                      # w: [4H, H] (torch layout)
        wt = w.T                             # [H, 4H]
        out = jnp.zeros((Hp, 4 * Hp), jnp.float32)
        for g in range(4):                   # each gate -> its own 128-aligned block
            out = out.at[:H, g * Hp:g * Hp + H].set(wt[:, g * H:(g + 1) * H])
        return out

    def pack_gate_b(b):                      # b: [4H]
        out = jnp.zeros((4 * Hp,), jnp.float32)
        for g in range(4):
            out = out.at[g * Hp:g * Hp + H].set(b[g * H:(g + 1) * H])
        return out

    wih = jnp.stack([pack_gate_w(params[f'w_ih_{l}'])
                     for l in range(num_layers)]).astype(matmul_dtype)   # [L, Hp, 4Hp]
    whh = jnp.stack([pack_gate_w(params[f'w_hh_{l}'])
                     for l in range(num_layers)]).astype(matmul_dtype)   # [L, Hp, 4Hp]
    b = jnp.stack([pack_gate_b(params[f'b_ih_{l}'] + params[f'b_hh_{l}'])[None, :]
                   for l in range(num_layers)])                          # [L, 1, 4Hp] f32
    wlin = (jnp.zeros((Hp, Op), jnp.float32)
            .at[:H, :O].set(params['w_lin'].T)).astype(matmul_dtype)     # [Hp, Op]
    blin = jnp.zeros((1, Op), jnp.float32).at[0, :O].set(params['b_lin'])  # [1, Op]

    kernel = functools.partial(
        _lstm_kernel,
        num_layers=num_layers, seq_len=T, batch_tile=Bb, hidden_pad=Hp,
        matmul_dtype=matmul_dtype, unroll=unroll)

    const_map3 = lambda i: (0, 0, 0)
    const_map2 = lambda i: (0, 0)

    out = pl.pallas_call(
        kernel,
        out_shape=jax.ShapeDtypeStruct((nb, T * Bb, Op), jnp.float32),
        grid_spec=pltpu.PrefetchScalarGridSpec(
            num_scalar_prefetch=0,
            grid=(nb,),
            in_specs=[
                pl.BlockSpec((None, T * Bb, Hp), lambda i: (i, 0, 0)),  # emb tile
                pl.BlockSpec(wih.shape, const_map3),
                pl.BlockSpec(whh.shape, const_map3),
                pl.BlockSpec(b.shape, const_map3),
                pl.BlockSpec(wlin.shape, const_map2),
                pl.BlockSpec(blin.shape, const_map2),
            ],
            out_specs=pl.BlockSpec((None, T * Bb, Op), lambda i: (i, 0, 0)),
            scratch_shapes=[
                pltpu.VMEM((T * Bb, Hp), jnp.float32),       # layer activations
                pltpu.VMEM((T * Bb, 4 * Hp), jnp.float32),   # hoisted preactivations
            ],
        ),
        compiler_params=pltpu.CompilerParams(
            dimension_semantics=("parallel",),              # batch tiles -> megacore
            vmem_limit_bytes=32 * 1024 * 1024,              # safe incl. v7x (64 MiB phys)
        ),
    )(emb, wih, whh, b, wlin, blin)

    # [nb, T*Bb, Op] -> [Bpad, T, Op] -> strip batch / feature padding.
    out = out.reshape(nb, T, Bb, Op).transpose(0, 2, 1, 3).reshape(Bpad, T, Op)
    return out[:B, :, :O]


def _reference_forward(x, params, *, num_layers, hidden_size, output_size):
    """Pure-JAX reference (mirrors torch.nn.LSTM batch_first semantics)."""
    B, T = x.shape
    H = hidden_size
    seq = params['embedding'][x]                       # [B, T, H]
    for l in range(num_layers):
        w_ih = params[f'w_ih_{l}']                     # [4H, H]
        w_hh = params[f'w_hh_{l}']
        b = params[f'b_ih_{l}'] + params[f'b_hh_{l}']  # [4H]

        def step(carry, x_t, w_ih=w_ih, w_hh=w_hh, b=b):
            h, c = carry
            gates = x_t @ w_ih.T + h @ w_hh.T + b
            i_g = jax.nn.sigmoid(gates[:, 0 * H:1 * H])
            f_g = jax.nn.sigmoid(gates[:, 1 * H:2 * H])
            g_g = jnp.tanh(gates[:, 2 * H:3 * H])
            o_g = jax.nn.sigmoid(gates[:, 3 * H:4 * H])
            c_new = f_g * c + i_g * g_g
            h_new = o_g * jnp.tanh(c_new)
            return (h_new, c_new), h_new

        h0 = jnp.zeros((B, H), jnp.float32)
        c0 = jnp.zeros((B, H), jnp.float32)
        _, hs = lax.scan(step, (h0, c0), jnp.transpose(seq, (1, 0, 2)))
        seq = jnp.transpose(hs, (1, 0, 2))
    return seq @ params['w_lin'].T + params['b_lin']


def init_params(key, *, input_size, hidden_size, num_layers, output_size):
    H = hidden_size
    k_lstm = 1.0 / jnp.sqrt(jnp.float32(H))
    keys = jax.random.split(key, 4 * num_layers + 4)
    params = {
        'embedding': jax.random.normal(keys[0], (input_size, H), jnp.float32),
    }
    idx = 1
    for l in range(num_layers):
        params[f'w_ih_{l}'] = jax.random.uniform(
            keys[idx], (4 * H, H), jnp.float32, -k_lstm, k_lstm); idx += 1
        params[f'w_hh_{l}'] = jax.random.uniform(
            keys[idx], (4 * H, H), jnp.float32, -k_lstm, k_lstm); idx += 1
        params[f'b_ih_{l}'] = jax.random.uniform(
            keys[idx], (4 * H,), jnp.float32, -k_lstm, k_lstm); idx += 1
        params[f'b_hh_{l}'] = jax.random.uniform(
            keys[idx], (4 * H,), jnp.float32, -k_lstm, k_lstm); idx += 1
    k_lin = 1.0 / jnp.sqrt(jnp.float32(H))
    params['w_lin'] = jax.random.uniform(
        keys[idx], (output_size, H), jnp.float32, -k_lin, k_lin); idx += 1
    params['b_lin'] = jax.random.uniform(
        keys[idx], (output_size,), jnp.float32, -k_lin, k_lin)
    return params


if __name__ == "__main__":
    INPUT_SIZE = 16      # vocab size
    HIDDEN_SIZE = 32
    NUM_LAYERS = 2
    OUTPUT_SIZE = 10
    BATCH = 2
    SEQ = 8

    key = jax.random.PRNGKey(0)
    k_param, k_x = jax.random.split(key)
    params = init_params(k_param, input_size=INPUT_SIZE, hidden_size=HIDDEN_SIZE,
                         num_layers=NUM_LAYERS, output_size=OUTPUT_SIZE)
    x = jax.random.randint(k_x, (BATCH, SEQ), 0, INPUT_SIZE, dtype=jnp.int32)

    ref = _reference_forward(x, params, num_layers=NUM_LAYERS,
                             hidden_size=HIDDEN_SIZE, output_size=OUTPUT_SIZE)
    ref = jax.block_until_ready(ref)

    # bf16 MXU operands (v6e/v7x MXU-native; elementwise stays f32 -> v5e-safe).
    out_bf16 = lstm_nn_forward(x, params, num_layers=NUM_LAYERS,
                               hidden_size=HIDDEN_SIZE, output_size=OUTPUT_SIZE,
                               matmul_dtype=jnp.bfloat16)
    out_bf16 = jax.block_until_ready(out_bf16)
    assert out_bf16.shape == (BATCH, SEQ, OUTPUT_SIZE), out_bf16.shape
    assert jnp.allclose(out_bf16, ref, atol=1e-1, rtol=1e-1), (
        float(jnp.max(jnp.abs(out_bf16 - ref))))

    # Full-f32 path, strict check.
    out_f32 = lstm_nn_forward(x, params, num_layers=NUM_LAYERS,
                              hidden_size=HIDDEN_SIZE, output_size=OUTPUT_SIZE,
                              matmul_dtype=jnp.float32)
    out_f32 = jax.block_until_ready(out_f32)
    assert out_f32.shape == (BATCH, SEQ, OUTPUT_SIZE), out_f32.shape
    assert jnp.allclose(out_f32, ref, atol=2e-3, rtol=2e-3), (
        float(jnp.max(jnp.abs(out_f32 - ref))))

    print("KERNEL_OK")
</pallas_src>

<mosaic_0001>
module attributes {stable_mosaic.version = 11 : i64} {
  func.func @_lstm_kernel(%arg0: i32, %arg1: memref<1x64x128xbf16, #tpu.memory_space<vmem>>, %arg2: memref<2x128x512xbf16, #tpu.memory_space<vmem>>, %arg3: memref<2x128x512xbf16, #tpu.memory_space<vmem>>, %arg4: memref<2x1x512xf32, #tpu.memory_space<vmem>>, %arg5: memref<128x128xbf16, #tpu.memory_space<vmem>>, %arg6: memref<1x128xf32, #tpu.memory_space<vmem>>, %arg7: memref<1x64x128xf32, #tpu.memory_space<vmem>>, %arg8: memref<64x128xf32, #tpu.memory_space<vmem>>, %arg9: memref<64x512xf32, #tpu.memory_space<vmem>>) attributes {dimension_semantics = [#tpu.dimension_semantics<parallel>], iteration_bounds = array<i64: 1>, scalar_prefetch = 0 : i64, scratch_operands = 2 : i64, tpu.core_type = #tpu.core_type<tc>, window_params = [{transform_indices = @transform_0, window_bounds = array<i64: 1, 64, 128>}, {pipeline_mode = #tpu.pipeline_mode<synchronous>, transform_indices = @transform_1, window_bounds = array<i64: 2, 128, 512>}, {pipeline_mode = #tpu.pipeline_mode<synchronous>, transform_indices = @transform_2, window_bounds = array<i64: 2, 128, 512>}, {pipeline_mode = #tpu.pipeline_mode<synchronous>, transform_indices = @transform_3, window_bounds = array<i64: 2, 1, 512>}, {pipeline_mode = #tpu.pipeline_mode<synchronous>, transform_indices = @transform_4, window_bounds = array<i64: 128, 128>}, {pipeline_mode = #tpu.pipeline_mode<synchronous>, transform_indices = @transform_5, window_bounds = array<i64: 1, 128>}, {transform_indices = @transform_6, window_bounds = array<i64: 1, 64, 128>}]} {
    %c0 = arith.constant 0 : index
    %c0_0 = arith.constant 0 : index
    %c0_1 = arith.constant 0 : index
    %0 = vector.load %arg1[%c0, %c0_0, %c0_1] : memref<1x64x128xbf16, #tpu.memory_space<vmem>>, vector<1x64x128xbf16>
    %1 = vector.shape_cast %0 : vector<1x64x128xbf16> to vector<64x128xbf16>
    %c0_2 = arith.constant 0 : index
    %c0_3 = arith.constant 0 : index
    %c0_4 = arith.constant 0 : index
    %2 = vector.load %arg2[%c0_2, %c0_3, %c0_4] : memref<2x128x512xbf16, #tpu.memory_space<vmem>>, vector<1x128x512xbf16>
    %3 = vector.shape_cast %2 : vector<1x128x512xbf16> to vector<128x512xbf16>
    %cst = arith.constant dense<0.000000e+00> : vector<64x512xf32>
    %4 = tpu.matmul %1, %3, %cst {dimension_numbers = #tpu.dot_dimension_numbers<[1], [0], [0], [1], [0, 0, 1, 1], [], []>} : vector<64x128xbf16>, vector<128x512xbf16>, vector<64x512xf32> -> vector<64x512xf32>
    %c0_5 = arith.constant 0 : index
    %c0_6 = arith.constant 0 : index
    %c0_7 = arith.constant 0 : index
    %5 = vector.load %arg4[%c0_5, %c0_6, %c0_7] : memref<2x1x512xf32, #tpu.memory_space<vmem>>, vector<1x1x512xf32>
    %6 = vector.shape_cast %5 : vector<1x1x512xf32> to vector<1x512xf32>
    %7 = vector.broadcast %6 : vector<1x512xf32> to vector<64x512xf32>
    %8 = arith.addf %4, %7 : vector<64x512xf32>
    %c0_8 = arith.constant 0 : index
    %c0_9 = arith.constant 0 : index
    %9 = vector.load %arg9[%c0_8, %c0_9] : memref<64x512xf32, #tpu.memory_space<vmem>>, vector<64x512xf32>
    tpu.vector_store %arg9[%c0_8, %c0_9], %8 {strides = array<i32>} : memref<64x512xf32, #tpu.memory_space<vmem>>, vector<64x512xf32>,
    %c0_10 = arith.constant 0 : index
    %c0_11 = arith.constant 0 : index
    %c0_12 = arith.constant 0 : index
    %10 = vector.load %arg3[%c0_10, %c0_11, %c0_12] : memref<2x128x512xbf16, #tpu.memory_space<vmem>>, vector<1x128x512xbf16>
    %11 = vector.shape_cast %10 : vector<1x128x512xbf16> to vector<128x512xbf16>
    %cst_13 = arith.constant 0.000000e+00 : f32
    %12 = vector.broadcast %cst_13 : f32 to vector<8x128xf32>
    %cst_14 = arith.constant 0.000000e+00 : f32
    %13 = vector.broadcast %cst_14 : f32 to vector<8x128xf32>
    %c0_i32 = arith.constant 0 : i32
    %c8_i32 = arith.constant 8 : i32
    %14 = arith.muli %c0_i32, %c8_i32 : i32
    %15 = tpu.assume_multiple %14, 8 : i32
    %16 = arith.index_cast %15 : i32 to index
    %c0_15 = arith.constant 0 : index
    %17 = vector.load %arg9[%16, %c0_15] : memref<64x512xf32, #tpu.memory_space<vmem>>, vector<8x512xf32>
    %18 = arith.truncf %12 : vector<8x128xf32> to vector<8x128xbf16>
    %cst_16 = arith.constant dense<0.000000e+00> : vector<8x512xf32>
    %19 = tpu.matmul %18, %11, %cst_16 {dimension_numbers = #tpu.dot_dimension_numbers<[1], [0], [0], [1], [0, 0, 1, 1], [], []>} : vector<8x128xbf16>, vector<128x512xbf16>, vector<8x512xf32> -> vector<8x512xf32>
    %20 = arith.addf %17, %19 : vector<8x512xf32>
    %21 = vector.extract_strided_slice %20 {offsets = [0, 0], sizes = [8, 128], strides = [1, 1]} : vector<8x512xf32> to vector<8x128xf32>
    %22 = arith.negf %21 : vector<8x128xf32>
    %23 = math.exp %22 : vector<8x128xf32>
    %cst_17 = arith.constant 1.000000e+00 : f32
    %24 = vector.broadcast %cst_17 : f32 to vector<8x128xf32>
    %25 = arith.addf %24, %23 : vector<8x128xf32>
    %26 = arith.divf %24, %25 : vector<8x128xf32>
    %27 = vector.extract_strided_slice %20 {offsets = [0, 128], sizes = [8, 128], strides = [1, 1]} : vector<8x512xf32> to vector<8x128xf32>
    %28 = arith.negf %27 : vector<8x128xf32>
    %29 = math.exp %28 : vector<8x128xf32>
    %cst_18 = arith.constant 1.000000e+00 : f32
    %30 = vector.broadcast %cst_18 : f32 to vector<8x128xf32>
    %31 = arith.addf %30, %29 : vector<8x128xf32>
    %32 = arith.divf %30, %31 : vector<8x128xf32>
    %33 = vector.extract_strided_slice %20 {offsets = [0, 256], sizes = [8, 128], strides = [1, 1]} : vector<8x512xf32> to vector<8x128xf32>
    %34 = math.tanh %33 : vector<8x128xf32>
    %35 = vector.extract_strided_slice %20 {offsets = [0, 384], sizes = [8, 128], strides = [1, 1]} : vector<8x512xf32> to vector<8x128xf32>
    %36 = arith.negf %35 : vector<8x128xf32>
    %37 = math.exp %36 : vector<8x128xf32>
    %cst_19 = arith.constant 1.000000e+00 : f32
    %38 = vector.broadcast %cst_19 : f32 to vector<8x128xf32>
    %39 = arith.addf %38, %37 : vector<8x128xf32>
    %40 = arith.divf %38, %39 : vector<8x128xf32>
    %41 = arith.mulf %32, %13 : vector<8x128xf32>
    %42 = arith.mulf %26, %34 : vector<8x128xf32>
    %43 = arith.addf %41, %42 : vector<8x128xf32>
    %44 = math.tanh %43 : vector<8x128xf32>
    %45 = arith.mulf %40, %44 : vector<8x128xf32>
    %46 = arith.index_cast %15 : i32 to index
    %c0_20 = arith.constant 0 : index
    %47 = vector.load %arg8[%46, %c0_20] : memref<64x128xf32, #tpu.memory_space<vmem>>, vector<8x128xf32>
    tpu.vector_store %arg8[%46, %c0_20], %45 {strides = array<i32>} : memref<64x128xf32, #tpu.memory_space<vmem>>, vector<8x128xf32>,
    %c1_i32 = arith.constant 1 : i32
    %c8_i32_21 = arith.constant 8 : i32
    %48 = arith.muli %c1_i32, %c8_i32_21 : i32
    %49 = tpu.assume_multiple %48, 8 : i32
    %50 = arith.index_cast %49 : i32 to index
    %c0_22 = arith.constant 0 : index
    %51 = vector.load %arg9[%50, %c0_22] : memref<64x512xf32, #tpu.memory_space<vmem>>, vector<8x512xf32>
    %52 = arith.truncf %45 : vector<8x128xf32> to vector<8x128xbf16>
    %cst_23 = arith.constant dense<0.000000e+00> : vector<8x512xf32>
    %53 = tpu.matmul %52, %11, %cst_23 {dimension_numbers = #tpu.dot_dimension_numbers<[1], [0], [0], [1], [0, 0, 1, 1], [], []>} : vector<8x128xbf16>, vector<128x512xbf16>, vector<8x512xf32> -> vector<8x512xf32>
    %54 = arith.addf %51, %53 : vector<8x512xf32>
    %55 = vector.extract_strided_slice %54 {offsets = [0, 0], sizes = [8, 128], strides = [1, 1]} : vector<8x512xf32> to vector<8x128xf32>
    %56 = arith.negf %55 : vector<8x128xf32>
    %57 = math.exp %56 : vector<8x128xf32>
    %cst_24 = arith.constant 1.000000e+00 : f32
    %58 = vector.broadcast %cst_24 : f32 to vector<8x128xf32>
    %59 = arith.addf %58, %57 : vector<8x128xf32>
    %60 = arith.divf %58, %59 : vector<8x128xf32>
    %61 = vector.extract_strided_slice %54 {offsets = [0, 128], sizes = [8, 128], strides = [1, 1]} : vector<8x512xf32> to vector<8x128xf32>
    %62 = arith.negf %61 : vector<8x128xf32>
    %63 = math.exp %62 : vector<8x128xf32>
    %cst_25 = arith.constant 1.000000e+00 : f32
    %64 = vector.broadcast %cst_25 : f32 to vector<8x128xf32>
    %65 = arith.addf %64, %63 : vector<8x128xf32>
    %66 = arith.divf %64, %65 : vector<8x128xf32>
    %67 = vector.extract_strided_slice %54 {offsets = [0, 256], sizes = [8, 128], strides = [1, 1]} : vector<8x512xf32> to vector<8x128xf32>
    %68 = math.tanh %67 : vector<8x128xf32>
    %69 = vector.extract_strided_slice %54 {offsets = [0, 384], sizes = [8, 128], strides = [1, 1]} : vector<8x512xf32> to vector<8x128xf32>
    %70 = arith.negf %69 : vector<8x128xf32>
    %71 = math.exp %70 : vector<8x128xf32>
    %cst_26 = arith.constant 1.000000e+00 : f32
    %72 = vector.broadcast %cst_26 : f32 to vector<8x128xf32>
    %73 = arith.addf %72, %71 : vector<8x128xf32>
    %74 = arith.divf %72, %73 : vector<8x128xf32>
    %75 = arith.mulf %66, %43 : vector<8x128xf32>
    %76 = arith.mulf %60, %68 : vector<8x128xf32>
    %77 = arith.addf %75, %76 : vector<8x128xf32>
    %78 = math.tanh %77 : vector<8x128xf32>
    %79 = arith.mulf %74, %78 : vector<8x128xf32>
    %80 = arith.index_cast %49 : i32 to index
    %c0_27 = arith.constant 0 : index
    %81 = vector.load %arg8[%80, %c0_27] : memref<64x128xf32, #tpu.memory_space<vmem>>, vector<8x128xf32>
    tpu.vector_store %arg8[%80, %c0_27], %79 {strides = array<i32>} : memref<64x128xf32, #tpu.memory_space<vmem>>, vector<8x128xf32>,
    %c2_i32 = arith.constant 2 : i32
    %c8_i32_28 = arith.constant 8 : i32
    %82 = arith.muli %c2_i32, %c8_i32_28 : i32
    %83 = tpu.assume_multiple %82, 8 : i32
    %84 = arith.index_cast %83 : i32 to index
    %c0_29 = arith.constant 0 : index
    %85 = vector.load %arg9[%84, %c0_29] : memref<64x512xf32, #tpu.memory_space<vmem>>, vector<8x512xf32>
    %86 = arith.truncf %79 : vector<8x128xf32> to vector<8x128xbf16>
    %cst_30 = arith.constant dense<0.000000e+00> : vector<8x512xf32>
    %87 = tpu.matmul %86, %11, %cst_30 {dimension_numbers = #tpu.dot_dimension_numbers<[1], [0], [0], [1], [0, 0, 1, 1], [], []>} : vector<8x128xbf16>, vector<128x512xbf16>, vector<8x512xf32> -> vector<8x512xf32>
    %88 = arith.addf %85, %87 : vector<8x512xf32>
    %89 = vector.extract_strided_slice %88 {offsets = [0, 0], sizes = [8, 128], strides = [1, 1]} : vector<8x512xf32> to vector<8x128xf32>
    %90 = arith.negf %89 : vector<8x128xf32>
    %91 = math.exp %90 : vector<8x128xf32>
    %cst_31 = arith.constant 1.000000e+00 : f32
    %92 = vector.broadcast %cst_31 : f32 to vector<8x128xf32>
    %93 = arith.addf %92, %91 : vector<8x128xf32>
    %94 = arith.divf %92, %93 : vector<8x128xf32>
    %95 = vector.extract_strided_slice %88 {offsets = [0, 128], sizes = [8, 128], strides = [1, 1]} : vector<8x512xf32> to vector<8x128xf32>
    %96 = arith.negf %95 : vector<8x128xf32>
    %97 = math.exp %96 : vector<8x128xf32>
    %cst_32 = arith.constant 1.000000e+00 : f32
    %98 = vector.broadcast %cst_32 : f32 to vector<8x128xf32>
    %99 = arith.addf %98, %97 : vector<8x128xf32>
    %100 = arith.divf %98, %99 : vector<8x128xf32>
    %101 = vector.extract_strided_slice %88 {offsets = [0, 256], sizes = [8, 128], strides = [1, 1]} : vector<8x512xf32> to vector<8x128xf32>
    %102 = math.tanh %101 : vector<8x128xf32>
    %103 = vector.extract_strided_slice %88 {offsets = [0, 384], sizes = [8, 128], strides = [1, 1]} : vector<8x512xf32> to vector<8x128xf32>
    %104 = arith.negf %103 : vector<8x128xf32>
    %105 = math.exp %104 : vector<8x128xf32>
    %cst_33 = arith.constant 1.000000e+00 : f32
    %106 = vector.broadcast %cst_33 : f32 to vector<8x128xf32>
    %107 = arith.addf %106, %105 : vector<8x128xf32>
    %108 = arith.divf %106, %107 : vector<8x128xf32>
    %109 = arith.mulf %100, %77 : vector<8x128xf32>
    %110 = arith.mulf %94, %102 : vector<8x128xf32>
    %111 = arith.addf %109, %110 : vector<8x128xf32>
    %112 = math.tanh %111 : vector<8x128xf32>
    %113 = arith.mulf %108, %112 : vector<8x128xf32>
    %114 = arith.index_cast %83 : i32 to index
    %c0_34 = arith.constant 0 : index
    %115 = vector.load %arg8[%114, %c0_34] : memref<64x128xf32, #tpu.memory_space<vmem>>, vector<8x128xf32>
    tpu.vector_store %arg8[%114, %c0_34], %113 {strides = array<i32>} : memref<64x128xf32, #tpu.memory_space<vmem>>, vector<8x128xf32>,
    %c3_i32 = arith.constant 3 : i32
    %c8_i32_35 = arith.constant 8 : i32
    %116 = arith.muli %c3_i32, %c8_i32_35 : i32
    %117 = tpu.assume_multiple %116, 8 : i32
    %118 = arith.index_cast %117 : i32 to index
    %c0_36 = arith.constant 0 : index
    %119 = vector.load %arg9[%118, %c0_36] : memref<64x512xf32, #tpu.memory_space<vmem>>, vector<8x512xf32>
    %120 = arith.truncf %113 : vector<8x128xf32> to vector<8x128xbf16>
    %cst_37 = arith.constant dense<0.000000e+00> : vector<8x512xf32>
    %121 = tpu.matmul %120, %11, %cst_37 {dimension_numbers = #tpu.dot_dimension_numbers<[1], [0], [0], [1], [0, 0, 1, 1], [], []>} : vector<8x128xbf16>, vector<128x512xbf16>, vector<8x512xf32> -> vector<8x512xf32>
    %122 = arith.addf %119, %121 : vector<8x512xf32>
    %123 = vector.extract_strided_slice %122 {offsets = [0, 0], sizes = [8, 128], strides = [1, 1]} : vector<8x512xf32> to vector<8x128xf32>
    %124 = arith.negf %123 : vector<8x128xf32>
    %125 = math.exp %124 : vector<8x128xf32>
    %cst_38 = arith.constant 1.000000e+00 : f32
    %126 = vector.broadcast %cst_38 : f32 to vector<8x128xf32>
    %127 = arith.addf %126, %125 : vector<8x128xf32>
    %128 = arith.divf %126, %127 : vector<8x128xf32>
    %129 = vector.extract_strided_slice %122 {offsets = [0, 128], sizes = [8, 128], strides = [1, 1]} : vector<8x512xf32> to vector<8x128xf32>
    %130 = arith.negf %129 : vector<8x128xf32>
    %131 = math.exp %130 : vector<8x128xf32>
    %cst_39 = arith.constant 1.000000e+00 : f32
    %132 = vector.broadcast %cst_39 : f32 to vector<8x128xf32>
    %133 = arith.addf %132, %131 : vector<8x128xf32>
    %134 = arith.divf %132, %133 : vector<8x128xf32>
    %135 = vector.extract_strided_slice %122 {offsets = [0, 256], sizes = [8, 128], strides = [1, 1]} : vector<8x512xf32> to vector<8x128xf32>
    %136 = math.tanh %135 : vector<8x128xf32>
    %137 = vector.extract_strided_slice %122 {offsets = [0, 384], sizes = [8, 128], strides = [1, 1]} : vector<8x512xf32> to vector<8x128xf32>
    %138 = arith.negf %137 : vector<8x128xf32>
    %139 = math.exp %138 : vector<8x128xf32>
    %cst_40 = arith.constant 1.000000e+00 : f32
    %140 = vector.broadcast %cst_40 : f32 to vector<8x128xf32>
    %141 = arith.addf %140, %139 : vector<8x128xf32>
    %142 = arith.divf %140, %141 : vector<8x128xf32>
    %143 = arith.mulf %134, %111 : vector<8x128xf32>
    %144 = arith.mulf %128, %136 : vector<8x128xf32>
    %145 = arith.addf %143, %144 : vector<8x128xf32>
    %146 = math.tanh %145 : vector<8x128xf32>
    %147 = arith.mulf %142, %146 : vector<8x128xf32>
    %148 = arith.index_cast %117 : i32 to index
    %c0_41 = arith.constant 0 : index
    %149 = vector.load %arg8[%148, %c0_41] : memref<64x128xf32, #tpu.memory_space<vmem>>, vector<8x128xf32>
    tpu.vector_store %arg8[%148, %c0_41], %147 {strides = array<i32>} : memref<64x128xf32, #tpu.memory_space<vmem>>, vector<8x128xf32>,
    %c4_i32 = arith.constant 4 : i32
    %c8_i32_42 = arith.constant 8 : i32
    %150 = arith.muli %c4_i32, %c8_i32_42 : i32
    %151 = tpu.assume_multiple %150, 8 : i32
    %152 = arith.index_cast %151 : i32 to index
    %c0_43 = arith.constant 0 : index
    %153 = vector.load %arg9[%152, %c0_43] : memref<64x512xf32, #tpu.memory_space<vmem>>, vector<8x512xf32>
    %154 = arith.truncf %147 : vector<8x128xf32> to vector<8x128xbf16>
    %cst_44 = arith.constant dense<0.000000e+00> : vector<8x512xf32>
    %155 = tpu.matmul %154, %11, %cst_44 {dimension_numbers = #tpu.dot_dimension_numbers<[1], [0], [0], [1], [0, 0, 1, 1], [], []>} : vector<8x128xbf16>, vector<128x512xbf16>, vector<8x512xf32> -> vector<8x512xf32>
    %156 = arith.addf %153, %155 : vector<8x512xf32>
    %157 = vector.extract_strided_slice %156 {offsets = [0, 0], sizes = [8, 128], strides = [1, 1]} : vector<8x512xf32> to vector<8x128xf32>
    %158 = arith.negf %157 : vector<8x128xf32>
    %159 = math.exp %158 : vector<8x128xf32>
    %cst_45 = arith.constant 1.000000e+00 : f32
    %160 = vector.broadcast %cst_45 : f32 to vector<8x128xf32>
    %161 = arith.addf %160, %159 : vector<8x128xf32>
    %162 = arith.divf %160, %161 : vector<8x128xf32>
    %163 = vector.extract_strided_slice %156 {offsets = [0, 128], sizes = [8, 128], strides = [1, 1]} : vector<8x512xf32> to vector<8x128xf32>
    %164 = arith.negf %163 : vector<8x128xf32>
    %165 = math.exp %164 : vector<8x128xf32>
    %cst_46 = arith.constant 1.000000e+00 : f32
    %166 = vector.broadcast %cst_46 : f32 to vector<8x128xf32>
    %167 = arith.addf %166, %165 : vector<8x128xf32>
    %168 = arith.divf %166, %167 : vector<8x128xf32>
    %169 = vector.extract_strided_slice %156 {offsets = [0, 256], sizes = [8, 128], strides = [1, 1]} : vector<8x512xf32> to vector<8x128xf32>
    %170 = math.tanh %169 : vector<8x128xf32>
    %171 = vector.extract_strided_slice %156 {offsets = [0, 384], sizes = [8, 128], strides = [1, 1]} : vector<8x512xf32> to vector<8x128xf32>
    %172 = arith.negf %171 : vector<8x128xf32>
    %173 = math.exp %172 : vector<8x128xf32>
    %cst_47 = arith.constant 1.000000e+00 : f32
    %174 = vector.broadcast %cst_47 : f32 to vector<8x128xf32>
    %175 = arith.addf %174, %173 : vector<8x128xf32>
    %176 = arith.divf %174, %175 : vector<8x128xf32>
    %177 = arith.mulf %168, %145 : vector<8x128xf32>
    %178 = arith.mulf %162, %170 : vector<8x128xf32>
    %179 = arith.addf %177, %178 : vector<8x128xf32>
    %180 = math.tanh %179 : vector<8x128xf32>
    %181 = arith.mulf %176, %180 : vector<8x128xf32>
    %182 = arith.index_cast %151 : i32 to index
    %c0_48 = arith.constant 0 : index
    %183 = vector.load %arg8[%182, %c0_48] : memref<64x128xf32, #tpu.memory_space<vmem>>, vector<8x128xf32>
    tpu.vector_store %arg8[%182, %c0_48], %181 {strides = array<i32>} : memref<64x128xf32, #tpu.memory_space<vmem>>, vector<8x128xf32>,
    %c5_i32 = arith.constant 5 : i32
    %c8_i32_49 = arith.constant 8 : i32
    %184 = arith.muli %c5_i32, %c8_i32_49 : i32
    %185 = tpu.assume_multiple %184, 8 : i32
    %186 = arith.index_cast %185 : i32 to index
    %c0_50 = arith.constant 0 : index
    %187 = vector.load %arg9[%186, %c0_50] : memref<64x512xf32, #tpu.memory_space<vmem>>, vector<8x512xf32>
    %188 = arith.truncf %181 : vector<8x128xf32> to vector<8x128xbf16>
    %cst_51 = arith.constant dense<0.000000e+00> : vector<8x512xf32>
    %189 = tpu.matmul %188, %11, %cst_51 {dimension_numbers = #tpu.dot_dimension_numbers<[1], [0], [0], [1], [0, 0, 1, 1], [], []>} : vector<8x128xbf16>, vector<128x512xbf16>, vector<8x512xf32> -> vector<8x512xf32>
    %190 = arith.addf %187, %189 : vector<8x512xf32>
    %191 = vector.extract_strided_slice %190 {offsets = [0, 0], sizes = [8, 128], strides = [1, 1]} : vector<8x512xf32> to vector<8x128xf32>
    %192 = arith.negf %191 : vector<8x128xf32>
    %193 = math.exp %192 : vector<8x128xf32>
    %cst_52 = arith.constant 1.000000e+00 : f32
    %194 = vector.broadcast %cst_52 : f32 to vector<8x128xf32>
    %195 = arith.addf %194, %193 : vector<8x128xf32>
    %196 = arith.divf %194, %195 : vector<8x128xf32>
    %197 = vector.extract_strided_slice %190 {offsets = [0, 128], sizes = [8, 128], strides = [1, 1]} : vector<8x512xf32> to vector<8x128xf32>
    %198 = arith.negf %197 : vector<8x128xf32>
    %199 = math.exp %198 : vector<8x128xf32>
    %cst_53 = arith.constant 1.000000e+00 : f32
    %200 = vector.broadcast %cst_53 : f32 to vector<8x128xf32>
    %201 = arith.addf %200, %199 : vector<8x128xf32>
    %202 = arith.divf %200, %201 : vector<8x128xf32>
    %203 = vector.extract_strided_slice %190 {offsets = [0, 256], sizes = [8, 128], strides = [1, 1]} : vector<8x512xf32> to vector<8x128xf32>
    %204 = math.tanh %203 : vector<8x128xf32>
    %205 = vector.extract_strided_slice %190 {offsets = [0, 384], sizes = [8, 128], strides = [1, 1]} : vector<8x512xf32> to vector<8x128xf32>
    %206 = arith.negf %205 : vector<8x128xf32>
    %207 = math.exp %206 : vector<8x128xf32>
    %cst_54 = arith.constant 1.000000e+00 : f32
    %208 = vector.broadcast %cst_54 : f32 to vector<8x128xf32>
    %209 = arith.addf %208, %207 : vector<8x128xf32>
    %210 = arith.divf %208, %209 : vector<8x128xf32>
    %211 = arith.mulf %202, %179 : vector<8x128xf32>
    %212 = arith.mulf %196, %204 : vector<8x128xf32>
    %213 = arith.addf %211, %212 : vector<8x128xf32>
    %214 = math.tanh %213 : vector<8x128xf32>
    %215 = arith.mulf %210, %214 : vector<8x128xf32>
    %216 = arith.index_cast %185 : i32 to index
    %c0_55 = arith.constant 0 : index
    %217 = vector.load %arg8[%216, %c0_55] : memref<64x128xf32, #tpu.memory_space<vmem>>, vector<8x128xf32>
    tpu.vector_store %arg8[%216, %c0_55], %215 {strides = array<i32>} : memref<64x128xf32, #tpu.memory_space<vmem>>, vector<8x128xf32>,
    %c6_i32 = arith.constant 6 : i32
    %c8_i32_56 = arith.constant 8 : i32
    %218 = arith.muli %c6_i32, %c8_i32_56 : i32
    %219 = tpu.assume_multiple %218, 8 : i32
    %220 = arith.index_cast %219 : i32 to index
    %c0_57 = arith.constant 0 : index
    %221 = vector.load %arg9[%220, %c0_57] : memref<64x512xf32, #tpu.memory_space<vmem>>, vector<8x512xf32>
    %222 = arith.truncf %215 : vector<8x128xf32> to vector<8x128xbf16>
    %cst_58 = arith.constant dense<0.000000e+00> : vector<8x512xf32>
    %223 = tpu.matmul %222, %11, %cst_58 {dimension_numbers = #tpu.dot_dimension_numbers<[1], [0], [0], [1], [0, 0, 1, 1], [], []>} : vector<8x128xbf16>, vector<128x512xbf16>, vector<8x512xf32> -> vector<8x512xf32>
    %224 = arith.addf %221, %223 : vector<8x512xf32>
    %225 = vector.extract_strided_slice %224 {offsets = [0, 0], sizes = [8, 128], strides = [1, 1]} : vector<8x512xf32> to vector<8x128xf32>
    %226 = arith.negf %225 : vector<8x128xf32>
    %227 = math.exp %226 : vector<8x128xf32>
    %cst_59 = arith.constant 1.000000e+00 : f32
    %228 = vector.broadcast %cst_59 : f32 to vector<8x128xf32>
    %229 = arith.addf %228, %227 : vector<8x128xf32>
    %230 = arith.divf %228, %229 : vector<8x128xf32>
    %231 = vector.extract_strided_slice %224 {offsets = [0, 128], sizes = [8, 128], strides = [1, 1]} : vector<8x512xf32> to vector<8x128xf32>
    %232 = arith.negf %231 : vector<8x128xf32>
    %233 = math.exp %232 : vector<8x128xf32>
    %cst_60 = arith.constant 1.000000e+00 : f32
    %234 = vector.broadcast %cst_60 : f32 to vector<8x128xf32>
    %235 = arith.addf %234, %233 : vector<8x128xf32>
    %236 = arith.divf %234, %235 : vector<8x128xf32>
    %237 = vector.extract_strided_slice %224 {offsets = [0, 256], sizes = [8, 128], strides = [1, 1]} : vector<8x512xf32> to vector<8x128xf32>
    %238 = math.tanh %237 : vector<8x128xf32>
    %239 = vector.extract_strided_slice %224 {offsets = [0, 384], sizes = [8, 128], strides = [1, 1]} : vector<8x512xf32> to vector<8x128xf32>
    %240 = arith.negf %239 : vector<8x128xf32>
    %241 = math.exp %240 : vector<8x128xf32>
    %cst_61 = arith.constant 1.000000e+00 : f32
    %242 = vector.broadcast %cst_61 : f32 to vector<8x128xf32>
    %243 = arith.addf %242, %241 : vector<8x128xf32>
    %244 = arith.divf %242, %243 : vector<8x128xf32>
    %245 = arith.mulf %236, %213 : vector<8x128xf32>
    %246 = arith.mulf %230, %238 : vector<8x128xf32>
    %247 = arith.addf %245, %246 : vector<8x128xf32>
    %248 = math.tanh %247 : vector<8x128xf32>
    %249 = arith.mulf %244, %248 : vector<8x128xf32>
    %250 = arith.index_cast %219 : i32 to index
    %c0_62 = arith.constant 0 : index
    %251 = vector.load %arg8[%250, %c0_62] : memref<64x128xf32, #tpu.memory_space<vmem>>, vector<8x128xf32>
    tpu.vector_store %arg8[%250, %c0_62], %249 {strides = array<i32>} : memref<64x128xf32, #tpu.memory_space<vmem>>, vector<8x128xf32>,
    %c7_i32 = arith.constant 7 : i32
    %c8_i32_63 = arith.constant 8 : i32
    %252 = arith.muli %c7_i32, %c8_i32_63 : i32
    %253 = tpu.assume_multiple %252, 8 : i32
    %254 = arith.index_cast %253 : i32 to index
    %c0_64 = arith.constant 0 : index
    %255 = vector.load %arg9[%254, %c0_64] : memref<64x512xf32, #tpu.memory_space<vmem>>, vector<8x512xf32>
    %256 = arith.truncf %249 : vector<8x128xf32> to vector<8x128xbf16>
    %cst_65 = arith.constant dense<0.000000e+00> : vector<8x512xf32>
    %257 = tpu.matmul %256, %11, %cst_65 {dimension_numbers = #tpu.dot_dimension_numbers<[1], [0], [0], [1], [0, 0, 1, 1], [], []>} : vector<8x128xbf16>, vector<128x512xbf16>, vector<8x512xf32> -> vector<8x512xf32>
    %258 = arith.addf %255, %257 : vector<8x512xf32>
    %259 = vector.extract_strided_slice %258 {offsets = [0, 0], sizes = [8, 128], strides = [1, 1]} : vector<8x512xf32> to vector<8x128xf32>
    %260 = arith.negf %259 : vector<8x128xf32>
    %261 = math.exp %260 : vector<8x128xf32>
    %cst_66 = arith.constant 1.000000e+00 : f32
    %262 = vector.broadcast %cst_66 : f32 to vector<8x128xf32>
    %263 = arith.addf %262, %261 : vector<8x128xf32>
    %264 = arith.divf %262, %263 : vector<8x128xf32>
    %265 = vector.extract_strided_slice %258 {offsets = [0, 128], sizes = [8, 128], strides = [1, 1]} : vector<8x512xf32> to vector<8x128xf32>
    %266 = arith.negf %265 : vector<8x128xf32>
    %267 = math.exp %266 : vector<8x128xf32>
    %cst_67 = arith.constant 1.000000e+00 : f32
    %268 = vector.broadcast %cst_67 : f32 to vector<8x128xf32>
    %269 = arith.addf %268, %267 : vector<8x128xf32>
    %270 = arith.divf %268, %269 : vector<8x128xf32>
    %271 = vector.extract_strided_slice %258 {offsets = [0, 256], sizes = [8, 128], strides = [1, 1]} : vector<8x512xf32> to vector<8x128xf32>
    %272 = math.tanh %271 : vector<8x128xf32>
    %273 = vector.extract_strided_slice %258 {offsets = [0, 384], sizes = [8, 128], strides = [1, 1]} : vector<8x512xf32> to vector<8x128xf32>
    %274 = arith.negf %273 : vector<8x128xf32>
    %275 = math.exp %274 : vector<8x128xf32>
    %cst_68 = arith.constant 1.000000e+00 : f32
    %276 = vector.broadcast %cst_68 : f32 to vector<8x128xf32>
    %277 = arith.addf %276, %275 : vector<8x128xf32>
    %278 = arith.divf %276, %277 : vector<8x128xf32>
    %279 = arith.mulf %270, %247 : vector<8x128xf32>
    %280 = arith.mulf %264, %272 : vector<8x128xf32>
    %281 = arith.addf %279, %280 : vector<8x128xf32>
    %282 = math.tanh %281 : vector<8x128xf32>
    %283 = arith.mulf %278, %282 : vector<8x128xf32>
    %284 = arith.index_cast %253 : i32 to index
    %c0_69 = arith.constant 0 : index
    %285 = vector.load %arg8[%284, %c0_69] : memref<64x128xf32, #tpu.memory_space<vmem>>, vector<8x128xf32>
    tpu.vector_store %arg8[%284, %c0_69], %283 {strides = array<i32>} : memref<64x128xf32, #tpu.memory_space<vmem>>, vector<8x128xf32>,
    %c8_i32_70 = arith.constant 8 : i32
    %c0_71 = arith.constant 0 : index
    %c0_72 = arith.constant 0 : index
    %286 = vector.load %arg8[%c0_71, %c0_72] : memref<64x128xf32, #tpu.memory_space<vmem>>, vector<64x128xf32>
    %287 = arith.truncf %286 : vector<64x128xf32> to vector<64x128xbf16>
    %c1 = arith.constant 1 : index
    %c0_73 = arith.constant 0 : index
    %c0_74 = arith.constant 0 : index
    %288 = vector.load %arg2[%c1, %c0_73, %c0_74] : memref<2x128x512xbf16, #tpu.memory_space<vmem>>, vector<1x128x512xbf16>
    %289 = vector.shape_cast %288 : vector<1x128x512xbf16> to vector<128x512xbf16>
    %cst_75 = arith.constant dense<0.000000e+00> : vector<64x512xf32>
    %290 = tpu.matmul %287, %289, %cst_75 {dimension_numbers = #tpu.dot_dimension_numbers<[1], [0], [0], [1], [0, 0, 1, 1], [], []>} : vector<64x128xbf16>, vector<128x512xbf16>, vector<64x512xf32> -> vector<64x512xf32>
    %c1_76 = arith.constant 1 : index
    %c0_77 = arith.constant 0 : index
    %c0_78 = arith.constant 0 : index
    %291 = vector.load %arg4[%c1_76, %c0_77, %c0_78] : memref<2x1x512xf32, #tpu.memory_space<vmem>>, vector<1x1x512xf32>
    %292 = vector.shape_cast %291 : vector<1x1x512xf32> to vector<1x512xf32>
    %293 = vector.broadcast %292 : vector<1x512xf32> to vector<64x512xf32>
    %294 = arith.addf %290, %293 : vector<64x512xf32>
    %c0_79 = arith.constant 0 : index
    %c0_80 = arith.constant 0 : index
    %295 = vector.load %arg9[%c0_79, %c0_80] : memref<64x512xf32, #tpu.memory_space<vmem>>, vector<64x512xf32>
    tpu.vector_store %arg9[%c0_79, %c0_80], %294 {strides = array<i32>} : memref<64x512xf32, #tpu.memory_space<vmem>>, vector<64x512xf32>,
    %c1_81 = arith.constant 1 : index
    %c0_82 = arith.constant 0 : index
    %c0_83 = arith.constant 0 : index
    %296 = vector.load %arg3[%c1_81, %c0_82, %c0_83] : memref<2x128x512xbf16, #tpu.memory_space<vmem>>, vector<1x128x512xbf16>
    %297 = vector.shape_cast %296 : vector<1x128x512xbf16> to vector<128x512xbf16>
    %cst_84 = arith.constant 0.000000e+00 : f32
    %298 = vector.broadcast %cst_84 : f32 to vector<8x128xf32>
    %cst_85 = arith.constant 0.000000e+00 : f32
    %299 = vector.broadcast %cst_85 : f32 to vector<8x128xf32>
    %c0_i32_86 = arith.constant 0 : i32
    %c8_i32_87 = arith.constant 8 : i32
    %300 = arith.muli %c0_i32_86, %c8_i32_87 : i32
    %301 = tpu.assume_multiple %300, 8 : i32
    %302 = arith.index_cast %301 : i32 to index
    %c0_88 = arith.constant 0 : index
    %303 = vector.load %arg9[%302, %c0_88] : memref<64x512xf32, #tpu.memory_space<vmem>>, vector<8x512xf32>
    %304 = arith.truncf %298 : vector<8x128xf32> to vector<8x128xbf16>
    %cst_89 = arith.constant dense<0.000000e+00> : vector<8x512xf32>
    %305 = tpu.matmul %304, %297, %cst_89 {dimension_numbers = #tpu.dot_dimension_numbers<[1], [0], [0], [1], [0, 0, 1, 1], [], []>} : vector<8x128xbf16>, vector<128x512xbf16>, vector<8x512xf32> -> vector<8x512xf32>
    %306 = arith.addf %303, %305 : vector<8x512xf32>
    %307 = vector.extract_strided_slice %306 {offsets = [0, 0], sizes = [8, 128], strides = [1, 1]} : vector<8x512xf32> to vector<8x128xf32>
    %308 = arith.negf %307 : vector<8x128xf32>
    %309 = math.exp %308 : vector<8x128xf32>
    %cst_90 = arith.constant 1.000000e+00 : f32
    %310 = vector.broadcast %cst_90 : f32 to vector<8x128xf32>
    %311 = arith.addf %310, %309 : vector<8x128xf32>
    %312 = arith.divf %310, %311 : vector<8x128xf32>
    %313 = vector.extract_strided_slice %306 {offsets = [0, 128], sizes = [8, 128], strides = [1, 1]} : vector<8x512xf32> to vector<8x128xf32>
    %314 = arith.negf %313 : vector<8x128xf32>
    %315 = math.exp %314 : vector<8x128xf32>
    %cst_91 = arith.constant 1.000000e+00 : f32
    %316 = vector.broadcast %cst_91 : f32 to vector<8x128xf32>
    %317 = arith.addf %316, %315 : vector<8x128xf32>
    %318 = arith.divf %316, %317 : vector<8x128xf32>
    %319 = vector.extract_strided_slice %306 {offsets = [0, 256], sizes = [8, 128], strides = [1, 1]} : vector<8x512xf32> to vector<8x128xf32>
    %320 = math.tanh %319 : vector<8x128xf32>
    %321 = vector.extract_strided_slice %306 {offsets = [0, 384], sizes = [8, 128], strides = [1, 1]} : vector<8x512xf32> to vector<8x128xf32>
    %322 = arith.negf %321 : vector<8x128xf32>
    %323 = math.exp %322 : vector<8x128xf32>
    %cst_92 = arith.constant 1.000000e+00 : f32
    %324 = vector.broadcast %cst_92 : f32 to vector<8x128xf32>
    %325 = arith.addf %324, %323 : vector<8x128xf32>
    %326 = arith.divf %324, %325 : vector<8x128xf32>
    %327 = arith.mulf %318, %299 : vector<8x128xf32>
    %328 = arith.mulf %312, %320 : vector<8x128xf32>
    %329 = arith.addf %327, %328 : vector<8x128xf32>
    %330 = math.tanh %329 : vector<8x128xf32>
    %331 = arith.mulf %326, %330 : vector<8x128xf32>
    %332 = arith.index_cast %301 : i32 to index
    %c0_93 = arith.constant 0 : index
    %333 = vector.load %arg8[%332, %c0_93] : memref<64x128xf32, #tpu.memory_space<vmem>>, vector<8x128xf32>
    tpu.vector_store %arg8[%332, %c0_93], %331 {strides = array<i32>} : memref<64x128xf32, #tpu.memory_space<vmem>>, vector<8x128xf32>,
    %c1_i32_94 = arith.constant 1 : i32
    %c8_i32_95 = arith.constant 8 : i32
    %334 = arith.muli %c1_i32_94, %c8_i32_95 : i32
    %335 = tpu.assume_multiple %334, 8 : i32
    %336 = arith.index_cast %335 : i32 to index
    %c0_96 = arith.constant 0 : index
    %337 = vector.load %arg9[%336, %c0_96] : memref<64x512xf32, #tpu.memory_space<vmem>>, vector<8x512xf32>
    %338 = arith.truncf %331 : vector<8x128xf32> to vector<8x128xbf16>
    %cst_97 = arith.constant dense<0.000000e+00> : vector<8x512xf32>
    %339 = tpu.matmul %338, %297, %cst_97 {dimension_numbers = #tpu.dot_dimension_numbers<[1], [0], [0], [1], [0, 0, 1, 1], [], []>} : vector<8x128xbf16>, vector<128x512xbf16>, vector<8x512xf32> -> vector<8x512xf32>
    %340 = arith.addf %337, %339 : vector<8x512xf32>
    %341 = vector.extract_strided_slice %340 {offsets = [0, 0], sizes = [8, 128], strides = [1, 1]} : vector<8x512xf32> to vector<8x128xf32>
    %342 = arith.negf %341 : vector<8x128xf32>
    %343 = math.exp %342 : vector<8x128xf32>
    %cst_98 = arith.constant 1.000000e+00 : f32
    %344 = vector.broadcast %cst_98 : f32 to vector<8x128xf32>
    %345 = arith.addf %344, %343 : vector<8x128xf32>
    %346 = arith.divf %344, %345 : vector<8x128xf32>
    %347 = vector.extract_strided_slice %340 {offsets = [0, 128], sizes = [8, 128], strides = [1, 1]} : vector<8x512xf32> to vector<8x128xf32>
    %348 = arith.negf %347 : vector<8x128xf32>
    %349 = math.exp %348 : vector<8x128xf32>
    %cst_99 = arith.constant 1.000000e+00 : f32
    %350 = vector.broadcast %cst_99 : f32 to vector<8x128xf32>
    %351 = arith.addf %350, %349 : vector<8x128xf32>
    %352 = arith.divf %350, %351 : vector<8x128xf32>
    %353 = vector.extract_strided_slice %340 {offsets = [0, 256], sizes = [8, 128], strides = [1, 1]} : vector<8x512xf32> to vector<8x128xf32>
    %354 = math.tanh %353 : vector<8x128xf32>
    %355 = vector.extract_strided_slice %340 {offsets = [0, 384], sizes = [8, 128], strides = [1, 1]} : vector<8x512xf32> to vector<8x128xf32>
    %356 = arith.negf %355 : vector<8x128xf32>
    %357 = math.exp %356 : vector<8x128xf32>
    %cst_100 = arith.constant 1.000000e+00 : f32
    %358 = vector.broadcast %cst_100 : f32 to vector<8x128xf32>
    %359 = arith.addf %358, %357 : vector<8x128xf32>
    %360 = arith.divf %358, %359 : vector<8x128xf32>
    %361 = arith.mulf %352, %329 : vector<8x128xf32>
    %362 = arith.mulf %346, %354 : vector<8x128xf32>
    %363 = arith.addf %361, %362 : vector<8x128xf32>
    %364 = math.tanh %363 : vector<8x128xf32>
    %365 = arith.mulf %360, %364 : vector<8x128xf32>
    %366 = arith.index_cast %335 : i32 to index
    %c0_101 = arith.constant 0 : index
    %367 = vector.load %arg8[%366, %c0_101] : memref<64x128xf32, #tpu.memory_space<vmem>>, vector<8x128xf32>
    tpu.vector_store %arg8[%366, %c0_101], %365 {strides = array<i32>} : memref<64x128xf32, #tpu.memory_space<vmem>>, vector<8x128xf32>,
    %c2_i32_102 = arith.constant 2 : i32
    %c8_i32_103 = arith.constant 8 : i32
    %368 = arith.muli %c2_i32_102, %c8_i32_103 : i32
    %369 = tpu.assume_multiple %368, 8 : i32
    %370 = arith.index_cast %369 : i32 to index
    %c0_104 = arith.constant 0 : index
    %371 = vector.load %arg9[%370, %c0_104] : memref<64x512xf32, #tpu.memory_space<vmem>>, vector<8x512xf32>
    %372 = arith.truncf %365 : vector<8x128xf32> to vector<8x128xbf16>
    %cst_105 = arith.constant dense<0.000000e+00> : vector<8x512xf32>
    %373 = tpu.matmul %372, %297, %cst_105 {dimension_numbers = #tpu.dot_dimension_numbers<[1], [0], [0], [1], [0, 0, 1, 1], [], []>} : vector<8x128xbf16>, vector<128x512xbf16>, vector<8x512xf32> -> vector<8x512xf32>
    %374 = arith.addf %371, %373 : vector<8x512xf32>
    %375 = vector.extract_strided_slice %374 {offsets = [0, 0], sizes = [8, 128], strides = [1, 1]} : vector<8x512xf32> to vector<8x128xf32>
    %376 = arith.negf %375 : vector<8x128xf32>
    %377 = math.exp %376 : vector<8x128xf32>
    %cst_106 = arith.constant 1.000000e+00 : f32
    %378 = vector.broadcast %cst_106 : f32 to vector<8x128xf32>
    %379 = arith.addf %378, %377 : vector<8x128xf32>
    %380 = arith.divf %378, %379 : vector<8x128xf32>
    %381 = vector.extract_strided_slice %374 {offsets = [0, 128], sizes = [8, 128], strides = [1, 1]} : vector<8x512xf32> to vector<8x128xf32>
    %382 = arith.negf %381 : vector<8x128xf32>
    %383 = math.exp %382 : vector<8x128xf32>
    %cst_107 = arith.constant 1.000000e+00 : f32
    %384 = vector.broadcast %cst_107 : f32 to vector<8x128xf32>
    %385 = arith.addf %384, %383 : vector<8x128xf32>
    %386 = arith.divf %384, %385 : vector<8x128xf32>
    %387 = vector.extract_strided_slice %374 {offsets = [0, 256], sizes = [8, 128], strides = [1, 1]} : vector<8x512xf32> to vector<8x128xf32>
    %388 = math.tanh %387 : vector<8x128xf32>
    %389 = vector.extract_strided_slice %374 {offsets = [0, 384], sizes = [8, 128], strides = [1, 1]} : vector<8x512xf32> to vector<8x128xf32>
    %390 = arith.negf %389 : vector<8x128xf32>
    %391 = math.exp %390 : vector<8x128xf32>
    %cst_108 = arith.constant 1.000000e+00 : f32
    %392 = vector.broadcast %cst_108 : f32 to vector<8x128xf32>
    %393 = arith.addf %392, %391 : vector<8x128xf32>
    %394 = arith.divf %392, %393 : vector<8x128xf32>
    %395 = arith.mulf %386, %363 : vector<8x128xf32>
    %396 = arith.mulf %380, %388 : vector<8x128xf32>
    %397 = arith.addf %395, %396 : vector<8x128xf32>
    %398 = math.tanh %397 : vector<8x128xf32>
    %399 = arith.mulf %394, %398 : vector<8x128xf32>
    %400 = arith.index_cast %369 : i32 to index
    %c0_109 = arith.constant 0 : index
    %401 = vector.load %arg8[%400, %c0_109] : memref<64x128xf32, #tpu.memory_space<vmem>>, vector<8x128xf32>
    tpu.vector_store %arg8[%400, %c0_109], %399 {strides = array<i32>} : memref<64x128xf32, #tpu.memory_space<vmem>>, vector<8x128xf32>,
    %c3_i32_110 = arith.constant 3 : i32
    %c8_i32_111 = arith.constant 8 : i32
    %402 = arith.muli %c3_i32_110, %c8_i32_111 : i32
    %403 = tpu.assume_multiple %402, 8 : i32
    %404 = arith.index_cast %403 : i32 to index
    %c0_112 = arith.constant 0 : index
    %405 = vector.load %arg9[%404, %c0_112] : memref<64x512xf32, #tpu.memory_space<vmem>>, vector<8x512xf32>
    %406 = arith.truncf %399 : vector<8x128xf32> to vector<8x128xbf16>
    %cst_113 = arith.constant dense<0.000000e+00> : vector<8x512xf32>
    %407 = tpu.matmul %406, %297, %cst_113 {dimension_numbers = #tpu.dot_dimension_numbers<[1], [0], [0], [1], [0, 0, 1, 1], [], []>} : vector<8x128xbf16>, vector<128x512xbf16>, vector<8x512xf32> -> vector<8x512xf32>
    %408 = arith.addf %405, %407 : vector<8x512xf32>
    %409 = vector.extract_strided_slice %408 {offsets = [0, 0], sizes = [8, 128], strides = [1, 1]} : vector<8x512xf32> to vector<8x128xf32>
    %410 = arith.negf %409 : vector<8x128xf32>
    %411 = math.exp %410 : vector<8x128xf32>
    %cst_114 = arith.constant 1.000000e+00 : f32
    %412 = vector.broadcast %cst_114 : f32 to vector<8x128xf32>
    %413 = arith.addf %412, %411 : vector<8x128xf32>
    %414 = arith.divf %412, %413 : vector<8x128xf32>
    %415 = vector.extract_strided_slice %408 {offsets = [0, 128], sizes = [8, 128], strides = [1, 1]} : vector<8x512xf32> to vector<8x128xf32>
    %416 = arith.negf %415 : vector<8x128xf32>
    %417 = math.exp %416 : vector<8x128xf32>
    %cst_115 = arith.constant 1.000000e+00 : f32
    %418 = vector.broadcast %cst_115 : f32 to vector<8x128xf32>
    %419 = arith.addf %418, %417 : vector<8x128xf32>
    %420 = arith.divf %418, %419 : vector<8x128xf32>
    %421 = vector.extract_strided_slice %408 {offsets = [0, 256], sizes = [8, 128], strides = [1, 1]} : vector<8x512xf32> to vector<8x128xf32>
    %422 = math.tanh %421 : vector<8x128xf32>
    %423 = vector.extract_strided_slice %408 {offsets = [0, 384], sizes = [8, 128], strides = [1, 1]} : vector<8x512xf32> to vector<8x128xf32>
    %424 = arith.negf %423 : vector<8x128xf32>
    %425 = math.exp %424 : vector<8x128xf32>
    %cst_116 = arith.constant 1.000000e+00 : f32
    %426 = vector.broadcast %cst_116 : f32 to vector<8x128xf32>
    %427 = arith.addf %426, %425 : vector<8x128xf32>
    %428 = arith.divf %426, %427 : vector<8x128xf32>
    %429 = arith.mulf %420, %397 : vector<8x128xf32>
    %430 = arith.mulf %414, %422 : vector<8x128xf32>
    %431 = arith.addf %429, %430 : vector<8x128xf32>
    %432 = math.tanh %431 : vector<8x128xf32>
    %433 = arith.mulf %428, %432 : vector<8x128xf32>
    %434 = arith.index_cast %403 : i32 to index
    %c0_117 = arith.constant 0 : index
    %435 = vector.load %arg8[%434, %c0_117] : memref<64x128xf32, #tpu.memory_space<vmem>>, vector<8x128xf32>
    tpu.vector_store %arg8[%434, %c0_117], %433 {strides = array<i32>} : memref<64x128xf32, #tpu.memory_space<vmem>>, vector<8x128xf32>,
    %c4_i32_118 = arith.constant 4 : i32
    %c8_i32_119 = arith.constant 8 : i32
    %436 = arith.muli %c4_i32_118, %c8_i32_119 : i32
    %437 = tpu.assume_multiple %436, 8 : i32
    %438 = arith.index_cast %437 : i32 to index
    %c0_120 = arith.constant 0 : index
    %439 = vector.load %arg9[%438, %c0_120] : memref<64x512xf32, #tpu.memory_space<vmem>>, vector<8x512xf32>
    %440 = arith.truncf %433 : vector<8x128xf32> to vector<8x128xbf16>
    %cst_121 = arith.constant dense<0.000000e+00> : vector<8x512xf32>
    %441 = tpu.matmul %440, %297, %cst_121 {dimension_numbers = #tpu.dot_dimension_numbers<[1], [0], [0], [1], [0, 0, 1, 1], [], []>} : vector<8x128xbf16>, vector<128x512xbf16>, vector<8x512xf32> -> vector<8x512xf32>
    %442 = arith.addf %439, %441 : vector<8x512xf32>
    %443 = vector.extract_strided_slice %442 {offsets = [0, 0], sizes = [8, 128], strides = [1, 1]} : vector<8x512xf32> to vector<8x128xf32>
    %444 = arith.negf %443 : vector<8x128xf32>
    %445 = math.exp %444 : vector<8x128xf32>
    %cst_122 = arith.constant 1.000000e+00 : f32
    %446 = vector.broadcast %cst_122 : f32 to vector<8x128xf32>
    %447 = arith.addf %446, %445 : vector<8x128xf32>
    %448 = arith.divf %446, %447 : vector<8x128xf32>
    %449 = vector.extract_strided_slice %442 {offsets = [0, 128], sizes = [8, 128], strides = [1, 1]} : vector<8x512xf32> to vector<8x128xf32>
    %450 = arith.negf %449 : vector<8x128xf32>
    %451 = math.exp %450 : vector<8x128xf32>
    %cst_123 = arith.constant 1.000000e+00 : f32
    %452 = vector.broadcast %cst_123 : f32 to vector<8x128xf32>
    %453 = arith.addf %452, %451 : vector<8x128xf32>
    %454 = arith.divf %452, %453 : vector<8x128xf32>
    %455 = vector.extract_strided_slice %442 {offsets = [0, 256], sizes = [8, 128], strides = [1, 1]} : vector<8x512xf32> to vector<8x128xf32>
    %456 = math.tanh %455 : vector<8x128xf32>
    %457 = vector.extract_strided_slice %442 {offsets = [0, 384], sizes = [8, 128], strides = [1, 1]} : vector<8x512xf32> to vector<8x128xf32>
    %458 = arith.negf %457 : vector<8x128xf32>
    %459 = math.exp %458 : vector<8x128xf32>
    %cst_124 = arith.constant 1.000000e+00 : f32
    %460 = vector.broadcast %cst_124 : f32 to vector<8x128xf32>
    %461 = arith.addf %460, %459 : vector<8x128xf32>
    %462 = arith.divf %460, %461 : vector<8x128xf32>
    %463 = arith.mulf %454, %431 : vector<8x128xf32>
    %464 = arith.mulf %448, %456 : vector<8x128xf32>
    %465 = arith.addf %463, %464 : vector<8x128xf32>
    %466 = math.tanh %465 : vector<8x128xf32>
    %467 = arith.mulf %462, %466 : vector<8x128xf32>
    %468 = arith.index_cast %437 : i32 to index
    %c0_125 = arith.constant 0 : index
    %469 = vector.load %arg8[%468, %c0_125] : memref<64x128xf32, #tpu.memory_space<vmem>>, vector<8x128xf32>
    tpu.vector_store %arg8[%468, %c0_125], %467 {strides = array<i32>} : memref<64x128xf32, #tpu.memory_space<vmem>>, vector<8x128xf32>,
    %c5_i32_126 = arith.constant 5 : i32
    %c8_i32_127 = arith.constant 8 : i32
    %470 = arith.muli %c5_i32_126, %c8_i32_127 : i32
    %471 = tpu.assume_multiple %470, 8 : i32
    %472 = arith.index_cast %471 : i32 to index
    %c0_128 = arith.constant 0 : index
    %473 = vector.load %arg9[%472, %c0_128] : memref<64x512xf32, #tpu.memory_space<vmem>>, vector<8x512xf32>
    %474 = arith.truncf %467 : vector<8x128xf32> to vector<8x128xbf16>
    %cst_129 = arith.constant dense<0.000000e+00> : vector<8x512xf32>
    %475 = tpu.matmul %474, %297, %cst_129 {dimension_numbers = #tpu.dot_dimension_numbers<[1], [0], [0], [1], [0, 0, 1, 1], [], []>} : vector<8x128xbf16>, vector<128x512xbf16>, vector<8x512xf32> -> vector<8x512xf32>
    %476 = arith.addf %473, %475 : vector<8x512xf32>
    %477 = vector.extract_strided_slice %476 {offsets = [0, 0], sizes = [8, 128], strides = [1, 1]} : vector<8x512xf32> to vector<8x128xf32>
    %478 = arith.negf %477 : vector<8x128xf32>
    %479 = math.exp %478 : vector<8x128xf32>
    %cst_130 = arith.constant 1.000000e+00 : f32
    %480 = vector.broadcast %cst_130 : f32 to vector<8x128xf32>
    %481 = arith.addf %480, %479 : vector<8x128xf32>
    %482 = arith.divf %480, %481 : vector<8x128xf32>
    %483 = vector.extract_strided_slice %476 {offsets = [0, 128], sizes = [8, 128], strides = [1, 1]} : vector<8x512xf32> to vector<8x128xf32>
    %484 = arith.negf %483 : vector<8x128xf32>
    %485 = math.exp %484 : vector<8x128xf32>
    %cst_131 = arith.constant 1.000000e+00 : f32
    %486 = vector.broadcast %cst_131 : f32 to vector<8x128xf32>
    %487 = arith.addf %486, %485 : vector<8x128xf32>
    %488 = arith.divf %486, %487 : vector<8x128xf32>
    %489 = vector.extract_strided_slice %476 {offsets = [0, 256], sizes = [8, 128], strides = [1, 1]} : vector<8x512xf32> to vector<8x128xf32>
    %490 = math.tanh %489 : vector<8x128xf32>
    %491 = vector.extract_strided_slice %476 {offsets = [0, 384], sizes = [8, 128], strides = [1, 1]} : vector<8x512xf32> to vector<8x128xf32>
    %492 = arith.negf %491 : vector<8x128xf32>
    %493 = math.exp %492 : vector<8x128xf32>
    %cst_132 = arith.constant 1.000000e+00 : f32
    %494 = vector.broadcast %cst_132 : f32 to vector<8x128xf32>
    %495 = arith.addf %494, %493 : vector<8x128xf32>
    %496 = arith.divf %494, %495 : vector<8x128xf32>
    %497 = arith.mulf %488, %465 : vector<8x128xf32>
    %498 = arith.mulf %482, %490 : vector<8x128xf32>
    %499 = arith.addf %497, %498 : vector<8x128xf32>
    %500 = math.tanh %499 : vector<8x128xf32>
    %501 = arith.mulf %496, %500 : vector<8x128xf32>
    %502 = arith.index_cast %471 : i32 to index
    %c0_133 = arith.constant 0 : index
    %503 = vector.load %arg8[%502, %c0_133] : memref<64x128xf32, #tpu.memory_space<vmem>>, vector<8x128xf32>
    tpu.vector_store %arg8[%502, %c0_133], %501 {strides = array<i32>} : memref<64x128xf32, #tpu.memory_space<vmem>>, vector<8x128xf32>,
    %c6_i32_134 = arith.constant 6 : i32
    %c8_i32_135 = arith.constant 8 : i32
    %504 = arith.muli %c6_i32_134, %c8_i32_135 : i32
    %505 = tpu.assume_multiple %504, 8 : i32
    %506 = arith.index_cast %505 : i32 to index
    %c0_136 = arith.constant 0 : index
    %507 = vector.load %arg9[%506, %c0_136] : memref<64x512xf32, #tpu.memory_space<vmem>>, vector<8x512xf32>
    %508 = arith.truncf %501 : vector<8x128xf32> to vector<8x128xbf16>
    %cst_137 = arith.constant dense<0.000000e+00> : vector<8x512xf32>
    %509 = tpu.matmul %508, %297, %cst_137 {dimension_numbers = #tpu.dot_dimension_numbers<[1], [0], [0], [1], [0, 0, 1, 1], [], []>} : vector<8x128xbf16>, vector<128x512xbf16>, vector<8x512xf32> -> vector<8x512xf32>
    %510 = arith.addf %507, %509 : vector<8x512xf32>
    %511 = vector.extract_strided_slice %510 {offsets = [0, 0], sizes = [8, 128], strides = [1, 1]} : vector<8x512xf32> to vector<8x128xf32>
    %512 = arith.negf %511 : vector<8x128xf32>
    %513 = math.exp %512 : vector<8x128xf32>
    %cst_138 = arith.constant 1.000000e+00 : f32
    %514 = vector.broadcast %cst_138 : f32 to vector<8x128xf32>
    %515 = arith.addf %514, %513 : vector<8x128xf32>
    %516 = arith.divf %514, %515 : vector<8x128xf32>
    %517 = vector.extract_strided_slice %510 {offsets = [0, 128], sizes = [8, 128], strides = [1, 1]} : vector<8x512xf32> to vector<8x128xf32>
    %518 = arith.negf %517 : vector<8x128xf32>
    %519 = math.exp %518 : vector<8x128xf32>
    %cst_139 = arith.constant 1.000000e+00 : f32
    %520 = vector.broadcast %cst_139 : f32 to vector<8x128xf32>
    %521 = arith.addf %520, %519 : vector<8x128xf32>
    %522 = arith.divf %520, %521 : vector<8x128xf32>
    %523 = vector.extract_strided_slice %510 {offsets = [0, 256], sizes = [8, 128], strides = [1, 1]} : vector<8x512xf32> to vector<8x128xf32>
    %524 = math.tanh %523 : vector<8x128xf32>
    %525 = vector.extract_strided_slice %510 {offsets = [0, 384], sizes = [8, 128], strides = [1, 1]} : vector<8x512xf32> to vector<8x128xf32>
    %526 = arith.negf %525 : vector<8x128xf32>
    %527 = math.exp %526 : vector<8x128xf32>
    %cst_140 = arith.constant 1.000000e+00 : f32
    %528 = vector.broadcast %cst_140 : f32 to vector<8x128xf32>
    %529 = arith.addf %528, %527 : vector<8x128xf32>
    %530 = arith.divf %528, %529 : vector<8x128xf32>
    %531 = arith.mulf %522, %499 : vector<8x128xf32>
    %532 = arith.mulf %516, %524 : vector<8x128xf32>
    %533 = arith.addf %531, %532 : vector<8x128xf32>
    %534 = math.tanh %533 : vector<8x128xf32>
    %535 = arith.mulf %530, %534 : vector<8x128xf32>
    %536 = arith.index_cast %505 : i32 to index
    %c0_141 = arith.constant 0 : index
    %537 = vector.load %arg8[%536, %c0_141] : memref<64x128xf32, #tpu.memory_space<vmem>>, vector<8x128xf32>
    tpu.vector_store %arg8[%536, %c0_141], %535 {strides = array<i32>} : memref<64x128xf32, #tpu.memory_space<vmem>>, vector<8x128xf32>,
    %c7_i32_142 = arith.constant 7 : i32
    %c8_i32_143 = arith.constant 8 : i32
    %538 = arith.muli %c7_i32_142, %c8_i32_143 : i32
    %539 = tpu.assume_multiple %538, 8 : i32
    %540 = arith.index_cast %539 : i32 to index
    %c0_144 = arith.constant 0 : index
    %541 = vector.load %arg9[%540, %c0_144] : memref<64x512xf32, #tpu.memory_space<vmem>>, vector<8x512xf32>
    %542 = arith.truncf %535 : vector<8x128xf32> to vector<8x128xbf16>
    %cst_145 = arith.constant dense<0.000000e+00> : vector<8x512xf32>
    %543 = tpu.matmul %542, %297, %cst_145 {dimension_numbers = #tpu.dot_dimension_numbers<[1], [0], [0], [1], [0, 0, 1, 1], [], []>} : vector<8x128xbf16>, vector<128x512xbf16>, vector<8x512xf32> -> vector<8x512xf32>
    %544 = arith.addf %541, %543 : vector<8x512xf32>
    %545 = vector.extract_strided_slice %544 {offsets = [0, 0], sizes = [8, 128], strides = [1, 1]} : vector<8x512xf32> to vector<8x128xf32>
    %546 = arith.negf %545 : vector<8x128xf32>
    %547 = math.exp %546 : vector<8x128xf32>
    %cst_146 = arith.constant 1.000000e+00 : f32
    %548 = vector.broadcast %cst_146 : f32 to vector<8x128xf32>
    %549 = arith.addf %548, %547 : vector<8x128xf32>
    %550 = arith.divf %548, %549 : vector<8x128xf32>
    %551 = vector.extract_strided_slice %544 {offsets = [0, 128], sizes = [8, 128], strides = [1, 1]} : vector<8x512xf32> to vector<8x128xf32>
    %552 = arith.negf %551 : vector<8x128xf32>
    %553 = math.exp %552 : vector<8x128xf32>
    %cst_147 = arith.constant 1.000000e+00 : f32
    %554 = vector.broadcast %cst_147 : f32 to vector<8x128xf32>
    %555 = arith.addf %554, %553 : vector<8x128xf32>
    %556 = arith.divf %554, %555 : vector<8x128xf32>
    %557 = vector.extract_strided_slice %544 {offsets = [0, 256], sizes = [8, 128], strides = [1, 1]} : vector<8x512xf32> to vector<8x128xf32>
    %558 = math.tanh %557 : vector<8x128xf32>
    %559 = vector.extract_strided_slice %544 {offsets = [0, 384], sizes = [8, 128], strides = [1, 1]} : vector<8x512xf32> to vector<8x128xf32>
    %560 = arith.negf %559 : vector<8x128xf32>
    %561 = math.exp %560 : vector<8x128xf32>
    %cst_148 = arith.constant 1.000000e+00 : f32
    %562 = vector.broadcast %cst_148 : f32 to vector<8x128xf32>
    %563 = arith.addf %562, %561 : vector<8x128xf32>
    %564 = arith.divf %562, %563 : vector<8x128xf32>
    %565 = arith.mulf %556, %533 : vector<8x128xf32>
    %566 = arith.mulf %550, %558 : vector<8x128xf32>
    %567 = arith.addf %565, %566 : vector<8x128xf32>
    %568 = math.tanh %567 : vector<8x128xf32>
    %569 = arith.mulf %564, %568 : vector<8x128xf32>
    %570 = arith.index_cast %539 : i32 to index
    %c0_149 = arith.constant 0 : index
    %571 = vector.load %arg8[%570, %c0_149] : memref<64x128xf32, #tpu.memory_space<vmem>>, vector<8x128xf32>
    tpu.vector_store %arg8[%570, %c0_149], %569 {strides = array<i32>} : memref<64x128xf32, #tpu.memory_space<vmem>>, vector<8x128xf32>,
    %c8_i32_150 = arith.constant 8 : i32
    %c0_151 = arith.constant 0 : index
    %c0_152 = arith.constant 0 : index
    %572 = vector.load %arg8[%c0_151, %c0_152] : memref<64x128xf32, #tpu.memory_space<vmem>>, vector<64x128xf32>
    %573 = arith.truncf %572 : vector<64x128xf32> to vector<64x128xbf16>
    %c0_153 = arith.constant 0 : index
    %c0_154 = arith.constant 0 : index
    %574 = vector.load %arg5[%c0_153, %c0_154] : memref<128x128xbf16, #tpu.memory_space<vmem>>, vector<128x128xbf16>
    %cst_155 = arith.constant dense<0.000000e+00> : vector<64x128xf32>
    %575 = tpu.matmul %573, %574, %cst_155 {dimension_numbers = #tpu.dot_dimension_numbers<[1], [0], [0], [1], [0, 0, 1, 1], [], []>} : vector<64x128xbf16>, vector<128x128xbf16>, vector<64x128xf32> -> vector<64x128xf32>
    %c0_156 = arith.constant 0 : index
    %c0_157 = arith.constant 0 : index
    %576 = vector.load %arg6[%c0_156, %c0_157] : memref<1x128xf32, #tpu.memory_space<vmem>>, vector<1x128xf32>
    %577 = vector.broadcast %576 : vector<1x128xf32> to vector<64x128xf32>
    %578 = arith.addf %575, %577 : vector<64x128xf32>
    %c0_158 = arith.constant 0 : index
    %c0_159 = arith.constant 0 : index
    %c0_160 = arith.constant 0 : index
    %579 = vector.load %arg7[%c0_158, %c0_159, %c0_160] : memref<1x64x128xf32, #tpu.memory_space<vmem>>, vector<1x64x128xf32>
    %580 = vector.shape_cast %579 : vector<1x64x128xf32> to vector<64x128xf32>
    %581 = vector.shape_cast %578 : vector<64x128xf32> to vector<1x64x128xf32>
    tpu.vector_store %arg7[%c0_158, %c0_159, %c0_160], %581 {strides = array<i32>} : memref<1x64x128xf32, #tpu.memory_space<vmem>>, vector<1x64x128xf32>,
    return
  }
  func.func @transform_0(%arg0: i32) -> (i32, i32, i32) {
    %c0_i32 = arith.constant 0 : i32
    %c0_i32_0 = arith.constant 0 : i32
    %c0_i32_1 = arith.constant 0 : i32
    return %arg0, %c0_i32, %c0_i32_0 : i32, i32, i32
  }
  func.func @transform_1(%arg0: i32) -> (i32, i32, i32) {
    %c0_i32 = arith.constant 0 : i32
    %c0_i32_0 = arith.constant 0 : i32
    %c0_i32_1 = arith.constant 0 : i32
    %c0_i32_2 = arith.constant 0 : i32
    return %c0_i32, %c0_i32_0, %c0_i32_1 : i32, i32, i32
  }
  func.func @transform_2(%arg0: i32) -> (i32, i32, i32) {
    %c0_i32 = arith.constant 0 : i32
    %c0_i32_0 = arith.constant 0 : i32
    %c0_i32_1 = arith.constant 0 : i32
    %c0_i32_2 = arith.constant 0 : i32
    return %c0_i32, %c0_i32_0, %c0_i32_1 : i32, i32, i32
  }
  func.func @transform_3(%arg0: i32) -> (i32, i32, i32) {
    %c0_i32 = arith.constant 0 : i32
    %c0_i32_0 = arith.constant 0 : i32
    %c0_i32_1 = arith.constant 0 : i32
    %c0_i32_2 = arith.constant 0 : i32
    return %c0_i32, %c0_i32_0, %c0_i32_1 : i32, i32, i32
  }
  func.func @transform_4(%arg0: i32) -> (i32, i32) {
    %c0_i32 = arith.constant 0 : i32
    %c0_i32_0 = arith.constant 0 : i32
    %c0_i32_1 = arith.constant 0 : i32
    return %c0_i32, %c0_i32_0 : i32, i32
  }
  func.func @transform_5(%arg0: i32) -> (i32, i32) {
    %c0_i32 = arith.constant 0 : i32
    %c0_i32_0 = arith.constant 0 : i32
    %c0_i32_1 = arith.constant 0 : i32
    return %c0_i32, %c0_i32_0 : i32, i32
  }
  func.func @transform_6(%arg0: i32) -> (i32, i32, i32) {
    %c0_i32 = arith.constant 0 : i32
    %c0_i32_0 = arith.constant 0 : i32
    %c0_i32_1 = arith.constant 0 : i32
    return %arg0, %c0_i32, %c0_i32_0 : i32, i32, i32
  }
}

</mosaic_0001>

<bundles_post_ra>
// kernel: tpu_custom_call.1
= control target key start
LH: loop header
LB: loop body
LE: loop exit
PB: predicated region body
PF: predicated region fallthrough
CT: control target
= control target key end

     0   :  { %11 = vsyncpa [#allocation5], 0  ;;  %s5521_s0 = inlined_call_operand.hbm [shape: bf16[1,64,128], index: 0, kind: input, shape index: {}]   ;;  %s5522_s1 = inlined_call_operand.hbm [shape: bf16[2,128,512], index: 1, kind: input, shape index: {}]   ;;  %s5523_s2 = inlined_call_operand.hbm [shape: bf16[2,128,512], index: 2, kind: input, shape index: {}]   ;;  %s5524_s3 = inlined_call_operand.vmem [shape: f32[2,1,512], index: 3, kind: input, shape index: {}]   ;;  %s5525_s4 = inlined_call_operand.hbm [shape: bf16[128,128], index: 4, kind: input, shape index: {}]   ;;  %s5526_s5 = inlined_call_operand.vmem [shape: f32[1,128], index: 5, kind: input, shape index: {}]   ;;  %s5527_s6 = inlined_call_operand.hbm [shape: f32[1,64,128], index: 6, kind: output, shape index: {}]  }
   0x1   :  { %12 = vsyncpa [#allocation8], 0 }
   0x2   :  { %13 = vsyncpa [#allocation11], 0 }
   0x3   :  { %14 = vsyncpa [#allocation6], 0  ;;  %s4242_s21 = smov [#allocation7]   ;;  %s4124_s25 = scalar_lea.hbm %s5522_s1, 8192 }
   0x4   :  { %s32_s22 = sshll.u32 %s4242_s21, 4  ;;  %p4125_p0 = scmp.ne.s32.totalorder %s5522_s1, %s4124_s25  ;;  %s33_s22 = int_to_ptr.vmem [resolvable:$true] %s32_s22 }
   0x5   :  { %p4128_p1 = scmp.lt.u32.totalorder %s4124_s25, %s5522_s1 }
   0x7   :  { %p4130_p2 = pnand %p4128_p1, %p4125_p0 }
   0x9   :  { %4133 = shalt.err (!%p4130_p2)
}
   0xa   :  { %s4134_s30 = scalar_lea.vmem %s33_s22, 8192  ;;  %p4139_p4 = scmp.lt.s32.totalorder %s33_s22, %s33_s22 }
   0xb   :  { %p4135_p3 = scmp.ne.s32.totalorder %s33_s22, %s4134_s30  ;;  %p4140_p5 = scmp.lt.s32.totalorder %s4134_s30, %s4134_s30 }
   0xd   :  { %p4141_p6 = por %p4140_p5, %p4139_p4 }
   0xf   :  { %p4142_p7 = pnand %p4141_p6, %p4135_p3 }
  0x11   :  { %4145 = shalt.err (!%p4142_p7)
}
  0x12   :  { %s4243_s7 = smov 256   ;;  %s4244_s8 = smov 16  }
  0x13   :  { %38 = dma.hbm_to_vmem [thread:$0]  %s5522_s1, 8192, %s33_s22, [#allocation8], %s4243_s7, %s4243_s7, %s4244_s8  }
  0x14   :  { %s4245_s11 = smov [#allocation4]   ;;  %s4146_s15 = scalar_lea.hbm %s5521_s0, 512 }
  0x15   :  { %s20_s12 = sshll.u32 %s4245_s11, 4  ;;  %p4147_p8 = scmp.ne.s32.totalorder %s5521_s0, %s4146_s15  ;;  %s21_s12 = int_to_ptr.vmem [resolvable:$true] %s20_s12 }
  0x16   :  { %p4150_p9 = scmp.lt.u32.totalorder %s4146_s15, %s5521_s0 }
  0x18   :  { %p4152_p10 = pnand %p4150_p9, %p4147_p8 }
  0x1a   :  { %4155 = shalt.err (!%p4152_p10)
}
  0x1b   :  { %s4156_s20 = scalar_lea.vmem %s21_s12, 512  ;;  %p4161_p12 = scmp.lt.s32.totalorder %s21_s12, %s21_s12 }
  0x1c   :  { %p4157_p11 = scmp.ne.s32.totalorder %s21_s12, %s4156_s20  ;;  %p4162_p13 = scmp.lt.s32.totalorder %s4156_s20, %s4156_s20 }
  0x1e   :  { %p4163_p0 = por %p4162_p13, %p4161_p12 }
  0x20   :  { %p4164_p1 = pnand %p4163_p0, %p4157_p11 }
  0x22   :  { %4167 = shalt.err (!%p4164_p1)
}
  0x23   :  { %s4246_s1 = smov 64   ;;  %s4247_s21 = smov 4  }
  0x24   :  { %26 = dma.hbm_to_vmem [thread:$0]  %s5521_s0, 512, %s21_s12, [#allocation5], %s4246_s1, %s4246_s1, %s4247_s21  }
  0x25   :  { %s4248_s24 = smov [#allocation9]   ;;  %s4249_s26 = smov [#allocation10]  }
  0x26   :  { %s44_s25 = sshll.u32 %s4248_s24, 4  ;;  %s58_s27 = sshll.u32 %s4249_s26, 4  ;;  %s45_s25 = int_to_ptr.vmem [resolvable:$true] %s44_s25  ;;  %s4319_s27 = int_to_ptr.vmem [resolvable:$true] %s58_s27 }
  0x27   :  { %s4168_s30 = scalar_lea.hbm %s5523_s2, 8192 }
  0x28   :  { %p4169_p2 = scmp.ne.s32.totalorder %s5523_s2, %s4168_s30  ;;  %p4172_p3 = scmp.lt.u32.totalorder %s4168_s30, %s5523_s2 }
  0x2a   :  { %p4174_p4 = pnand %p4172_p3, %p4169_p2 }
  0x2c   :  { %4177 = shalt.err (!%p4174_p4)
}
  0x2d   :  { %s4178_s0 = scalar_lea.vmem %s45_s25, 8192  ;;  %p4183_p6 = scmp.lt.s32.totalorder %s45_s25, %s45_s25 }
  0x2e   :  { %p4179_p5 = scmp.ne.s32.totalorder %s45_s25, %s4178_s0  ;;  %p4184_p7 = scmp.lt.s32.totalorder %s4178_s0, %s4178_s0 }
  0x30   :  { %p4185_p8 = por %p4184_p7, %p4183_p6 }
  0x32   :  { %p4186_p9 = pnand %p4185_p8, %p4179_p5 }
  0x34   :  { %4189 = shalt.err (!%p4186_p9)
}
  0x35   :  { %50 = dma.hbm_to_vmem [thread:$0]  %s5523_s2, 8192, %s45_s25, [#allocation8], %s4243_s7, %s4243_s7, %s4244_s8  }
  0x36   :  { %s4190_s17 = scalar_lea.hbm %s5525_s4, 1024 }
  0x37   :  { %p4191_p10 = scmp.ne.s32.totalorder %s5525_s4, %s4190_s17  ;;  %p4194_p11 = scmp.lt.u32.totalorder %s4190_s17, %s5525_s4 }
  0x39   :  { %p4196_p12 = pnand %p4194_p11, %p4191_p10 }
  0x3b   :  { %4199 = shalt.err (!%p4196_p12)
}
  0x3c   :  { %s4200_s23 = scalar_lea.vmem %s4319_s27, 1024  ;;  %p4205_p0 = scmp.lt.s32.totalorder %s4319_s27, %s4319_s27 }
  0x3d   :  { %p4201_p13 = scmp.ne.s32.totalorder %s4319_s27, %s4200_s23  ;;  %p4206_p1 = scmp.lt.s32.totalorder %s4200_s23, %s4200_s23 }
  0x3f   :  { %p4207_p2 = por %p4206_p1, %p4205_p0 }
  0x41   :  { %p4208_p3 = pnand %p4207_p2, %p4201_p13 }
  0x43   :  { %4211 = shalt.err (!%p4208_p3)
}
  0x44   :  { %64 = dma.hbm_to_vmem [thread:$0]  %s5525_s4, 1024, %s4319_s27, [#allocation11], %s4246_s1, %s4246_s1, %s4247_s21  }
  0x45   :  { %4234 = dma.done.wait [#allocation5], 512  }
  0x46   :  { %4235 = vsyncadd [#allocation5], 4294966784 }
  0x47   :  { %4236 = dma.done.wait [#allocation8], 16384  }
  0x48   :  { %4237 = vsyncadd [#allocation8], 4294950912 }
  0x49   :  { %4238 = dma.done.wait [#allocation11], 1024  }
  0x4a   :  { %4239 = vsyncadd [#allocation11], 4294966272  ;;  %v5530_v0 = vmov 0   ;;  %v3600_v1 = vld [vmem:[#allocation7 + $0x4] ss:$16 sps:$4 sm:$0xff]   ;;  %v3655_v39 = vld [vmem:[#allocation4 + $0x8] sm:$0xff]  }
  0x4b   :  { %358 = vmatprep.mubr.bf16.mxu1 %v5530_v0  ;;  %735 = vmatprep.mubr.bf16.mxu0 %v5530_v0  ;;  %v3602_v2 = vld [vmem:[#allocation7] ss:$16 sps:$4 sm:$0xff]   ;;  %v4358_v3 = vld [vmem:[#allocation9 + $0x4] ss:$16 sps:$4 sm:$0xff]   ;;  %v3651_v32 = vld [vmem:[#allocation7 + $0xc] ss:$16 sps:$4 sm:$0xff]  }
  0x4c   :  { %326 = vmatprep.subr.bf16.mxu1 %v3600_v1  ;;  %v4360_v4 = vld [vmem:[#allocation9] ss:$16 sps:$4 sm:$0xff]   ;;  %v3606_v5 = vld [vmem:[#allocation7 + $0x24] ss:$16 sps:$4 sm:$0xff]   ;;  %703 = vmatprep.subr.bf16.mxu0 %v4358_v3  ;;  %v3649_v35 = vld [vmem:[#allocation7 + $0x8] ss:$16 sps:$4 sm:$0xff]  }
  0x4d   :  { %327 = vmatpush1.bf16.msra.mxu1 %v3602_v2  ;;  %v3608_v6 = vld [vmem:[#allocation7 + $0x20] ss:$16 sps:$4 sm:$0xff]   ;;  %v4363_v7 = vld [vmem:[#allocation9 + $0x24] ss:$16 sps:$4 sm:$0xff]   ;;  %704 = vmatpush1.bf16.msra.mxu0 %v4360_v4  ;;  %v3654_v36 = vld [vmem:[#allocation7 + $0x2c] ss:$16 sps:$4 sm:$0xff]  }
  0x4e   :  { %328 = vmatprep.subr.bf16.mxu1 %v3606_v5  ;;  %v4366_v8 = vld [vmem:[#allocation9 + $0x20] ss:$16 sps:$4 sm:$0xff]   ;;  %705 = vmatprep.subr.bf16.mxu0 %v4363_v7  ;;  %v3612_v9 = vld [vmem:[#allocation7 + $0x44] ss:$16 sps:$4 sm:$0xff]   ;;  %v3652_v37 = vld [vmem:[#allocation7 + $0x28] ss:$16 sps:$4 sm:$0xff]  }
  0x4f   :  { %v3614_v10 = vld [vmem:[#allocation7 + $0x40] ss:$16 sps:$4 sm:$0xff]   ;;  %v4369_v11 = vld [vmem:[#allocation9 + $0x44] ss:$16 sps:$4 sm:$0xff]   ;;  %v3658_v38 = vld [vmem:[#allocation7 + $0x4c] ss:$16 sps:$4 sm:$0xff]  }
  0x50   :  { %v3618_v12 = vld [vmem:[#allocation7 + $0x64] ss:$16 sps:$4 sm:$0xff]   ;;  %v4372_v13 = vld [vmem:[#allocation9 + $0x40] ss:$16 sps:$4 sm:$0xff]   ;;  %v3656_v40 = vld [vmem:[#allocation7 + $0x48] ss:$16 sps:$4 sm:$0xff]  }
  0x51   :  { %329 = vmatpush1.bf16.msra.mxu1 %v3608_v6  ;;  %706 = vmatpush1.bf16.msra.mxu0 %v4366_v8  ;;  %v4375_v14 = vld [vmem:[#allocation9 + $0x64] ss:$16 sps:$4 sm:$0xff]   ;;  %v3620_v15 = vld [vmem:[#allocation7 + $0x60] ss:$16 sps:$4 sm:$0xff]   ;;  %v3661_v41 = vld [vmem:[#allocation7 + $0x6c] ss:$16 sps:$4 sm:$0xff]  }
  0x52   :  { %330 = vmatprep.subr.bf16.mxu1 %v3612_v9  ;;  %707 = vmatprep.subr.bf16.mxu0 %v4369_v11  ;;  %v3624_v16 = vld [vmem:[#allocation7 + $0x84] ss:$16 sps:$4 sm:$0xff]   ;;  %v4378_v17 = vld [vmem:[#allocation9 + $0x60] ss:$16 sps:$4 sm:$0xff]   ;;  %v3659_v42 = vld [vmem:[#allocation7 + $0x68] ss:$16 sps:$4 sm:$0xff]  }
  0x53   :  { %v4381_v18 = vld [vmem:[#allocation9 + $0x84] ss:$16 sps:$4 sm:$0xff]   ;;  %v3626_v19 = vld [vmem:[#allocation7 + $0x80] ss:$16 sps:$4 sm:$0xff]   ;;  %v3665_v43 = vld [vmem:[#allocation7 + $0x8c] ss:$16 sps:$4 sm:$0xff]  }
  0x54   :  { %v3630_v20 = vld [vmem:[#allocation7 + $0xa4] ss:$16 sps:$4 sm:$0xff]   ;;  %v4384_v21 = vld [vmem:[#allocation9 + $0x80] ss:$16 sps:$4 sm:$0xff]   ;;  %v3663_v45 = vld [vmem:[#allocation7 + $0x88] ss:$16 sps:$4 sm:$0xff]  }
  0x55   :  { %331 = vmatpush1.bf16.msra.mxu1 %v3614_v10  ;;  %708 = vmatpush1.bf16.msra.mxu0 %v4372_v13  ;;  %v4387_v22 = vld [vmem:[#allocation9 + $0xa4] ss:$16 sps:$4 sm:$0xff]   ;;  %v3632_v23 = vld [vmem:[#allocation7 + $0xa0] ss:$16 sps:$4 sm:$0xff]   ;;  %v3668_v46 = vld [vmem:[#allocation7 + $0xac] ss:$16 sps:$4 sm:$0xff]   ;;  %v122_v10 = vlaneseq }
  0x56   :  { %332 = vmatprep.subr.bf16.mxu1 %v3618_v12  ;;  %709 = vmatprep.subr.bf16.mxu0 %v4375_v14  ;;  %v3636_v24 = vld [vmem:[#allocation7 + $0xc4] ss:$16 sps:$4 sm:$0xff]   ;;  %v4390_v25 = vld [vmem:[#allocation9 + $0xa0] ss:$16 sps:$4 sm:$0xff]   ;;  %v3666_v47 = vld [vmem:[#allocation7 + $0xa8] ss:$16 sps:$4 sm:$0xff]  }
  0x57   :  { %v4393_v26 = vld [vmem:[#allocation9 + $0xc4] ss:$16 sps:$4 sm:$0xff]   ;;  %v3638_v27 = vld [vmem:[#allocation7 + $0xc0] ss:$16 sps:$4 sm:$0xff]   ;;  %v3672_v48 = vld [vmem:[#allocation7 + $0xcc] ss:$16 sps:$4 sm:$0xff]  }
  0x58   :  { %v3642_v28 = vld [vmem:[#allocation7 + $0xe4] ss:$16 sps:$4 sm:$0xff]   ;;  %v4396_v29 = vld [vmem:[#allocation9 + $0xc0] ss:$16 sps:$4 sm:$0xff]   ;;  %v3669_v49 = vld [vmem:[#allocation4 + $0x18] sm:$0xff]   ;;  %v4504_v12 = vshrl.u32 %v122_v10, 7 }
  0x59   :  { %333 = vmatpush1.bf16.msra.mxu1 %v3620_v15  ;;  %710 = vmatpush1.bf16.msra.mxu0 %v4378_v17  ;;  %v4399_v30 = vld [vmem:[#allocation9 + $0xe4] ss:$16 sps:$4 sm:$0xff]   ;;  %v3644_v31 = vld [vmem:[#allocation7 + $0xe0] ss:$16 sps:$4 sm:$0xff]   ;;  %v3670_v50 = vld [vmem:[#allocation7 + $0xc8] ss:$16 sps:$4 sm:$0xff]  }
  0x5a   :  { %334 = vmatprep.subr.bf16.mxu1 %v3624_v16  ;;  %711 = vmatprep.subr.bf16.mxu0 %v4381_v18  ;;  %v4402_v33 = vld [vmem:[#allocation9 + $0xe0] ss:$16 sps:$4 sm:$0xff]   ;;  %v3675_v51 = vld [vmem:[#allocation7 + $0xec] ss:$16 sps:$4 sm:$0xff]   ;;  %v3673_v52 = vld [vmem:[#allocation7 + $0xe8] ss:$16 sps:$4 sm:$0xff]  }
  0x5b   :  { %v4405_v34 = vld [vmem:[#allocation4] sm:$0xff]   ;;  %v3662_v44 = vld [vmem:[#allocation4 + $0x10] sm:$0xff]   ;;  %v4426_v53 = vld [vmem:[#allocation9 + $0xc] ss:$16 sps:$4 sm:$0xff]   ;;  %5536 = vst [vmem:[#allocation17_spill] sm:$0xff] %v4504_v12  ;;  %v5529_v15 = vsub.s32 0, %v4504_v12 }
  0x5c   :  { %v4430_v54 = vld [vmem:[#allocation9 + $0x8] ss:$16 sps:$4 sm:$0xff]   ;;  %v4433_v55 = vld [vmem:[#allocation9 + $0x2c] ss:$16 sps:$4 sm:$0xff]   ;;  %v120_v16 = vld [vmem:[%s5524_s3] sm:$0xf] }
  0x5d   :  { %335 = vmatpush1.bf16.msra.mxu1 %v3626_v19  ;;  %712 = vmatpush1.bf16.msra.mxu0 %v4384_v21  ;;  %v4437_v56 = vld [vmem:[#allocation9 + $0x28] ss:$16 sps:$4 sm:$0xff]   ;;  %v4441_v57 = vld [vmem:[#allocation9 + $0x4c] ss:$16 sps:$4 sm:$0xff]   ;;  %v5528_v19 = vsub.s32 1, %v4504_v12 }
  0x5e   :  { %336 = vmatprep.subr.bf16.mxu1 %v3630_v20  ;;  %713 = vmatprep.subr.bf16.mxu0 %v4387_v22  ;;  %v4447_v58 = vld [vmem:[#allocation9 + $0x48] ss:$16 sps:$4 sm:$0xff]   ;;  %v4449_v59 = vld [vmem:[#allocation9 + $0x6c] ss:$16 sps:$4 sm:$0xff]   ;;  %v125_v20 = vrot.slane %v120_v16, %v5529_v15 }
  0x5f   :  { %v4454_v60 = vld [vmem:[#allocation9 + $0x68] ss:$16 sps:$4 sm:$0xff]   ;;  %v4458_v61 = vld [vmem:[#allocation9 + $0x8c] ss:$16 sps:$4 sm:$0xff]  }
  0x60   :  { %v4461_v62 = vld [vmem:[#allocation9 + $0x88] ss:$16 sps:$4 sm:$0xff]   ;;  %v4464_v63 = vld [vmem:[#allocation9 + $0xac] ss:$16 sps:$4 sm:$0xff]  }
  0x61   :  { %337 = vmatpush1.bf16.msra.mxu1 %v3632_v23  ;;  %714 = vmatpush1.bf16.msra.mxu0 %v4390_v25  ;;  %v4467_v1 = vld [vmem:[#allocation9 + $0xa8] ss:$16 sps:$4 sm:$0xff]   ;;  %v4471_v2 = vld [vmem:[#allocation9 + $0xcc] ss:$16 sps:$4 sm:$0xff]   ;;  %v129_v23 = vrot.slane %v120_v16, %v5528_v19 }
  0x62   :  { %338 = vmatprep.subr.bf16.mxu1 %v3636_v24  ;;  %715 = vmatprep.subr.bf16.mxu0 %v4393_v26  ;;  %v4474_v5 = vld [vmem:[#allocation9 + $0xc8] ss:$16 sps:$4 sm:$0xff]   ;;  %v4477_v6 = vld [vmem:[#allocation9 + $0xec] ss:$16 sps:$4 sm:$0xff]  }
  0x63   :  { %v4480_v9 = vld [vmem:[#allocation9 + $0xe8] ss:$16 sps:$4 sm:$0xff]  }
  0x65   :  { %339 = vmatpush1.bf16.msra.mxu1 %v3638_v27  ;;  %716 = vmatpush1.bf16.msra.mxu0 %v4396_v29 }
  0x66   :  { %340 = vmatprep.subr.bf16.mxu1 %v3642_v28  ;;  %717 = vmatprep.subr.bf16.mxu0 %v4399_v30 }
  0x69   :  { %341 = vmatpush1.bf16.msra.mxu1 %v3644_v31  ;;  %718 = vmatpush1.bf16.msra.mxu0 %v4402_v33 }
  0x6a   :  { %399 = vmatprep.subr.bf16.mxu1 %v3651_v32  ;;  %822 = vmatprep.subr.bf16.mxu0 %v4358_v3 }
  0x6c   :  { %359 = vmatmul.mubr.bf16.vlgmr.msra.gmra.mrb[0].mxu1 %v4405_v34  ;;  %736 = vmatmul.mubr.bf16.vlgmr.msra.gmra.mrb[0].mxu0 %v5530_v0 }
  0x6d   :  { %400 = vmatpush1.bf16.msra.mxu1 %v3649_v35  ;;  %368 = vmatprep.mubr.bf16.mxu1 %v5530_v0 }
  0x6e   :  { %401 = vmatprep.subr.bf16.mxu1 %v3654_v36  ;;  %823 = vmatpush1.bf16.msra.mxu0 %v4360_v4 }
  0x6f   :  { %854 = vmatprep.mubr.bf16.mxu0 %v5530_v0  ;;  %824 = vmatprep.subr.bf16.mxu0 %v4363_v7 }
  0x71   :  { %402 = vmatpush1.bf16.msra.mxu1 %v3652_v37 }
  0x72   :  { %403 = vmatprep.subr.bf16.mxu1 %v3658_v38  ;;  %825 = vmatpush1.bf16.msra.mxu0 %v4366_v8 }
  0x73   :  { %826 = vmatprep.subr.bf16.mxu0 %v4369_v11 }
  0x74   :  { %369 = vmatmul.mubr.bf16.gmra.mrb[4].mxu1 %v3655_v39 }
  0x75   :  { %404 = vmatpush1.bf16.msra.mxu1 %v3656_v40  ;;  %378 = vmatprep.mubr.bf16.mxu1 %v5530_v0 }
  0x76   :  { %405 = vmatprep.subr.bf16.mxu1 %v3661_v41  ;;  %827 = vmatpush1.bf16.msra.mxu0 %v4372_v13 }
  0x77   :  { %828 = vmatprep.subr.bf16.mxu0 %v4375_v14 }
  0x79   :  { %406 = vmatpush1.bf16.msra.mxu1 %v3659_v42 }
  0x7a   :  { %407 = vmatprep.subr.bf16.mxu1 %v3665_v43  ;;  %829 = vmatpush1.bf16.msra.mxu0 %v4378_v17 }
  0x7b   :  { %830 = vmatprep.subr.bf16.mxu0 %v4381_v18 }
  0x7c   :  { %379 = vmatmul.mubr.bf16.gmra.mrb[8].mxu1 %v3662_v44 }
  0x7d   :  { %408 = vmatpush1.bf16.msra.mxu1 %v3663_v45  ;;  %388 = vmatprep.mubr.bf16.mxu1 %v5530_v0 }
  0x7e   :  { %409 = vmatprep.subr.bf16.mxu1 %v3668_v46  ;;  %831 = vmatpush1.bf16.msra.mxu0 %v4384_v21 }
  0x7f   :  { %832 = vmatprep.subr.bf16.mxu0 %v4387_v22 }
  0x81   :  { %410 = vmatpush1.bf16.msra.mxu1 %v3666_v47 }
  0x82   :  { %411 = vmatprep.subr.bf16.mxu1 %v3672_v48  ;;  %833 = vmatpush1.bf16.msra.mxu0 %v4390_v25 }
  0x83   :  { %834 = vmatprep.subr.bf16.mxu0 %v4393_v26 }
  0x84   :  { %389 = vmatmul.mubr.bf16.gmra.mrb[12].mxu1 %v3669_v49 }
  0x85   :  { %412 = vmatpush1.bf16.msra.mxu1 %v3670_v50  ;;  %431 = vmatprep.mubr.bf16.mxu1 %v5530_v0 }
  0x86   :  { %413 = vmatprep.subr.bf16.mxu1 %v3675_v51  ;;  %835 = vmatpush1.bf16.msra.mxu0 %v4396_v29 }
  0x87   :  { %836 = vmatprep.subr.bf16.mxu0 %v4399_v30 }
  0x89   :  { %414 = vmatpush1.bf16.msra.mxu1 %v3673_v52 }
  0x8a   :  { %744 = vmatprep.subr.bf16.mxu1 %v4426_v53  ;;  %837 = vmatpush1.bf16.msra.mxu0 %v4402_v33 }
  0x8b   :  { %942 = vmatprep.subr.bf16.mxu0 %v4358_v3 }
  0x8c   :  { %432 = vmatmul.mubr.bf16.vlgmr.msra.gmra.mrb[16].mxu1 %v4405_v34 }
  0x8d   :  { %745 = vmatpush1.bf16.msra.mxu1 %v4430_v54  ;;  %441 = vmatprep.mubr.bf16.mxu1 %v5530_v0 }
  0x8e   :  { %746 = vmatprep.subr.bf16.mxu1 %v4433_v55 }
  0x91   :  { %747 = vmatpush1.bf16.msra.mxu1 %v4437_v56 }
  0x92   :  { %748 = vmatprep.subr.bf16.mxu1 %v4441_v57 }
  0x94   :  { %442 = vmatmul.mubr.bf16.gmra.mrb[20].mxu1 %v3655_v39 }
  0x95   :  { %749 = vmatpush1.bf16.msra.mxu1 %v4447_v58  ;;  %451 = vmatprep.mubr.bf16.mxu1 %v5530_v0 }
  0x96   :  { %750 = vmatprep.subr.bf16.mxu1 %v4449_v59 }
  0x99   :  { %751 = vmatpush1.bf16.msra.mxu1 %v4454_v60 }
  0x9a   :  { %752 = vmatprep.subr.bf16.mxu1 %v4458_v61 }
  0x9c   :  { %452 = vmatmul.mubr.bf16.gmra.mrb[24].mxu1 %v3662_v44 }
  0x9d   :  { %753 = vmatpush1.bf16.msra.mxu1 %v4461_v62  ;;  %461 = vmatprep.mubr.bf16.mxu1 %v5530_v0 }
  0x9e   :  { %754 = vmatprep.subr.bf16.mxu1 %v4464_v63 }
  0xa1   :  { %755 = vmatpush1.bf16.msra.mxu1 %v4467_v1 }
  0xa2   :  { %756 = vmatprep.subr.bf16.mxu1 %v4471_v2 }
  0xa4   :  { %462 = vmatmul.mubr.bf16.gmra.mrb[28].mxu1 %v3669_v49 }
  0xa5   :  { %757 = vmatpush1.bf16.msra.mxu1 %v4474_v5  ;;  %776 = vmatprep.mubr.bf16.mxu1 %v5530_v0 }
  0xa6   :  { %758 = vmatprep.subr.bf16.mxu1 %v4477_v6 }
  0xa9   :  { %759 = vmatpush1.bf16.msra.mxu1 %v4480_v9 }
  0xaa   :  { %863 = vmatprep.subr.bf16.mxu1 %v4426_v53 }
  0xac   :  { %777 = vmatmul.mubr.bf16.vlgmr.msra.gmra.mrb[32].mxu1 %v5530_v0 }
  0xad   :  { %864 = vmatpush1.bf16.msra.mxu1 %v4430_v54  ;;  %895 = vmatprep.mubr.bf16.mxu1 %v5530_v0 }
  0xae   :  { %865 = vmatprep.subr.bf16.mxu1 %v4433_v55 }
  0xb1   :  { %866 = vmatpush1.bf16.msra.mxu1 %v4437_v56 }
  0xb2   :  { %867 = vmatprep.subr.bf16.mxu1 %v4441_v57 }
  0xb5   :  { %868 = vmatpush1.bf16.msra.mxu1 %v4447_v58 }
  0xb6   :  { %869 = vmatprep.subr.bf16.mxu1 %v4449_v59 }
  0xb9   :  { %870 = vmatpush1.bf16.msra.mxu1 %v4454_v60 }
  0xba   :  { %871 = vmatprep.subr.bf16.mxu1 %v4458_v61 }
  0xbd   :  { %872 = vmatpush1.bf16.msra.mxu1 %v4461_v62 }
  0xbe   :  { %873 = vmatprep.subr.bf16.mxu1 %v4464_v63 }
  0xc1   :  { %874 = vmatpush1.bf16.msra.mxu1 %v4467_v1 }
  0xc2   :  { %875 = vmatprep.subr.bf16.mxu1 %v4471_v2 }
  0xc5   :  { %876 = vmatpush1.bf16.msra.mxu1 %v4474_v5 }
  0xc6   :  { %877 = vmatprep.subr.bf16.mxu1 %v4477_v6 }
  0xc9   :  { %878 = vmatpush1.bf16.msra.mxu1 %v4480_v9 }
  0xca   :  { %983 = vmatprep.subr.bf16.mxu1 %v4426_v53 }
 0x13f   :  { %v360_v24 = vpop.f32.mrb[0].mxu1  ;;  %v737_v34 = vpop.f32.mrb[0].mxu0 }
 0x140   :  { %v361_v27 = vadd.f32 %v360_v24, %v125_v20  ;;  %v362_v28 = vpop.f32.mrb[1].mxu1  ;;  %v739_v38 = vpop.f32.mrb[1].mxu0 }
 0x141   :  { %v363_v31 = vadd.f32 %v362_v28, %v129_v23  ;;  %v364_v32 = vpop.f32.mrb[2].mxu1  ;;  %v741_v41 = vpop.f32.mrb[2].mxu0 }
 0x142   :  { %v4515_v35 = vadd.f32 %v364_v32, %v125_v20  ;;  %v785_v36 = vadd.f32 %v737_v34, %v361_v27  ;;  %v366_v37 = vpop.f32.mrb[3].mxu1  ;;  %v742_v42 = vpop.f32.mrb[3].mxu0 }
 0x143   :  { %v4517_v39 = vadd.f32 %v366_v37, %v129_v23  ;;  %v786_v40 = vadd.f32 %v739_v38, %v363_v31 }
 0x147   :  { %v370_v43 = vpop.f32.mrb[4].mxu1 }
 0x148   :  { %v4519_v44 = vadd.f32 %v370_v43, %v125_v20  ;;  %v372_v45 = vpop.f32.mrb[5].mxu1 }
 0x149   :  { %v4521_v46 = vadd.f32 %v372_v45, %v129_v23  ;;  %v374_v47 = vpop.f32.mrb[6].mxu1 }
 0x14a   :  { %v4523_v48 = vadd.f32 %v374_v47, %v125_v20  ;;  %v376_v49 = vpop.f32.mrb[7].mxu1 }
 0x14b   :  { %v4525_v50 = vadd.f32 %v376_v49, %v129_v23  ;;  %v5532_v49 = vsub.s32 2, %v4504_v12 }
 0x14d   :  { %5537 = vst [vmem:[#allocation18_spill] sm:$0xff] %v4525_v50 }
 0x14f   :  { %v380_v51 = vpop.f32.mrb[8].mxu1 }
 0x150   :  { %v4527_v52 = vadd.f32 %v380_v51, %v125_v20  ;;  %v382_v10 = vpop.f32.mrb[9].mxu1  ;;  %v5533_v51 = vsub.s32 3, %v4504_v12 }
 0x151   :  { %v4529_v24 = vadd.f32 %v382_v10, %v129_v23  ;;  %v384_v27 = vpop.f32.mrb[10].mxu1 }
 0x152   :  { %5538 = vst [vmem:[#allocation19_spill] sm:$0xff] %v4527_v52  ;;  %v4531_v28 = vadd.f32 %v384_v27, %v125_v20  ;;  %v386_v31 = vpop.f32.mrb[11].mxu1  ;;  %v133_v27 = vrot.slane %v120_v16, %v5532_v49 }
 0x153   :  { %5539 = vst [vmem:[#allocation20_spill] sm:$0xff] %v4529_v24  ;;  %v4533_v32 = vadd.f32 %v386_v31, %v129_v23 }
 0x154   :  { %5540 = vst [vmem:[#allocation21_spill] sm:$0xff] %v4531_v28 }
 0x155   :  { %5541 = vst [vmem:[#allocation22_spill] sm:$0xff] %v4533_v32 }
 0x157   :  { %v390_v34 = vpop.f32.mrb[12].mxu1 }
 0x158   :  { %v4535_v37 = vadd.f32 %v390_v34, %v125_v20  ;;  %v392_v38 = vpop.f32.mrb[13].mxu1  ;;  %v137_v34 = vrot.slane %v120_v16, %v5533_v51  ;;  %v3430_v16 = vmul.f32 -1.442695, %v785_v36 }
 0x159   :  { %v4537_v41 = vadd.f32 %v392_v38, %v129_v23  ;;  %v394_v42 = vpop.f32.mrb[14].mxu1 }
 0x15a   :  { %5542 = vst [vmem:[#allocation23_spill] sm:$0xff] %v4535_v37  ;;  %v4539_v43 = vadd.f32 %v394_v42, %v125_v20  ;;  %v396_v45 = vpop.f32.mrb[15].mxu1 }
 0x15b   :  { %5543 = vst [vmem:[#allocation24_spill] sm:$0xff] %v4537_v41  ;;  %v4541_v47 = vadd.f32 %v396_v45, %v129_v23  ;;  %v3431_v41 = vmul.f32 -1.442695, %v786_v40 }
 0x15c   :  { %5544 = vst [vmem:[#allocation25_spill] sm:$0xff] %v4539_v43 }
 0x15d   :  { %5545 = vst [vmem:[#allocation26_spill] sm:$0xff] %v4541_v47  ;;  %3804 = vpow2.f32 %v3431_v41 }
 0x15e   :  { %3806 = vpow2.f32 %v3430_v16 }
 0x15f   :  { %v433_v10 = vpop.f32.mrb[16].mxu1 }
 0x160   :  { %v435_v31 = vpop.f32.mrb[17].mxu1 }
 0x161   :  { %v437_v38 = vpop.f32.mrb[18].mxu1  ;;  %v436_v52 = vadd.f32 %v435_v31, %v137_v34 }
 0x162   :  { %v4549_v19 = vadd.f32 %v437_v38, %v133_v27  ;;  %v439_v20 = vpop.f32.mrb[19].mxu1 }
 0x163   :  { %v4551_v42 = vadd.f32 %v439_v20, %v137_v34 }
 0x167   :  { %v443_v23 = vpop.f32.mrb[20].mxu1 }
 0x168   :  { %v4553_v45 = vadd.f32 %v443_v23, %v133_v27  ;;  %v445_v15 = vpop.f32.mrb[21].mxu1 }
 0x169   :  { %v4555_v0 = vadd.f32 %v445_v15, %v137_v34  ;;  %v447_v47 = vpop.f32.mrb[22].mxu1 }
 0x16a   :  { %v4557_v43 = vadd.f32 %v447_v47, %v133_v27  ;;  %v449_v49 = vpop.f32.mrb[23].mxu1 }
 0x16b   :  { %v4559_v37 = vadd.f32 %v449_v49, %v137_v34  ;;  %v3805_v49 = vpop.eup %3804 }
 0x16c   :  { %v3807_v16 = vpop.eup %3806 }
 0x16d   :  { %5546 = vst [vmem:[#allocation27_spill] sm:$0xff] %v4559_v37 }
 0x16f   :  { %v453_v38 = vpop.f32.mrb[24].mxu1 }
 0x170   :  { %v4561_v51 = vadd.f32 %v453_v38, %v133_v27  ;;  %v455_v20 = vpop.f32.mrb[25].mxu1 }
 0x171   :  { %v4563_v12 = vadd.f32 %v455_v20, %v137_v34  ;;  %v457_v23 = vpop.f32.mrb[26].mxu1 }
 0x172   :  { %5547 = vst [vmem:[#allocation28_spill] sm:$0xff] %v4561_v51  ;;  %v4565_v32 = vadd.f32 %v457_v23, %v133_v27  ;;  %v459_v15 = vpop.f32.mrb[27].mxu1  ;;  %v792_v23 = vadd.f32 1.0, %v3807_v16 }
 0x173   :  { %5548 = vst [vmem:[#allocation29_spill] sm:$0xff] %v4563_v12  ;;  %v4567_v28 = vadd.f32 %v459_v15, %v137_v34  ;;  %v798_v12 = vadd.f32 1.0, %v3805_v49 }
 0x174   :  { %5549 = vst [vmem:[#allocation30_spill] sm:$0xff] %v4565_v32  ;;  %v434_v32 = vadd.f32 %v433_v10, %v133_v27 }
 0x175   :  { %5550 = vst [vmem:[#allocation31_spill] sm:$0xff] %v4567_v28  ;;  %3808 = vrcp.f32 %v798_v12 }
 0x176   :  { %3810 = vrcp.f32 %v792_v23 }
 0x177   :  { %v463_v47 = vpop.f32.mrb[28].mxu1 }
 0x178   :  { %v4569_v24 = vadd.f32 %v463_v47, %v133_v27  ;;  %v465_v40 = vpop.f32.mrb[29].mxu1 }
 0x179   :  { %v4571_v36 = vadd.f32 %v465_v40, %v137_v34  ;;  %v467_v41 = vpop.f32.mrb[30].mxu1 }
 0x17a   :  { %5551 = vst [vmem:[#allocation32_spill] sm:$0xff] %v4569_v24  ;;  %v4573_v38 = vadd.f32 %v467_v41, %v133_v27  ;;  %v469_v51 = vpop.f32.mrb[31].mxu1 }
 0x17b   :  { %5552 = vst [vmem:[#allocation33_spill] sm:$0xff] %v4571_v36  ;;  %v4575_v20 = vadd.f32 %v469_v51, %v137_v34 }
 0x17c   :  { %5553 = vst [vmem:[#allocation34_spill] sm:$0xff] %v4573_v38 }
 0x17d   :  { %5554 = vst [vmem:[#allocation35_spill] sm:$0xff] %v4575_v20 }
 0x17f   :  { %v778_v15 = vpop.f32.mrb[32].mxu1  ;;  %v3809_v41 = vpop.eup %3808 }
 0x180   :  { %v787_v28 = vadd.f32 %v778_v15, %v434_v32  ;;  %v780_v47 = vpop.f32.mrb[33].mxu1  ;;  %v3811_v38 = vpop.eup %3810  ;;  %v808_v51 = vmul.f32 0.0, %v3809_v41 }
 0x181   :  { %v788_v24 = vadd.f32 %v780_v47, %v436_v52  ;;  %v782_v37 = vpop.f32.mrb[34].mxu1 }
 0x182   :  { %3812 = vtanh.f32 %v787_v28  ;;  %v783_v40 = vpop.f32.mrb[35].mxu1 }
 0x183   :  { %v3432_v36 = vmul.f32 -1.442695, %v788_v24 }
 0x185   :  { %3814 = vpow2.f32 %v3432_v36 }
 0x18c   :  { %v3813_v50 = vpop.eup %3812 }
 0x18d   :  { %v809_v20 = vmul.f32 %v3813_v50, %v3811_v38  ;;  %v5555_v50 = vmov 0  }
 0x18f   :  { %v3815_v49 = vpop.eup %3814  ;;  %v4577_v16 = vadd.f32 %v809_v20, %v808_v51 }
 0x190   :  { %v805_v10 = vadd.f32 1.0, %v3815_v49 }
 0x191   :  { %3816 = vtanh.f32 %v4577_v16 }
 0x192   :  { %3818 = vrcp.f32 %v805_v10 }
 0x19b   :  { %v3817_v12 = vpop.eup %3816 }
 0x19c   :  { %v3819_v32 = vpop.eup %3818 }
 0x19d   :  { %v4580_v52 = vmul.f32 %v3819_v32, %v3817_v12 }
 0x19f   :  { %v821_v24 = vpack.c.bf16 %v4580_v52, %v4580_v52 }
 0x1a1   :  { %855 = vmatmul.mubr.bf16.vlgmr.msra.gmra.mrb[4].mxu0 %v821_v24  ;;  %896 = vmatmul.mubr.bf16.vlgmr.msra.gmra.mrb[36].mxu1 %v821_v24 }
 0x1a2   :  { %943 = vmatpush1.bf16.msra.mxu0 %v4360_v4  ;;  %984 = vmatpush1.bf16.msra.mxu1 %v4430_v54 }
 0x1a3   :  { %944 = vmatprep.subr.bf16.mxu0 %v4363_v7  ;;  %985 = vmatprep.subr.bf16.mxu1 %v4433_v55 }
 0x1a4   :  { %974 = vmatprep.mubr.bf16.mxu0 %v5555_v50  ;;  %1015 = vmatprep.mubr.bf16.mxu1 %v5555_v50 }
 0x1a6   :  { %945 = vmatpush1.bf16.msra.mxu0 %v4366_v8  ;;  %986 = vmatpush1.bf16.msra.mxu1 %v4437_v56 }
 0x1a7   :  { %946 = vmatprep.subr.bf16.mxu0 %v4369_v11  ;;  %987 = vmatprep.subr.bf16.mxu1 %v4441_v57 }
 0x1aa   :  { %947 = vmatpush1.bf16.msra.mxu0 %v4372_v13  ;;  %988 = vmatpush1.bf16.msra.mxu1 %v4447_v58 }
 0x1ab   :  { %948 = vmatprep.subr.bf16.mxu0 %v4375_v14  ;;  %989 = vmatprep.subr.bf16.mxu1 %v4449_v59 }
 0x1ae   :  { %949 = vmatpush1.bf16.msra.mxu0 %v4378_v17  ;;  %990 = vmatpush1.bf16.msra.mxu1 %v4454_v60 }
 0x1af   :  { %950 = vmatprep.subr.bf16.mxu0 %v4381_v18  ;;  %991 = vmatprep.subr.bf16.mxu1 %v4458_v61 }
 0x1b2   :  { %951 = vmatpush1.bf16.msra.mxu0 %v4384_v21  ;;  %992 = vmatpush1.bf16.msra.mxu1 %v4461_v62 }
 0x1b3   :  { %952 = vmatprep.subr.bf16.mxu0 %v4387_v22  ;;  %993 = vmatprep.subr.bf16.mxu1 %v4464_v63 }
 0x1b6   :  { %953 = vmatpush1.bf16.msra.mxu0 %v4390_v25  ;;  %994 = vmatpush1.bf16.msra.mxu1 %v4467_v1 }
 0x1b7   :  { %954 = vmatprep.subr.bf16.mxu0 %v4393_v26  ;;  %995 = vmatprep.subr.bf16.mxu1 %v4471_v2 }
 0x1ba   :  { %955 = vmatpush1.bf16.msra.mxu0 %v4396_v29  ;;  %996 = vmatpush1.bf16.msra.mxu1 %v4474_v5 }
 0x1bb   :  { %956 = vmatprep.subr.bf16.mxu0 %v4399_v30  ;;  %997 = vmatprep.subr.bf16.mxu1 %v4477_v6 }
 0x1be   :  { %957 = vmatpush1.bf16.msra.mxu0 %v4402_v33  ;;  %998 = vmatpush1.bf16.msra.mxu1 %v4480_v9 }
 0x1bf   :  { %1062 = vmatprep.subr.bf16.mxu0 %v4358_v3  ;;  %1103 = vmatprep.subr.bf16.mxu1 %v4426_v53 }
 0x274   :  { %v856_v4 = vpop.f32.mrb[4].mxu0  ;;  %v897_v7 = vpop.f32.mrb[36].mxu1 }
 0x275   :  { %v904_v8 = vadd.f32 %v856_v4, %v4515_v35  ;;  %v906_v28 = vadd.f32 %v897_v7, %v4549_v19  ;;  %v858_v37 = vpop.f32.mrb[5].mxu0  ;;  %v899_v27 = vpop.f32.mrb[37].mxu1 }
 0x276   :  { %v905_v31 = vadd.f32 %v858_v37, %v4517_v39  ;;  %v907_v34 = vadd.f32 %v899_v27, %v4551_v42  ;;  %v860_v36 = vpop.f32.mrb[6].mxu0  ;;  %v901_v38 = vpop.f32.mrb[38].mxu1  ;;  %v4630_v37 = vld [vmem:[#allocation9] ss:$16 sps:$4 sm:$0xff]  }
 0x277   :  { %v3433_v20 = vmul.f32 -1.442695, %v904_v8  ;;  %v861_v23 = vpop.f32.mrb[7].mxu0  ;;  %v902_v15 = vpop.f32.mrb[39].mxu1  ;;  %v4640_v27 = vld [vmem:[#allocation9 + $0x20] ss:$16 sps:$4 sm:$0xff]  }
 0x278   :  { %v3434_v3 = vmul.f32 -1.442695, %v905_v31  ;;  %v3435_v47 = vmul.f32 -1.442695, %v907_v34 }
 0x279   :  { %3820 = vpow2.f32 %v3433_v20 }
 0x27a   :  { %3822 = vpow2.f32 %v3434_v3 }
 0x27b   :  { %3824 = vpow2.f32 %v3435_v47 }
 0x27c   :  { %3826 = vtanh.f32 %v906_v28 }
 0x283   :  { %v3821_v40 = vpop.eup %3820 }
 0x284   :  { %v3823_v41 = vpop.eup %3822  ;;  %v911_v35 = vadd.f32 1.0, %v3821_v40 }
 0x285   :  { %v917_v19 = vadd.f32 1.0, %v3823_v41  ;;  %v3825_v39 = vpop.eup %3824 }
 0x286   :  { %3828 = vrcp.f32 %v911_v35  ;;  %v3827_v51 = vpop.eup %3826  ;;  %v924_v12 = vadd.f32 1.0, %v3825_v39 }
 0x287   :  { %3830 = vrcp.f32 %v917_v19 }
 0x288   :  { %3832 = vrcp.f32 %v924_v12  ;;  %v4700_v12 = vld [vmem:[#allocation9 + $0x64] ss:$16 sps:$4 sm:$0xff]  }
 0x290   :  { %v3829_v42 = vpop.eup %3828 }
 0x291   :  { %v3831_v49 = vpop.eup %3830  ;;  %v928_v10 = vmul.f32 %v3829_v42, %v3827_v51 }
 0x292   :  { %v927_v32 = vmul.f32 %v3831_v49, %v4577_v16  ;;  %v3833_v4 = vpop.eup %3832  ;;  %v4634_v16 = vld [vmem:[#allocation9 + $0x24] ss:$16 sps:$4 sm:$0xff]  }
 0x293   :  { %v4692_v49 = vld [vmem:[#allocation9 + $0x44] ss:$16 sps:$4 sm:$0xff]  }
 0x294   :  { %v4623_v24 = vadd.f32 %v928_v10, %v927_v32  ;;  %v4696_v10 = vld [vmem:[#allocation9 + $0x40] ss:$16 sps:$4 sm:$0xff]  }
 0x295   :  { %v4704_v32 = vld [vmem:[#allocation9 + $0x60] ss:$16 sps:$4 sm:$0xff]  }
 0x296   :  { %3834 = vtanh.f32 %v4623_v24 }
 0x2a0   :  { %v3835_v7 = vpop.eup %3834 }
 0x2a1   :  { %v4626_v8 = vmul.f32 %v3835_v7, %v3833_v4  ;;  %v4712_v4 = vld [vmem:[#allocation9 + $0x80] ss:$16 sps:$4 sm:$0xff]   ;;  %v4716_v7 = vld [vmem:[#allocation9 + $0xa4] ss:$16 sps:$4 sm:$0xff]  }
 0x2a3   :  { %v941_v28 = vpack.c.bf16 %v4626_v8, %v4626_v8 }
 0x2a5   :  { %975 = vmatmul.mubr.bf16.vlgmr.msra.gmra.mrb[8].mxu0 %v941_v28  ;;  %1016 = vmatmul.mubr.bf16.vlgmr.msra.gmra.mrb[40].mxu1 %v941_v28  ;;  %v4720_v28 = vld [vmem:[#allocation9 + $0xa0] ss:$16 sps:$4 sm:$0xff]  }
 0x2a6   :  { %1063 = vmatpush1.bf16.msra.mxu0 %v4630_v37  ;;  %1104 = vmatpush1.bf16.msra.mxu1 %v4430_v54 }
 0x2a7   :  { %1064 = vmatprep.subr.bf16.mxu0 %v4634_v16  ;;  %1105 = vmatprep.subr.bf16.mxu1 %v4433_v55 }
 0x2a8   :  { %1094 = vmatprep.mubr.bf16.mxu0 %v5555_v50  ;;  %1135 = vmatprep.mubr.bf16.mxu1 %v5555_v50 }
 0x2aa   :  { %1065 = vmatpush1.bf16.msra.mxu0 %v4640_v27  ;;  %1106 = vmatpush1.bf16.msra.mxu1 %v4437_v56 }
 0x2ab   :  { %1066 = vmatprep.subr.bf16.mxu0 %v4369_v11  ;;  %1107 = vmatprep.subr.bf16.mxu1 %v4441_v57  ;;  %v4668_v11 = vld [vmem:[#allocation9 + $0x4] ss:$16 sps:$4 sm:$0xff]  }
 0x2ae   :  { %1067 = vmatpush1.bf16.msra.mxu0 %v4372_v13  ;;  %1108 = vmatpush1.bf16.msra.mxu1 %v4447_v58 }
 0x2af   :  { %1068 = vmatprep.subr.bf16.mxu0 %v4375_v14  ;;  %1109 = vmatprep.subr.bf16.mxu1 %v4449_v59 }
 0x2b2   :  { %1069 = vmatpush1.bf16.msra.mxu0 %v4378_v17  ;;  %1110 = vmatpush1.bf16.msra.mxu1 %v4454_v60 }
 0x2b3   :  { %1070 = vmatprep.subr.bf16.mxu0 %v4381_v18  ;;  %1111 = vmatprep.subr.bf16.mxu1 %v4458_v61 }
 0x2b6   :  { %1071 = vmatpush1.bf16.msra.mxu0 %v4384_v21  ;;  %1112 = vmatpush1.bf16.msra.mxu1 %v4461_v62 }
 0x2b7   :  { %1072 = vmatprep.subr.bf16.mxu0 %v4387_v22  ;;  %1113 = vmatprep.subr.bf16.mxu1 %v4464_v63 }
 0x2ba   :  { %1073 = vmatpush1.bf16.msra.mxu0 %v4390_v25  ;;  %1114 = vmatpush1.bf16.msra.mxu1 %v4467_v1 }
 0x2bb   :  { %1074 = vmatprep.subr.bf16.mxu0 %v4393_v26  ;;  %1115 = vmatprep.subr.bf16.mxu1 %v4471_v2 }
 0x2be   :  { %1075 = vmatpush1.bf16.msra.mxu0 %v4396_v29  ;;  %1116 = vmatpush1.bf16.msra.mxu1 %v4474_v5 }
 0x2bf   :  { %1076 = vmatprep.subr.bf16.mxu0 %v4399_v30  ;;  %1117 = vmatprep.subr.bf16.mxu1 %v4477_v6 }
 0x2c2   :  { %1077 = vmatpush1.bf16.msra.mxu0 %v4402_v33  ;;  %1118 = vmatpush1.bf16.msra.mxu1 %v4480_v9 }
 0x2c3   :  { %1182 = vmatprep.subr.bf16.mxu0 %v4668_v11  ;;  %1223 = vmatprep.subr.bf16.mxu1 %v4426_v53 }
 0x378   :  { %v976_v13 = vpop.f32.mrb[8].mxu0  ;;  %v1017_v14 = vpop.f32.mrb[40].mxu1 }
 0x379   :  { %v1024_v17 = vadd.f32 %v976_v13, %v4519_v44  ;;  %v1026_v18 = vadd.f32 %v1017_v14, %v4553_v45  ;;  %v978_v21 = vpop.f32.mrb[9].mxu0  ;;  %v1019_v22 = vpop.f32.mrb[41].mxu1  ;;  %v4724_v13 = vld [vmem:[#allocation9 + $0xc4] ss:$16 sps:$4 sm:$0xff]   ;;  %v4728_v14 = vld [vmem:[#allocation9 + $0xc0] ss:$16 sps:$4 sm:$0xff]  }
 0x37a   :  { %v1025_v25 = vadd.f32 %v978_v21, %v4521_v46  ;;  %v1027_v26 = vadd.f32 %v1019_v22, %v4555_v0  ;;  %v980_v29 = vpop.f32.mrb[10].mxu0  ;;  %v1021_v30 = vpop.f32.mrb[42].mxu1 }
 0x37b   :  { %v3436_v33 = vmul.f32 -1.442695, %v1024_v17  ;;  %v981_v31 = vpop.f32.mrb[11].mxu0  ;;  %v1022_v34 = vpop.f32.mrb[43].mxu1  ;;  %v4732_v17 = vld [vmem:[#allocation9 + $0xe4] ss:$16 sps:$4 sm:$0xff]  }
 0x37c   :  { %v3437_v36 = vmul.f32 -1.442695, %v1025_v25  ;;  %v3438_v38 = vmul.f32 -1.442695, %v1027_v26  ;;  %v5557_v34 = vld [vmem:[#allocation27_spill] sm:$0xff] }
 0x37d   :  { %3836 = vpow2.f32 %v3436_v33  ;;  %v5556_v33 = vld [vmem:[#allocation18_spill] sm:$0xff] }
 0x37e   :  { %3838 = vpow2.f32 %v3437_v36 }
 0x37f   :  { %3840 = vpow2.f32 %v3438_v38 }
 0x380   :  { %3842 = vtanh.f32 %v1026_v18  ;;  %v4736_v18 = vld [vmem:[#allocation9 + $0xe0] ss:$16 sps:$4 sm:$0xff]  }
 0x387   :  { %v3837_v20 = vpop.eup %3836 }
 0x388   :  { %v3839_v23 = vpop.eup %3838  ;;  %v1031_v44 = vadd.f32 1.0, %v3837_v20 }
 0x389   :  { %v1037_v45 = vadd.f32 1.0, %v3839_v23  ;;  %v3841_v46 = vpop.eup %3840 }
 0x38a   :  { %3844 = vrcp.f32 %v1031_v44  ;;  %v3843_v15 = vpop.eup %3842  ;;  %v1044_v40 = vadd.f32 1.0, %v3841_v46 }
 0x38b   :  { %3846 = vrcp.f32 %v1037_v45 }
 0x38c   :  { %3848 = vrcp.f32 %v1044_v40 }
 0x394   :  { %v3845_v0 = vpop.eup %3844 }
 0x395   :  { %v3847_v3 = vpop.eup %3846  ;;  %v1048_v47 = vmul.f32 %v3845_v0, %v3843_v15 }
 0x396   :  { %v1047_v41 = vmul.f32 %v3847_v3, %v4623_v24  ;;  %v3849_v19 = vpop.eup %3848  ;;  %v4708_v24 = vld [vmem:[#allocation9 + $0x84] ss:$16 sps:$4 sm:$0xff]  }
 0x398   :  { %v4677_v35 = vadd.f32 %v1048_v47, %v1047_v41 }
 0x39a   :  { %3850 = vtanh.f32 %v4677_v35 }
 0x3a4   :  { %v3851_v39 = vpop.eup %3850 }
 0x3a5   :  { %v4680_v51 = vmul.f32 %v3851_v39, %v3849_v19 }
 0x3a7   :  { %v1061_v42 = vpack.c.bf16 %v4680_v51, %v4680_v51 }
 0x3a9   :  { %1095 = vmatmul.mubr.bf16.vlgmr.msra.gmra.mrb[12].mxu0 %v1061_v42  ;;  %1136 = vmatmul.mubr.bf16.vlgmr.msra.gmra.mrb[44].mxu1 %v1061_v42 }
 0x3aa   :  { %1183 = vmatpush1.bf16.msra.mxu0 %v4630_v37  ;;  %1224 = vmatpush1.bf16.msra.mxu1 %v4430_v54 }
 0x3ab   :  { %1184 = vmatprep.subr.bf16.mxu0 %v4634_v16  ;;  %1225 = vmatprep.subr.bf16.mxu1 %v4433_v55 }
 0x3ac   :  { %1214 = vmatprep.mubr.bf16.mxu0 %v5555_v50  ;;  %1255 = vmatprep.mubr.bf16.mxu1 %v5555_v50 }
 0x3ae   :  { %1185 = vmatpush1.bf16.msra.mxu0 %v4640_v27  ;;  %1226 = vmatpush1.bf16.msra.mxu1 %v4437_v56 }
 0x3af   :  { %1186 = vmatprep.subr.bf16.mxu0 %v4692_v49  ;;  %1227 = vmatprep.subr.bf16.mxu1 %v4441_v57 }
 0x3b2   :  { %1187 = vmatpush1.bf16.msra.mxu0 %v4696_v10  ;;  %1228 = vmatpush1.bf16.msra.mxu1 %v4447_v58 }
 0x3b3   :  { %1188 = vmatprep.subr.bf16.mxu0 %v4700_v12  ;;  %1229 = vmatprep.subr.bf16.mxu1 %v4449_v59 }
 0x3b6   :  { %1189 = vmatpush1.bf16.msra.mxu0 %v4704_v32  ;;  %1230 = vmatpush1.bf16.msra.mxu1 %v4454_v60 }
 0x3b7   :  { %1190 = vmatprep.subr.bf16.mxu0 %v4708_v24  ;;  %1231 = vmatprep.subr.bf16.mxu1 %v4458_v61 }
 0x3ba   :  { %1191 = vmatpush1.bf16.msra.mxu0 %v4712_v4  ;;  %1232 = vmatpush1.bf16.msra.mxu1 %v4461_v62 }
 0x3bb   :  { %1192 = vmatprep.subr.bf16.mxu0 %v4716_v7  ;;  %1233 = vmatprep.subr.bf16.mxu1 %v4464_v63 }
 0x3be   :  { %1193 = vmatpush1.bf16.msra.mxu0 %v4720_v28  ;;  %1234 = vmatpush1.bf16.msra.mxu1 %v4467_v1 }
 0x3bf   :  { %1194 = vmatprep.subr.bf16.mxu0 %v4724_v13  ;;  %1235 = vmatprep.subr.bf16.mxu1 %v4471_v2 }
 0x3c2   :  { %1195 = vmatpush1.bf16.msra.mxu0 %v4728_v14  ;;  %1236 = vmatpush1.bf16.msra.mxu1 %v4474_v5 }
 0x3c3   :  { %1196 = vmatprep.subr.bf16.mxu0 %v4732_v17  ;;  %1237 = vmatprep.subr.bf16.mxu1 %v4477_v6 }
 0x3c6   :  { %1197 = vmatpush1.bf16.msra.mxu0 %v4736_v18  ;;  %1238 = vmatpush1.bf16.msra.mxu1 %v4480_v9 }
 0x3c7   :  { %1302 = vmatprep.subr.bf16.mxu0 %v4668_v11  ;;  %1343 = vmatprep.subr.bf16.mxu1 %v4426_v53 }
 0x47c   :  { %v1096_v21 = vpop.f32.mrb[12].mxu0  ;;  %v1137_v22 = vpop.f32.mrb[44].mxu1 }
 0x47d   :  { %v1144_v25 = vadd.f32 %v1096_v21, %v4523_v48  ;;  %v1146_v26 = vadd.f32 %v1137_v22, %v4557_v43  ;;  %v1098_v29 = vpop.f32.mrb[13].mxu0  ;;  %v1139_v30 = vpop.f32.mrb[45].mxu1 }
 0x47e   :  { %v1145_v31 = vadd.f32 %v1098_v29, %v5556_v33  ;;  %v1147_v36 = vadd.f32 %v1139_v30, %v5557_v34  ;;  %v1100_v38 = vpop.f32.mrb[14].mxu0  ;;  %v1141_v20 = vpop.f32.mrb[46].mxu1 }
 0x47f   :  { %v3439_v23 = vmul.f32 -1.442695, %v1144_v25  ;;  %v1101_v44 = vpop.f32.mrb[15].mxu0  ;;  %v1142_v45 = vpop.f32.mrb[47].mxu1  ;;  %v5560_v20 = vld [vmem:[#allocation20_spill] sm:$0xff] }
 0x480   :  { %v3440_v46 = vmul.f32 -1.442695, %v1145_v31  ;;  %v3441_v15 = vmul.f32 -1.442695, %v1147_v36  ;;  %v5559_v31 = vld [vmem:[#allocation28_spill] sm:$0xff]  ;;  %v5561_v44 = vld [vmem:[#allocation29_spill] sm:$0xff] }
 0x481   :  { %3852 = vpow2.f32 %v3439_v23 }
 0x482   :  { %3854 = vpow2.f32 %v3440_v46 }
 0x483   :  { %3856 = vpow2.f32 %v3441_v15 }
 0x484   :  { %3858 = vtanh.f32 %v1146_v26 }
 0x48b   :  { %v3853_v0 = vpop.eup %3852 }
 0x48c   :  { %v3855_v3 = vpop.eup %3854  ;;  %v1151_v48 = vadd.f32 1.0, %v3853_v0 }
 0x48d   :  { %v1157_v43 = vadd.f32 1.0, %v3855_v3  ;;  %v3857_v47 = vpop.eup %3856 }
 0x48e   :  { %3860 = vrcp.f32 %v1151_v48  ;;  %v3859_v40 = vpop.eup %3858  ;;  %v1164_v42 = vadd.f32 1.0, %v3857_v47 }
 0x48f   :  { %3862 = vrcp.f32 %v1157_v43 }
 0x490   :  { %3864 = vrcp.f32 %v1164_v42 }
 0x498   :  { %v3861_v41 = vpop.eup %3860 }
 0x499   :  { %v3863_v19 = vpop.eup %3862  ;;  %v1168_v39 = vmul.f32 %v3861_v41, %v3859_v40 }
 0x49a   :  { %v1167_v21 = vmul.f32 %v3863_v19, %v4677_v35  ;;  %v3865_v25 = vpop.eup %3864  ;;  %v5558_v35 = vld [vmem:[#allocation19_spill] sm:$0xff] }
 0x49c   :  { %v4747_v22 = vadd.f32 %v1168_v39, %v1167_v21 }
 0x49e   :  { %3866 = vtanh.f32 %v4747_v22 }
 0x4a8   :  { %v3867_v29 = vpop.eup %3866 }
 0x4a9   :  { %v4750_v30 = vmul.f32 %v3867_v29, %v3865_v25 }
 0x4ab   :  { %v1181_v26 = vpack.c.bf16 %v4750_v30, %v4750_v30 }
 0x4ad   :  { %1215 = vmatmul.mubr.bf16.vlgmr.msra.gmra.mrb[16].mxu0 %v1181_v26  ;;  %1256 = vmatmul.mubr.bf16.vlgmr.msra.gmra.mrb[48].mxu1 %v1181_v26 }
 0x4ae   :  { %1303 = vmatpush1.bf16.msra.mxu0 %v4630_v37  ;;  %1344 = vmatpush1.bf16.msra.mxu1 %v4430_v54 }
 0x4af   :  { %1304 = vmatprep.subr.bf16.mxu0 %v4634_v16  ;;  %1345 = vmatprep.subr.bf16.mxu1 %v4433_v55 }
 0x4b0   :  { %1334 = vmatprep.mubr.bf16.mxu0 %v5555_v50  ;;  %1375 = vmatprep.mubr.bf16.mxu1 %v5555_v50 }
 0x4b2   :  { %1305 = vmatpush1.bf16.msra.mxu0 %v4640_v27  ;;  %1346 = vmatpush1.bf16.msra.mxu1 %v4437_v56 }
 0x4b3   :  { %1306 = vmatprep.subr.bf16.mxu0 %v4692_v49  ;;  %1347 = vmatprep.subr.bf16.mxu1 %v4441_v57 }
 0x4b6   :  { %1307 = vmatpush1.bf16.msra.mxu0 %v4696_v10  ;;  %1348 = vmatpush1.bf16.msra.mxu1 %v4447_v58 }
 0x4b7   :  { %1308 = vmatprep.subr.bf16.mxu0 %v4700_v12  ;;  %1349 = vmatprep.subr.bf16.mxu1 %v4449_v59 }
 0x4ba   :  { %1309 = vmatpush1.bf16.msra.mxu0 %v4704_v32  ;;  %1350 = vmatpush1.bf16.msra.mxu1 %v4454_v60 }
 0x4bb   :  { %1310 = vmatprep.subr.bf16.mxu0 %v4708_v24  ;;  %1351 = vmatprep.subr.bf16.mxu1 %v4458_v61 }
 0x4be   :  { %1311 = vmatpush1.bf16.msra.mxu0 %v4712_v4  ;;  %1352 = vmatpush1.bf16.msra.mxu1 %v4461_v62 }
 0x4bf   :  { %1312 = vmatprep.subr.bf16.mxu0 %v4716_v7  ;;  %1353 = vmatprep.subr.bf16.mxu1 %v4464_v63 }
 0x4c2   :  { %1313 = vmatpush1.bf16.msra.mxu0 %v4720_v28  ;;  %1354 = vmatpush1.bf16.msra.mxu1 %v4467_v1 }
 0x4c3   :  { %1314 = vmatprep.subr.bf16.mxu0 %v4724_v13  ;;  %1355 = vmatprep.subr.bf16.mxu1 %v4471_v2 }
 0x4c6   :  { %1315 = vmatpush1.bf16.msra.mxu0 %v4728_v14  ;;  %1356 = vmatpush1.bf16.msra.mxu1 %v4474_v5 }
 0x4c7   :  { %1316 = vmatprep.subr.bf16.mxu0 %v4732_v17  ;;  %1357 = vmatprep.subr.bf16.mxu1 %v4477_v6 }
 0x4ca   :  { %1317 = vmatpush1.bf16.msra.mxu0 %v4736_v18  ;;  %1358 = vmatpush1.bf16.msra.mxu1 %v4480_v9 }
 0x4cb   :  { %1422 = vmatprep.subr.bf16.mxu0 %v4668_v11  ;;  %1463 = vmatprep.subr.bf16.mxu1 %v4426_v53 }
 0x580   :  { %v1216_v54 = vpop.f32.mrb[16].mxu0  ;;  %v1257_v55 = vpop.f32.mrb[48].mxu1 }
 0x581   :  { %v1264_v33 = vadd.f32 %v1216_v54, %v5558_v35  ;;  %v1266_v34 = vadd.f32 %v1257_v55, %v5559_v31  ;;  %v1218_v36 = vpop.f32.mrb[17].mxu0  ;;  %v1259_v38 = vpop.f32.mrb[49].mxu1 }
 0x582   :  { %v1265_v23 = vadd.f32 %v1218_v36, %v5560_v20  ;;  %v1267_v45 = vadd.f32 %v1259_v38, %v5561_v44  ;;  %v1220_v46 = vpop.f32.mrb[18].mxu0  ;;  %v1261_v15 = vpop.f32.mrb[50].mxu1  ;;  %v4801_v36 = vld [vmem:[#allocation9 + $0x8] ss:$16 sps:$4 sm:$0xff]   ;;  %v5565_v38 = vld [vmem:[#allocation31_spill] sm:$0xff] }
 0x583   :  { %v3442_v0 = vmul.f32 -1.442695, %v1264_v33  ;;  %v1221_v3 = vpop.f32.mrb[19].mxu0  ;;  %v1262_v48 = vpop.f32.mrb[51].mxu1 }
 0x584   :  { %v3443_v43 = vmul.f32 -1.442695, %v1265_v23  ;;  %v3444_v53 = vmul.f32 -1.442695, %v1267_v45 }
 0x585   :  { %3868 = vpow2.f32 %v3442_v0 }
 0x586   :  { %3870 = vpow2.f32 %v3443_v43 }
 0x587   :  { %3872 = vpow2.f32 %v3444_v53 }
 0x588   :  { %3874 = vtanh.f32 %v1266_v34 }
 0x58f   :  { %v3869_v47 = vpop.eup %3868 }
 0x590   :  { %v3871_v40 = vpop.eup %3870  ;;  %v1271_v41 = vadd.f32 1.0, %v3869_v47 }
 0x591   :  { %v1277_v19 = vadd.f32 1.0, %v3871_v40  ;;  %v3873_v39 = vpop.eup %3872 }
 0x592   :  { %3876 = vrcp.f32 %v1271_v41  ;;  %v3875_v42 = vpop.eup %3874  ;;  %v1284_v26 = vadd.f32 1.0, %v3873_v39 }
 0x593   :  { %3878 = vrcp.f32 %v1277_v19 }
 0x594   :  { %3880 = vrcp.f32 %v1284_v26 }
 0x59c   :  { %v3877_v21 = vpop.eup %3876 }
 0x59d   :  { %v3879_v25 = vpop.eup %3878  ;;  %v1288_v29 = vmul.f32 %v3877_v21, %v3875_v42 }
 0x59e   :  { %v1287_v54 = vmul.f32 %v3879_v25, %v4747_v22  ;;  %v3881_v35 = vpop.eup %3880  ;;  %v4805_v22 = vld [vmem:[#allocation9 + $0x2c] ss:$16 sps:$4 sm:$0xff]  }
 0x5a0   :  { %v4793_v55 = vadd.f32 %v1288_v29, %v1287_v54  ;;  %v4079_v54 = vld [vmem:[#allocation9 + $0x28] ss:$16 sps:$4 sm:$0xff]  }
 0x5a2   :  { %3882 = vtanh.f32 %v4793_v55 }
 0x5ac   :  { %v3883_v33 = vpop.eup %3882 }
 0x5ad   :  { %v4796_v31 = vmul.f32 %v3883_v33, %v3881_v35  ;;  %v4083_v35 = vld [vmem:[#allocation9 + $0x68] ss:$16 sps:$4 sm:$0xff]   ;;  %v3702_v33 = vld [vmem:[#allocation7 + $0x104] ss:$16 sps:$4 sm:$0xff]  }
 0x5af   :  { %v1301_v34 = vpack.c.bf16 %v4796_v31, %v4796_v31 }
 0x5b1   :  { %1335 = vmatmul.mubr.bf16.vlgmr.msra.gmra.mrb[20].mxu0 %v1301_v34  ;;  %1376 = vmatmul.mubr.bf16.vlgmr.msra.gmra.mrb[52].mxu1 %v1301_v34 }
 0x5b2   :  { %1423 = vmatpush1.bf16.msra.mxu0 %v4630_v37  ;;  %1464 = vmatpush1.bf16.msra.mxu1 %v4801_v36 }
 0x5b3   :  { %1424 = vmatprep.subr.bf16.mxu0 %v4634_v16  ;;  %1465 = vmatprep.subr.bf16.mxu1 %v4805_v22 }
 0x5b4   :  { %1454 = vmatprep.mubr.bf16.mxu0 %v5555_v50  ;;  %1495 = vmatprep.mubr.bf16.mxu1 %v5555_v50 }
 0x5b6   :  { %1425 = vmatpush1.bf16.msra.mxu0 %v4640_v27  ;;  %1466 = vmatpush1.bf16.msra.mxu1 %v4437_v56  ;;  %v4078_v56 = vld [vmem:[#allocation9 + $0xc] ss:$16 sps:$4 sm:$0xff]  }
 0x5b7   :  { %1426 = vmatprep.subr.bf16.mxu0 %v4692_v49  ;;  %1467 = vmatprep.subr.bf16.mxu1 %v4441_v57 }
 0x5ba   :  { %1427 = vmatpush1.bf16.msra.mxu0 %v4696_v10  ;;  %1468 = vmatpush1.bf16.msra.mxu1 %v4447_v58 }
 0x5bb   :  { %1428 = vmatprep.subr.bf16.mxu0 %v4700_v12  ;;  %1469 = vmatprep.subr.bf16.mxu1 %v4449_v59  ;;  %v5562_v59 = vld [vmem:[#allocation21_spill] sm:$0xff] }
 0x5be   :  { %1429 = vmatpush1.bf16.msra.mxu0 %v4704_v32  ;;  %1470 = vmatpush1.bf16.msra.mxu1 %v4454_v60 }
 0x5bf   :  { %1430 = vmatprep.subr.bf16.mxu0 %v4708_v24  ;;  %1471 = vmatprep.subr.bf16.mxu1 %v4458_v61  ;;  %v5563_v61 = vld [vmem:[#allocation30_spill] sm:$0xff] }
 0x5c2   :  { %1431 = vmatpush1.bf16.msra.mxu0 %v4712_v4  ;;  %1472 = vmatpush1.bf16.msra.mxu1 %v4461_v62 }
 0x5c3   :  { %1432 = vmatprep.subr.bf16.mxu0 %v4716_v7  ;;  %1473 = vmatprep.subr.bf16.mxu1 %v4464_v63 }
 0x5c6   :  { %1433 = vmatpush1.bf16.msra.mxu0 %v4720_v28  ;;  %1474 = vmatpush1.bf16.msra.mxu1 %v4467_v1 }
 0x5c7   :  { %1434 = vmatprep.subr.bf16.mxu0 %v4724_v13  ;;  %1475 = vmatprep.subr.bf16.mxu1 %v4471_v2  ;;  %v5564_v2 = vld [vmem:[#allocation22_spill] sm:$0xff] }
 0x5ca   :  { %1435 = vmatpush1.bf16.msra.mxu0 %v4728_v14  ;;  %1476 = vmatpush1.bf16.msra.mxu1 %v4474_v5 }
 0x5cb   :  { %1436 = vmatprep.subr.bf16.mxu0 %v4732_v17  ;;  %1477 = vmatprep.subr.bf16.mxu1 %v4477_v6 }
 0x5ce   :  { %1437 = vmatpush1.bf16.msra.mxu0 %v4736_v18  ;;  %1478 = vmatpush1.bf16.msra.mxu1 %v4480_v9 }
 0x5cf   :  { %1542 = vmatprep.subr.bf16.mxu0 %v4668_v11  ;;  %1583 = vmatprep.subr.bf16.mxu1 %v4078_v56  ;;  %v5567_v56 = vld [vmem:[#allocation32_spill] sm:$0xff] }
 0x684   :  { %v1336_v57 = vpop.f32.mrb[20].mxu0  ;;  %v1377_v58 = vpop.f32.mrb[52].mxu1 }
 0x685   :  { %v1384_v60 = vadd.f32 %v1336_v57, %v5562_v59  ;;  %v1386_v62 = vadd.f32 %v1377_v58, %v5563_v61  ;;  %v1338_v63 = vpop.f32.mrb[21].mxu0  ;;  %v1379_v1 = vpop.f32.mrb[53].mxu1  ;;  %v5568_v59 = vld [vmem:[#allocation24_spill] sm:$0xff] }
 0x686   :  { %v1385_v5 = vadd.f32 %v1338_v63, %v5564_v2  ;;  %v1387_v6 = vadd.f32 %v1379_v1, %v5565_v38  ;;  %v1340_v20 = vpop.f32.mrb[22].mxu0  ;;  %v1381_v23 = vpop.f32.mrb[54].mxu1 }
 0x687   :  { %v3445_v44 = vmul.f32 -1.442695, %v1384_v60  ;;  %v1341_v9 = vpop.f32.mrb[23].mxu0  ;;  %v1382_v45 = vpop.f32.mrb[55].mxu1  ;;  %v5569_v60 = vld [vmem:[#allocation33_spill] sm:$0xff] }
 0x688   :  { %v3446_v11 = vmul.f32 -1.442695, %v1385_v5  ;;  %v3447_v46 = vmul.f32 -1.442695, %v1387_v6 }
 0x689   :  { %3884 = vpow2.f32 %v3445_v44 }
 0x68a   :  { %3886 = vpow2.f32 %v3446_v11 }
 0x68b   :  { %3888 = vpow2.f32 %v3447_v46 }
 0x68c   :  { %3890 = vtanh.f32 %v1386_v62 }
 0x693   :  { %v3885_v15 = vpop.eup %3884 }
 0x694   :  { %v3887_v0 = vpop.eup %3886  ;;  %v1391_v3 = vadd.f32 1.0, %v3885_v15 }
 0x695   :  { %v1397_v48 = vadd.f32 1.0, %v3887_v0  ;;  %v3889_v43 = vpop.eup %3888 }
 0x696   :  { %3892 = vrcp.f32 %v1391_v3  ;;  %v3891_v53 = vpop.eup %3890  ;;  %v1404_v19 = vadd.f32 1.0, %v3889_v43 }
 0x697   :  { %3894 = vrcp.f32 %v1397_v48 }
 0x698   :  { %3896 = vrcp.f32 %v1404_v19 }
 0x6a0   :  { %v3893_v47 = vpop.eup %3892 }
 0x6a1   :  { %v3895_v40 = vpop.eup %3894  ;;  %v1408_v41 = vmul.f32 %v3893_v47, %v3891_v53 }
 0x6a2   :  { %v1407_v39 = vmul.f32 %v3895_v40, %v4793_v55  ;;  %v3897_v21 = vpop.eup %3896  ;;  %v4080_v55 = vld [vmem:[#allocation9 + $0x4c] ss:$16 sps:$4 sm:$0xff]   ;;  %v3700_v40 = vld [vmem:[#allocation7 + $0x100] ss:$16 sps:$4 sm:$0xff]  }
 0x6a4   :  { %v4842_v42 = vadd.f32 %v1408_v41, %v1407_v39  ;;  %v3703_v41 = vld [vmem:[#allocation7 + $0x108] ss:$16 sps:$4 sm:$0xff]   ;;  %v3708_v39 = vld [vmem:[#allocation7 + $0x124] ss:$16 sps:$4 sm:$0xff]  }
 0x6a6   :  { %3898 = vtanh.f32 %v4842_v42 }
 0x6b0   :  { %v3899_v25 = vpop.eup %3898 }
 0x6b1   :  { %v4845_v29 = vmul.f32 %v3899_v25, %v3897_v21  ;;  %v3711_v21 = vld [vmem:[#allocation7 + $0x12c] ss:$16 sps:$4 sm:$0xff]   ;;  %v3709_v25 = vld [vmem:[#allocation7 + $0x128] ss:$16 sps:$4 sm:$0xff]  }
 0x6b3   :  { %v1421_v26 = vpack.c.bf16 %v4845_v29, %v4845_v29 }
 0x6b5   :  { %1455 = vmatmul.mubr.bf16.vlgmr.msra.gmra.mrb[24].mxu0 %v1421_v26  ;;  %1496 = vmatmul.mubr.bf16.vlgmr.msra.gmra.mrb[56].mxu1 %v1421_v26  ;;  %v3714_v26 = vld [vmem:[#allocation7 + $0x144] ss:$16 sps:$4 sm:$0xff]  }
 0x6b6   :  { %1543 = vmatpush1.bf16.msra.mxu0 %v4630_v37  ;;  %1584 = vmatpush1.bf16.msra.mxu1 %v4801_v36  ;;  %v4081_v37 = vld [vmem:[#allocation9 + $0x48] ss:$16 sps:$4 sm:$0xff]   ;;  %v5566_v36 = vld [vmem:[#allocation23_spill] sm:$0xff] }
 0x6b7   :  { %1544 = vmatprep.subr.bf16.mxu0 %v4634_v16  ;;  %1585 = vmatprep.subr.bf16.mxu1 %v4805_v22  ;;  %v4082_v16 = vld [vmem:[#allocation9 + $0x6c] ss:$16 sps:$4 sm:$0xff]  }
 0x6b8   :  { %1574 = vmatprep.mubr.bf16.mxu0 %v5555_v50  ;;  %1615 = vmatprep.mubr.bf16.mxu1 %v5555_v50 }
 0x6ba   :  { %1545 = vmatpush1.bf16.msra.mxu0 %v4640_v27  ;;  %1586 = vmatpush1.bf16.msra.mxu1 %v4079_v54  ;;  %v4084_v27 = vld [vmem:[#allocation9 + $0x8c] ss:$16 sps:$4 sm:$0xff]  }
 0x6bb   :  { %1546 = vmatprep.subr.bf16.mxu0 %v4692_v49  ;;  %1587 = vmatprep.subr.bf16.mxu1 %v4080_v55  ;;  %v4085_v49 = vld [vmem:[#allocation9 + $0x88] ss:$16 sps:$4 sm:$0xff]   ;;  %v3717_v54 = vld [vmem:[#allocation7 + $0x14c] ss:$16 sps:$4 sm:$0xff]   ;;  %v3712_v55 = vld [vmem:[#allocation7 + $0x140] ss:$16 sps:$4 sm:$0xff]  }
 0x6be   :  { %1547 = vmatpush1.bf16.msra.mxu0 %v4696_v10  ;;  %1588 = vmatpush1.bf16.msra.mxu1 %v4081_v37  ;;  %v4086_v10 = vld [vmem:[#allocation9 + $0xac] ss:$16 sps:$4 sm:$0xff]   ;;  %v3715_v37 = vld [vmem:[#allocation7 + $0x148] ss:$16 sps:$4 sm:$0xff]  }
 0x6bf   :  { %1548 = vmatprep.subr.bf16.mxu0 %v4700_v12  ;;  %1589 = vmatprep.subr.bf16.mxu1 %v4082_v16  ;;  %v4087_v12 = vld [vmem:[#allocation9 + $0xa8] ss:$16 sps:$4 sm:$0xff]   ;;  %v3720_v16 = vld [vmem:[#allocation7 + $0x164] ss:$16 sps:$4 sm:$0xff]  }
 0x6c2   :  { %1549 = vmatpush1.bf16.msra.mxu0 %v4704_v32  ;;  %1590 = vmatpush1.bf16.msra.mxu1 %v4083_v35  ;;  %v4088_v32 = vld [vmem:[#allocation9 + $0xcc] ss:$16 sps:$4 sm:$0xff]  }
 0x6c3   :  { %1550 = vmatprep.subr.bf16.mxu0 %v4708_v24  ;;  %1591 = vmatprep.subr.bf16.mxu1 %v4084_v27  ;;  %v4089_v24 = vld [vmem:[#allocation9 + $0xc8] ss:$16 sps:$4 sm:$0xff]   ;;  %v3723_v35 = vld [vmem:[#allocation7 + $0x16c] ss:$16 sps:$4 sm:$0xff]   ;;  %v3718_v27 = vld [vmem:[#allocation7 + $0x160] ss:$16 sps:$4 sm:$0xff]  }
 0x6c6   :  { %1551 = vmatpush1.bf16.msra.mxu0 %v4712_v4  ;;  %1592 = vmatpush1.bf16.msra.mxu1 %v4085_v49  ;;  %v4090_v4 = vld [vmem:[#allocation9 + $0xec] ss:$16 sps:$4 sm:$0xff]   ;;  %v3721_v49 = vld [vmem:[#allocation7 + $0x168] ss:$16 sps:$4 sm:$0xff]  }
 0x6c7   :  { %1552 = vmatprep.subr.bf16.mxu0 %v4716_v7  ;;  %1593 = vmatprep.subr.bf16.mxu1 %v4086_v10  ;;  %v4091_v7 = vld [vmem:[#allocation9 + $0xe8] ss:$16 sps:$4 sm:$0xff]   ;;  %v3726_v10 = vld [vmem:[#allocation7 + $0x184] ss:$16 sps:$4 sm:$0xff]  }
 0x6ca   :  { %1553 = vmatpush1.bf16.msra.mxu0 %v4720_v28  ;;  %1594 = vmatpush1.bf16.msra.mxu1 %v4087_v12  ;;  %v3705_v28 = vld [vmem:[#allocation7 + $0x10c] ss:$16 sps:$4 sm:$0xff]  }
 0x6cb   :  { %1554 = vmatprep.subr.bf16.mxu0 %v4724_v13  ;;  %1595 = vmatprep.subr.bf16.mxu1 %v4088_v32  ;;  %v3729_v12 = vld [vmem:[#allocation7 + $0x18c] ss:$16 sps:$4 sm:$0xff]   ;;  %v3724_v32 = vld [vmem:[#allocation7 + $0x180] ss:$16 sps:$4 sm:$0xff]  }
 0x6ce   :  { %1555 = vmatpush1.bf16.msra.mxu0 %v4728_v14  ;;  %1596 = vmatpush1.bf16.msra.mxu1 %v4089_v24  ;;  %v3727_v24 = vld [vmem:[#allocation7 + $0x188] ss:$16 sps:$4 sm:$0xff]  }
 0x6cf   :  { %1556 = vmatprep.subr.bf16.mxu0 %v4732_v17  ;;  %1597 = vmatprep.subr.bf16.mxu1 %v4090_v4  ;;  %v3732_v4 = vld [vmem:[#allocation7 + $0x1a4] ss:$16 sps:$4 sm:$0xff]  }
 0x6d2   :  { %1557 = vmatpush1.bf16.msra.mxu0 %v4736_v18  ;;  %1598 = vmatpush1.bf16.msra.mxu1 %v4091_v7  ;;  %v3735_v7 = vld [vmem:[#allocation7 + $0x1ac] ss:$16 sps:$4 sm:$0xff]  }
 0x6d3   :  { %1882 = vmatprep.subr.bf16.mxu0 %v3702_v33  ;;  %1955 = vmatprep.subr.bf16.mxu1 %v3705_v28  ;;  %v3730_v33 = vld [vmem:[#allocation7 + $0x1a0] ss:$16 sps:$4 sm:$0xff]   ;;  %v3733_v28 = vld [vmem:[#allocation7 + $0x1a8] ss:$16 sps:$4 sm:$0xff]  }
 0x788   :  { %v1456_v34 = vpop.f32.mrb[24].mxu0  ;;  %v1497_v13 = vpop.f32.mrb[56].mxu1 }
 0x789   :  { %v1504_v22 = vadd.f32 %v1456_v34, %v5566_v36  ;;  %v1506_v14 = vadd.f32 %v1497_v13, %v5567_v56  ;;  %v1458_v57 = vpop.f32.mrb[25].mxu0  ;;  %v1499_v58 = vpop.f32.mrb[57].mxu1  ;;  %v3738_v34 = vld [vmem:[#allocation7 + $0x1c4] ss:$16 sps:$4 sm:$0xff]   ;;  %v3741_v13 = vld [vmem:[#allocation7 + $0x1cc] ss:$16 sps:$4 sm:$0xff]  }
 0x78a   :  { %v1505_v17 = vadd.f32 %v1458_v57, %v5568_v59  ;;  %v1507_v61 = vadd.f32 %v1499_v58, %v5569_v60  ;;  %v1460_v62 = vpop.f32.mrb[26].mxu0  ;;  %v1501_v18 = vpop.f32.mrb[58].mxu1  ;;  %v3736_v36 = vld [vmem:[#allocation7 + $0x1c0] ss:$16 sps:$4 sm:$0xff]   ;;  %v3744_v56 = vld [vmem:[#allocation7 + $0x1e4] ss:$16 sps:$4 sm:$0xff]   ;;  %v1662_v59 = vpack.c.bf16 %v4626_v8, %v4580_v52  ;;  %v1664_v60 = vpack.c.bf16 %v4845_v29, %v4796_v31 }
 0x78b   :  { %v3448_v63 = vmul.f32 -1.442695, %v1504_v22  ;;  %v1461_v1 = vpop.f32.mrb[27].mxu0  ;;  %v1502_v2 = vpop.f32.mrb[59].mxu1  ;;  %v3739_v22 = vld [vmem:[#allocation7 + $0x1c8] ss:$16 sps:$4 sm:$0xff]  }
 0x78c   :  { %v3449_v5 = vmul.f32 -1.442695, %v1505_v17  ;;  %v3450_v38 = vmul.f32 -1.442695, %v1507_v61  ;;  %v3742_v57 = vld [vmem:[#allocation7 + $0x1e0] ss:$16 sps:$4 sm:$0xff]   ;;  %v1663_v17 = vpack.c.bf16 %v4750_v30, %v4680_v51 }
 0x78d   :  { %3900 = vpow2.f32 %v3448_v63  ;;  %v3745_v58 = vld [vmem:[#allocation7 + $0x1e8] ss:$16 sps:$4 sm:$0xff]   ;;  %v4894_v52 = vld [vmem:[#allocation9 + $0x104] ss:$16 sps:$4 sm:$0xff]   ;;  %v4896_v8 = vld [vmem:[#allocation9 + $0x10c] ss:$16 sps:$4 sm:$0xff]  }
 0x78e   :  { %3902 = vpow2.f32 %v3449_v5  ;;  %v4898_v51 = vld [vmem:[#allocation9 + $0x100] ss:$16 sps:$4 sm:$0xff]   ;;  %v4900_v30 = vld [vmem:[#allocation9 + $0x108] ss:$16 sps:$4 sm:$0xff]   ;;  %v4906_v31 = vld [vmem:[#allocation9 + $0x124] ss:$16 sps:$4 sm:$0xff]  }
 0x78f   :  { %3904 = vpow2.f32 %v3450_v38  ;;  %v4908_v29 = vld [vmem:[#allocation9 + $0x12c] ss:$16 sps:$4 sm:$0xff]   ;;  %v4910_v61 = vld [vmem:[#allocation9 + $0x120] ss:$16 sps:$4 sm:$0xff]   ;;  %v4912_v62 = vld [vmem:[#allocation9 + $0x128] ss:$16 sps:$4 sm:$0xff]  }
 0x790   :  { %3906 = vtanh.f32 %v1506_v14  ;;  %v3747_v14 = vld [vmem:[#allocation7 + $0x1ec] ss:$16 sps:$4 sm:$0xff]   ;;  %v4918_v18 = vld [vmem:[#allocation9 + $0x144] ss:$16 sps:$4 sm:$0xff]   ;;  %v4922_v1 = vld [vmem:[#allocation9 + $0x140] ss:$16 sps:$4 sm:$0xff]  }
 0x791   :  { %v4920_v63 = vld [vmem:[#allocation9 + $0x14c] ss:$16 sps:$4 sm:$0xff]   ;;  %v4924_v2 = vld [vmem:[#allocation9 + $0x148] ss:$16 sps:$4 sm:$0xff]   ;;  %v4930_v5 = vld [vmem:[#allocation9 + $0x164] ss:$16 sps:$4 sm:$0xff]  }
 0x792   :  { %v4932_v38 = vld [vmem:[#allocation9 + $0x16c] ss:$16 sps:$4 sm:$0xff]  }
 0x797   :  { %v3901_v6 = vpop.eup %3900 }
 0x798   :  { %v3903_v20 = vpop.eup %3902  ;;  %v1511_v23 = vadd.f32 1.0, %v3901_v6  ;;  %v4934_v6 = vld [vmem:[#allocation9 + $0x160] ss:$16 sps:$4 sm:$0xff]  }
 0x799   :  { %v1517_v44 = vadd.f32 1.0, %v3903_v20  ;;  %v3905_v9 = vpop.eup %3904  ;;  %v4936_v20 = vld [vmem:[#allocation9 + $0x168] ss:$16 sps:$4 sm:$0xff]  }
 0x79a   :  { %3908 = vrcp.f32 %v1511_v23  ;;  %v3907_v45 = vpop.eup %3906  ;;  %v1524_v0 = vadd.f32 1.0, %v3905_v9  ;;  %v4942_v23 = vld [vmem:[#allocation9 + $0x184] ss:$16 sps:$4 sm:$0xff]   ;;  %v4946_v9 = vld [vmem:[#allocation9 + $0x180] ss:$16 sps:$4 sm:$0xff]  }
 0x79b   :  { %3910 = vrcp.f32 %v1517_v44  ;;  %v4944_v44 = vld [vmem:[#allocation9 + $0x18c] ss:$16 sps:$4 sm:$0xff]  }
 0x79c   :  { %3912 = vrcp.f32 %v1524_v0  ;;  %v4960_v0 = vld [vmem:[#allocation9 + $0x1a8] ss:$16 sps:$4 sm:$0xff]  }
 0x7a4   :  { %v3909_v11 = vpop.eup %3908 }
 0x7a5   :  { %v3911_v46 = vpop.eup %3910  ;;  %v1528_v15 = vmul.f32 %v3909_v11, %v3907_v45  ;;  %v4948_v45 = vld [vmem:[#allocation9 + $0x188] ss:$16 sps:$4 sm:$0xff]   ;;  %v4954_v11 = vld [vmem:[#allocation9 + $0x1a4] ss:$16 sps:$4 sm:$0xff]  }
 0x7a6   :  { %v1527_v3 = vmul.f32 %v3911_v46, %v4842_v42  ;;  %v3913_v43 = vpop.eup %3912  ;;  %v3706_v42 = vld [vmem:[#allocation7 + $0x120] ss:$16 sps:$4 sm:$0xff]   ;;  %v4956_v46 = vld [vmem:[#allocation9 + $0x1ac] ss:$16 sps:$4 sm:$0xff]  }
 0x7a8   :  { %v4873_v48 = vadd.f32 %v1528_v15, %v1527_v3  ;;  %v4958_v15 = vld [vmem:[#allocation9 + $0x1a0] ss:$16 sps:$4 sm:$0xff]   ;;  %v4966_v3 = vld [vmem:[#allocation9 + $0x1c4] ss:$16 sps:$4 sm:$0xff]  }
 0x7aa   :  { %3914 = vtanh.f32 %v4873_v48 }
 0x7b4   :  { %v3915_v53 = vpop.eup %3914 }
 0x7b5   :  { %v4876_v47 = vmul.f32 %v3915_v53, %v3913_v43  ;;  %v4968_v43 = vld [vmem:[#allocation9 + $0x1cc] ss:$16 sps:$4 sm:$0xff]   ;;  %v4970_v53 = vld [vmem:[#allocation9 + $0x1c0] ss:$16 sps:$4 sm:$0xff]  }
 0x7b7   :  { %v1541_v19 = vpack.c.bf16 %v4876_v47, %v4876_v47 }
 0x7b9   :  { %1575 = vmatmul.mubr.bf16.vlgmr.msra.gmra.mrb[28].mxu0 %v1541_v19  ;;  %1616 = vmatmul.mubr.bf16.vlgmr.msra.gmra.mrb[60].mxu1 %v1541_v19  ;;  %v4980_v19 = vld [vmem:[#allocation9 + $0x1ec] ss:$16 sps:$4 sm:$0xff]  }
 0x7ba   :  { %1883 = vmatpush1.bf16.msra.mxu0 %v3700_v40  ;;  %1956 = vmatpush1.bf16.msra.mxu1 %v3703_v41  ;;  %v4972_v40 = vld [vmem:[#allocation9 + $0x1c8] ss:$16 sps:$4 sm:$0xff]   ;;  %v4978_v41 = vld [vmem:[#allocation9 + $0x1e4] ss:$16 sps:$4 sm:$0xff]  }
 0x7bb   :  { %1884 = vmatprep.subr.bf16.mxu0 %v3708_v39  ;;  %1957 = vmatprep.subr.bf16.mxu1 %v3711_v21  ;;  %v4982_v39 = vld [vmem:[#allocation9 + $0x1e0] ss:$16 sps:$4 sm:$0xff]   ;;  %v4984_v21 = vld [vmem:[#allocation9 + $0x1e8] ss:$16 sps:$4 sm:$0xff]  }
 0x7bc   :  { %1914 = vmatprep.mubr.bf16.mxu0 %v5555_v50  ;;  %1987 = vmatprep.mubr.bf16.mxu1 %v5555_v50 }
 0x7be   :  { %1885 = vmatpush1.bf16.msra.mxu0 %v3706_v42  ;;  %1958 = vmatpush1.bf16.msra.mxu1 %v3709_v25 }
 0x7bf   :  { %1886 = vmatprep.subr.bf16.mxu0 %v3714_v26  ;;  %1959 = vmatprep.subr.bf16.mxu1 %v3717_v54  ;;  %v5570_v26 = vld [vmem:[#allocation25_spill] sm:$0xff] }
 0x7c2   :  { %1887 = vmatpush1.bf16.msra.mxu0 %v3712_v55  ;;  %1960 = vmatpush1.bf16.msra.mxu1 %v3715_v37  ;;  %v5571_v55 = vld [vmem:[#allocation34_spill] sm:$0xff] }
 0x7c3   :  { %1888 = vmatprep.subr.bf16.mxu0 %v3720_v16  ;;  %1961 = vmatprep.subr.bf16.mxu1 %v3723_v35 }
 0x7c6   :  { %1889 = vmatpush1.bf16.msra.mxu0 %v3718_v27  ;;  %1962 = vmatpush1.bf16.msra.mxu1 %v3721_v49  ;;  %v5572_v27 = vld [vmem:[#allocation26_spill] sm:$0xff] }
 0x7c7   :  { %1890 = vmatprep.subr.bf16.mxu0 %v3726_v10  ;;  %1963 = vmatprep.subr.bf16.mxu1 %v3729_v12  ;;  %v5573_v10 = vld [vmem:[#allocation35_spill] sm:$0xff] }
 0x7ca   :  { %1891 = vmatpush1.bf16.msra.mxu0 %v3724_v32  ;;  %1964 = vmatpush1.bf16.msra.mxu1 %v3727_v24 }
 0x7cb   :  { %1892 = vmatprep.subr.bf16.mxu0 %v3732_v4  ;;  %1965 = vmatprep.subr.bf16.mxu1 %v3735_v7 }
 0x7ce   :  { %1893 = vmatpush1.bf16.msra.mxu0 %v3730_v33  ;;  %1966 = vmatpush1.bf16.msra.mxu1 %v3733_v28 }
 0x7cf   :  { %1894 = vmatprep.subr.bf16.mxu0 %v3738_v34  ;;  %1967 = vmatprep.subr.bf16.mxu1 %v3741_v13 }
 0x7d2   :  { %1895 = vmatpush1.bf16.msra.mxu0 %v3736_v36  ;;  %1968 = vmatpush1.bf16.msra.mxu1 %v3739_v22 }
 0x7d3   :  { %1896 = vmatprep.subr.bf16.mxu0 %v3744_v56  ;;  %1969 = vmatprep.subr.bf16.mxu1 %v3747_v14 }
 0x7d6   :  { %1897 = vmatpush1.bf16.msra.mxu0 %v3742_v57  ;;  %1970 = vmatpush1.bf16.msra.mxu1 %v3745_v58 }
 0x7d7   :  { %2257 = vmatprep.subr.bf16.mxu0 %v4894_v52  ;;  %2298 = vmatprep.subr.bf16.mxu1 %v4896_v8 }
 0x7d9   :  { %1915 = vmatmul.mubr.bf16.vlgmr.msra.gmra.mrb[32].mxu0 %v1662_v59  ;;  %1988 = vmatmul.mubr.bf16.vlgmr.msra.gmra.mrb[64].mxu1 %v1662_v59 }
 0x7da   :  { %1924 = vmatprep.mubr.bf16.mxu0 %v5555_v50  ;;  %1997 = vmatprep.mubr.bf16.mxu1 %v5555_v50 }
 0x7db   :  { %2258 = vmatpush1.bf16.msra.mxu0 %v4898_v51  ;;  %2299 = vmatpush1.bf16.msra.mxu1 %v4900_v30 }
 0x7dc   :  { %2259 = vmatprep.subr.bf16.mxu0 %v4906_v31  ;;  %2300 = vmatprep.subr.bf16.mxu1 %v4908_v29 }
 0x7df   :  { %2260 = vmatpush1.bf16.msra.mxu0 %v4910_v61  ;;  %2301 = vmatpush1.bf16.msra.mxu1 %v4912_v62 }
 0x7e0   :  { %2261 = vmatprep.subr.bf16.mxu0 %v4918_v18  ;;  %2302 = vmatprep.subr.bf16.mxu1 %v4920_v63 }
 0x7e1   :  { %1925 = vmatmul.mubr.bf16.gmra.mrb[36].mxu0 %v1663_v17  ;;  %1998 = vmatmul.mubr.bf16.gmra.mrb[68].mxu1 %v1663_v17 }
 0x7e2   :  { %1934 = vmatprep.mubr.bf16.mxu0 %v5555_v50  ;;  %2007 = vmatprep.mubr.bf16.mxu1 %v5555_v50 }
 0x7e3   :  { %2262 = vmatpush1.bf16.msra.mxu0 %v4922_v1  ;;  %2303 = vmatpush1.bf16.msra.mxu1 %v4924_v2 }
 0x7e4   :  { %2263 = vmatprep.subr.bf16.mxu0 %v4930_v5  ;;  %2304 = vmatprep.subr.bf16.mxu1 %v4932_v38 }
 0x7e7   :  { %2264 = vmatpush1.bf16.msra.mxu0 %v4934_v6  ;;  %2305 = vmatpush1.bf16.msra.mxu1 %v4936_v20 }
 0x7e8   :  { %2265 = vmatprep.subr.bf16.mxu0 %v4942_v23  ;;  %2306 = vmatprep.subr.bf16.mxu1 %v4944_v44 }
 0x7e9   :  { %1935 = vmatmul.mubr.bf16.gmra.mrb[40].mxu0 %v1664_v60  ;;  %2008 = vmatmul.mubr.bf16.gmra.mrb[72].mxu1 %v1664_v60 }
 0x7ea   :  { %1944 = vmatprep.mubr.bf16.mxu0 %v5555_v50  ;;  %2017 = vmatprep.mubr.bf16.mxu1 %v5555_v50 }
 0x7eb   :  { %2266 = vmatpush1.bf16.msra.mxu0 %v4946_v9  ;;  %2307 = vmatpush1.bf16.msra.mxu1 %v4948_v45 }
 0x7ec   :  { %2267 = vmatprep.subr.bf16.mxu0 %v4954_v11  ;;  %2308 = vmatprep.subr.bf16.mxu1 %v4956_v46 }
 0x7ef   :  { %2268 = vmatpush1.bf16.msra.mxu0 %v4958_v15  ;;  %2309 = vmatpush1.bf16.msra.mxu1 %v4960_v0 }
 0x7f0   :  { %2269 = vmatprep.subr.bf16.mxu0 %v4966_v3  ;;  %2310 = vmatprep.subr.bf16.mxu1 %v4968_v43 }
 0x7f3   :  { %2270 = vmatpush1.bf16.msra.mxu0 %v4970_v53  ;;  %2311 = vmatpush1.bf16.msra.mxu1 %v4972_v40 }
 0x7f4   :  { %2271 = vmatprep.subr.bf16.mxu0 %v4978_v41  ;;  %2312 = vmatprep.subr.bf16.mxu1 %v4980_v19 }
 0x7f7   :  { %2272 = vmatpush1.bf16.msra.mxu0 %v4982_v39  ;;  %2313 = vmatpush1.bf16.msra.mxu1 %v4984_v21 }
 0x7f8   :  { %2373 = vmatprep.subr.bf16.mxu0 %v4894_v52  ;;  %2414 = vmatprep.subr.bf16.mxu1 %v4896_v8 }
 0x88c   :  { %v1576_v42 = vpop.f32.mrb[28].mxu0  ;;  %v1617_v25 = vpop.f32.mrb[60].mxu1 }
 0x88d   :  { %v1624_v54 = vadd.f32 %v1576_v42, %v5570_v26  ;;  %v1626_v37 = vadd.f32 %v1617_v25, %v5571_v55  ;;  %v1578_v16 = vpop.f32.mrb[29].mxu0  ;;  %v1619_v35 = vpop.f32.mrb[61].mxu1 }
 0x88e   :  { %v1625_v49 = vadd.f32 %v1578_v16, %v5572_v27  ;;  %v1627_v12 = vadd.f32 %v1619_v35, %v5573_v10  ;;  %v1580_v32 = vpop.f32.mrb[30].mxu0  ;;  %v1621_v24 = vpop.f32.mrb[62].mxu1 }
 0x88f   :  { %v3451_v4 = vmul.f32 -1.442695, %v1624_v54  ;;  %v1581_v7 = vpop.f32.mrb[31].mxu0  ;;  %v1622_v33 = vpop.f32.mrb[63].mxu1 }
 0x890   :  { %v3452_v28 = vmul.f32 -1.442695, %v1625_v49  ;;  %v3453_v34 = vmul.f32 -1.442695, %v1627_v12 }
 0x891   :  { %3916 = vpow2.f32 %v3451_v4 }
 0x892   :  { %3918 = vpow2.f32 %v3452_v28 }
 0x893   :  { %3920 = vpow2.f32 %v3453_v34 }
 0x894   :  { %3922 = vtanh.f32 %v1626_v37 }
 0x89b   :  { %v3917_v13 = vpop.eup %3916 }
 0x89c   :  { %v3919_v36 = vpop.eup %3918  ;;  %v1631_v22 = vadd.f32 1.0, %v3917_v13 }
 0x89d   :  { %v1637_v56 = vadd.f32 1.0, %v3919_v36  ;;  %v3921_v14 = vpop.eup %3920 }
 0x89e   :  { %3924 = vrcp.f32 %v1631_v22  ;;  %v3923_v57 = vpop.eup %3922  ;;  %v1644_v60 = vadd.f32 1.0, %v3921_v14 }
 0x89f   :  { %3926 = vrcp.f32 %v1637_v56 }
 0x8a0   :  { %3928 = vrcp.f32 %v1644_v60  ;;  %v3454_v60 = vld [vmem:[%s5524_s3 + $0x4] sm:$0xf] }
 0x8a8   :  { %v3925_v58 = vpop.eup %3924 }
 0x8a9   :  { %v3927_v59 = vpop.eup %3926  ;;  %v1648_v17 = vmul.f32 %v3925_v58, %v3923_v57 }
 0x8aa   :  { %v1647_v42 = vmul.f32 %v3927_v59, %v4873_v48  ;;  %v3929_v7 = vpop.eup %3928 }
 0x8ac   :  { %v4997_v25 = vpop.f32.mrb[32].mxu0  ;;  %v4999_v26 = vpop.f32.mrb[64].mxu1  ;;  %v1649_v54 = vadd.f32 %v1648_v17, %v1647_v42 }
 0x8ad   :  { %v5001_v55 = vpop.f32.mrb[33].mxu0  ;;  %v5003_v37 = vpop.f32.mrb[65].mxu1 }
 0x8ae   :  { %v5005_v16 = vpop.f32.mrb[34].mxu0  ;;  %v5007_v35 = vpop.f32.mrb[66].mxu1  ;;  %3930 = vtanh.f32 %v1649_v54 }
 0x8af   :  { %v5009_v27 = vpop.f32.mrb[35].mxu0  ;;  %v5011_v49 = vpop.f32.mrb[67].mxu1 }
 0x8b4   :  { %v5013_v48 = vpop.f32.mrb[36].mxu0  ;;  %v5015_v10 = vpop.f32.mrb[68].mxu1 }
 0x8b5   :  { %5574 = vst [vmem:[#allocation18_spill] sm:$0xff] %v5015_v10  ;;  %v5017_v12 = vpop.f32.mrb[37].mxu0  ;;  %v5019_v32 = vpop.f32.mrb[69].mxu1 }
 0x8b6   :  { %5575 = vst [vmem:[#allocation27_spill] sm:$0xff] %v5017_v12  ;;  %5576 = vst [vmem:[#allocation19_spill] sm:$0xff] %v5019_v32  ;;  %v5021_v24 = vpop.f32.mrb[38].mxu0  ;;  %v5023_v4 = vpop.f32.mrb[70].mxu1 }
 0x8b7   :  { %5577 = vst [vmem:[#allocation28_spill] sm:$0xff] %v5021_v24  ;;  %5578 = vst [vmem:[#allocation20_spill] sm:$0xff] %v5023_v4  ;;  %v5025_v33 = vpop.f32.mrb[39].mxu0  ;;  %v5027_v28 = vpop.f32.mrb[71].mxu1 }
 0x8b8   :  { %5579 = vst [vmem:[#allocation29_spill] sm:$0xff] %v5025_v33  ;;  %5580 = vst [vmem:[#allocation21_spill] sm:$0xff] %v5027_v28  ;;  %v3931_v34 = vpop.eup %3930 }
 0x8b9   :  { %v1651_v13 = vmul.f32 %v3931_v34, %v3929_v7 }
 0x8bb   :  { %v1665_v36 = vpack.c.bf16 %v1651_v13, %v4876_v47 }
 0x8bc   :  { %v5030_v22 = vpop.f32.mrb[40].mxu0  ;;  %v5032_v56 = vpop.f32.mrb[72].mxu1 }
 0x8bd   :  { %5581 = vst [vmem:[#allocation30_spill] sm:$0xff] %v5030_v22  ;;  %5582 = vst [vmem:[#allocation22_spill] sm:$0xff] %v5032_v56  ;;  %v5034_v14 = vpop.f32.mrb[41].mxu0  ;;  %v5036_v57 = vpop.f32.mrb[73].mxu1  ;;  %1945 = vmatmul.mubr.bf16.gmra.mrb[44].mxu0 %v1665_v36  ;;  %2018 = vmatmul.mubr.bf16.gmra.mrb[76].mxu1 %v1665_v36 }
 0x8be   :  { %5583 = vst [vmem:[#allocation31_spill] sm:$0xff] %v5034_v14  ;;  %5584 = vst [vmem:[#allocation23_spill] sm:$0xff] %v5036_v57  ;;  %v5038_v58 = vpop.f32.mrb[42].mxu0  ;;  %v5040_v59 = vpop.f32.mrb[74].mxu1  ;;  %2289 = vmatprep.mubr.bf16.mxu0 %v5555_v50  ;;  %2330 = vmatprep.mubr.bf16.mxu1 %v5555_v50 }
 0x8bf   :  { %5585 = vst [vmem:[#allocation32_spill] sm:$0xff] %v5038_v58  ;;  %5586 = vst [vmem:[#allocation24_spill] sm:$0xff] %v5040_v59  ;;  %v5044_v17 = vpop.f32.mrb[43].mxu0  ;;  %v5046_v47 = vpop.f32.mrb[75].mxu1 }
 0x8c0   :  { %5587 = vst [vmem:[#allocation33_spill] sm:$0xff] %v5044_v17  ;;  %5588 = vst [vmem:[#allocation25_spill] sm:$0xff] %v5046_v47  ;;  %v5595_v47 = vld [vmem:[#allocation17_spill] sm:$0xff] }
 0x8c1   :  { %v5596_v17 = vsub.s32 0, %v5595_v47  ;;  %v5597_v58 = vsub.s32 2, %v5595_v47 }
 0x8c3   :  { %v5101_v59 = vrot.slane %v3454_v60, %v5596_v17  ;;  %v5105_v57 = vrot.slane %v3454_v60, %v5597_v58 }
 0x8c5   :  { %2290 = vmatmul.mubr.bf16.vlgmr.msra.gmra.mrb[48].mxu0 %v5555_v50  ;;  %2331 = vmatmul.mubr.bf16.vlgmr.msra.gmra.mrb[80].mxu1 %v5555_v50  ;;  %v1917_v17 = vadd.f32 %v4997_v25, %v5101_v59 }
 0x8c6   :  { %2374 = vmatpush1.bf16.msra.mxu0 %v4898_v51  ;;  %2415 = vmatpush1.bf16.msra.mxu1 %v4900_v30 }
 0x8c7   :  { %2375 = vmatprep.subr.bf16.mxu0 %v4906_v31  ;;  %2416 = vmatprep.subr.bf16.mxu1 %v4908_v29 }
 0x8c8   :  { %2405 = vmatprep.mubr.bf16.mxu0 %v5555_v50  ;;  %2446 = vmatprep.mubr.bf16.mxu1 %v5555_v50 }
 0x8ca   :  { %2376 = vmatpush1.bf16.msra.mxu0 %v4910_v61  ;;  %2417 = vmatpush1.bf16.msra.mxu1 %v4912_v62 }
 0x8cb   :  { %2377 = vmatprep.subr.bf16.mxu0 %v4918_v18  ;;  %2418 = vmatprep.subr.bf16.mxu1 %v4920_v63 }
 0x8ce   :  { %2378 = vmatpush1.bf16.msra.mxu0 %v4922_v1  ;;  %2419 = vmatpush1.bf16.msra.mxu1 %v4924_v2 }
 0x8cf   :  { %2379 = vmatprep.subr.bf16.mxu0 %v4930_v5  ;;  %2420 = vmatprep.subr.bf16.mxu1 %v4932_v38 }
 0x8d2   :  { %2380 = vmatpush1.bf16.msra.mxu0 %v4934_v6  ;;  %2421 = vmatpush1.bf16.msra.mxu1 %v4936_v20 }
 0x8d3   :  { %2381 = vmatprep.subr.bf16.mxu0 %v4942_v23  ;;  %2422 = vmatprep.subr.bf16.mxu1 %v4944_v44 }
 0x8d6   :  { %2382 = vmatpush1.bf16.msra.mxu0 %v4946_v9  ;;  %2423 = vmatpush1.bf16.msra.mxu1 %v4948_v45 }
 0x8d7   :  { %2383 = vmatprep.subr.bf16.mxu0 %v4954_v11  ;;  %2424 = vmatprep.subr.bf16.mxu1 %v4956_v46 }
 0x8da   :  { %2384 = vmatpush1.bf16.msra.mxu0 %v4958_v15  ;;  %2425 = vmatpush1.bf16.msra.mxu1 %v4960_v0 }
 0x8db   :  { %2385 = vmatprep.subr.bf16.mxu0 %v4966_v3  ;;  %2426 = vmatprep.subr.bf16.mxu1 %v4968_v43 }
 0x8de   :  { %2386 = vmatpush1.bf16.msra.mxu0 %v4970_v53  ;;  %2427 = vmatpush1.bf16.msra.mxu1 %v4972_v40 }
 0x8df   :  { %2387 = vmatprep.subr.bf16.mxu0 %v4978_v41  ;;  %2428 = vmatprep.subr.bf16.mxu1 %v4980_v19 }
 0x8e2   :  { %2388 = vmatpush1.bf16.msra.mxu0 %v4982_v39  ;;  %2429 = vmatpush1.bf16.msra.mxu1 %v4984_v21 }
 0x8e3   :  { %2489 = vmatprep.subr.bf16.mxu0 %v4894_v52  ;;  %2530 = vmatprep.subr.bf16.mxu1 %v4896_v8 }
 0x990   :  { %v5087_v42 = vpop.f32.mrb[44].mxu0  ;;  %v5089_v54 = vpop.f32.mrb[76].mxu1 }
 0x991   :  { %5589 = vst [vmem:[#allocation34_spill] sm:$0xff] %v5087_v42  ;;  %5590 = vst [vmem:[#allocation26_spill] sm:$0xff] %v5089_v54  ;;  %v5091_v7 = vpop.f32.mrb[45].mxu0  ;;  %v5093_v34 = vpop.f32.mrb[77].mxu1 }
 0x992   :  { %5591 = vst [vmem:[#allocation35_spill] sm:$0xff] %v5091_v7  ;;  %5592 = vst [vmem:[#allocation36_spill] sm:$0xff] %v5093_v34  ;;  %v5095_v13 = vpop.f32.mrb[46].mxu0  ;;  %v5097_v36 = vpop.f32.mrb[78].mxu1  ;;  %v5600_v7 = vsub.s32 1, %v5595_v47 }
 0x993   :  { %5593 = vst [vmem:[#allocation37_spill] sm:$0xff] %v5095_v13  ;;  %5594 = vst [vmem:[#allocation38_spill] sm:$0xff] %v5097_v36  ;;  %v5107_v14 = vpop.f32.mrb[47].mxu0  ;;  %v5109_v42 = vpop.f32.mrb[79].mxu1  ;;  %v5601_v13 = vsub.s32 3, %v5595_v47  ;;  %v1990_v36 = vadd.f32 %v4999_v26, %v5105_v57 }
 0x994   :  { %5598 = vst [vmem:[#allocation17_spill] sm:$0xff] %v5107_v14  ;;  %5599 = vst [vmem:[#allocation39_spill] sm:$0xff] %v5109_v42  ;;  %v5113_v54 = vrot.slane %v3454_v60, %v5600_v7 }
 0x995   :  { %v5117_v34 = vrot.slane %v3454_v60, %v5601_v13 }
 0x996   :  { %v1919_v58 = vadd.f32 %v5001_v55, %v5113_v54 }
 0x997   :  { %v1992_v42 = vadd.f32 %v5003_v37, %v5117_v34 }
 0x998   :  { %v2291_v14 = vpop.f32.mrb[48].mxu0  ;;  %v2332_v56 = vpop.f32.mrb[80].mxu1 }
 0x999   :  { %v2339_v7 = vadd.f32 %v2291_v14, %v1917_v17  ;;  %v2341_v22 = vadd.f32 %v2332_v56, %v1990_v36  ;;  %v2293_v28 = vpop.f32.mrb[49].mxu0  ;;  %v2334_v47 = vpop.f32.mrb[81].mxu1 }
 0x99a   :  { %v2340_v60 = vadd.f32 %v2293_v28, %v1919_v58  ;;  %v2342_v13 = vadd.f32 %v2334_v47, %v1992_v42  ;;  %v2295_v33 = vpop.f32.mrb[50].mxu0  ;;  %v2336_v4 = vpop.f32.mrb[82].mxu1  ;;  %v1923_v47 = vadd.f32 %v5009_v27, %v5113_v54 }
 0x99b   :  { %v3519_v25 = vmul.f32 -1.442695, %v2339_v7  ;;  %v2296_v24 = vpop.f32.mrb[51].mxu0  ;;  %v2337_v32 = vpop.f32.mrb[83].mxu1  ;;  %v1994_v7 = vadd.f32 %v5007_v35, %v5105_v57 }
 0x99c   :  { %v3520_v26 = vmul.f32 -1.442695, %v2340_v60  ;;  %v3521_v55 = vmul.f32 -1.442695, %v2342_v13  ;;  %v1996_v60 = vadd.f32 %v5011_v49, %v5117_v34 }
 0x99d   :  { %3932 = vpow2.f32 %v3519_v25 }
 0x99e   :  { %3934 = vpow2.f32 %v3520_v26 }
 0x99f   :  { %3936 = vpow2.f32 %v3521_v55 }
 0x9a0   :  { %3938 = vtanh.f32 %v2341_v22  ;;  %v1921_v22 = vadd.f32 %v5005_v16, %v5101_v59 }
 0x9a7   :  { %v3933_v12 = vpop.eup %3932 }
 0x9a8   :  { %v3935_v10 = vpop.eup %3934  ;;  %v2346_v37 = vadd.f32 1.0, %v3933_v12 }
 0x9a9   :  { %v2352_v14 = vadd.f32 1.0, %v3935_v10  ;;  %v3937_v56 = vpop.eup %3936 }
 0x9aa   :  { %3940 = vrcp.f32 %v2346_v37  ;;  %v3939_v28 = vpop.eup %3938  ;;  %v2359_v36 = vadd.f32 1.0, %v3937_v56 }
 0x9ab   :  { %3942 = vrcp.f32 %v2352_v14 }
 0x9ac   :  { %3944 = vrcp.f32 %v2359_v36 }
 0x9b4   :  { %v3941_v42 = vpop.eup %3940 }
 0x9b5   :  { %v3943_v33 = vpop.eup %3942  ;;  %v2363_v4 = vmul.f32 %v3941_v42, %v3939_v28 }
 0x9b6   :  { %v2362_v24 = vmul.f32 0.0, %v3943_v33  ;;  %v3945_v17 = vpop.eup %3944 }
 0x9b8   :  { %v5127_v32 = vadd.f32 %v2363_v4, %v2362_v24 }
 0x9ba   :  { %3946 = vtanh.f32 %v5127_v32 }
 0x9c4   :  { %v3947_v58 = vpop.eup %3946 }
 0x9c5   :  { %v5130_v12 = vmul.f32 %v3947_v58, %v3945_v17 }
 0x9c7   :  { %v2372_v10 = vpack.c.bf16 %v5130_v12, %v5130_v12 }
 0x9c9   :  { %2406 = vmatmul.mubr.bf16.vlgmr.msra.gmra.mrb[52].mxu0 %v2372_v10  ;;  %2447 = vmatmul.mubr.bf16.vlgmr.msra.gmra.mrb[84].mxu1 %v2372_v10 }
 0x9ca   :  { %2490 = vmatpush1.bf16.msra.mxu0 %v4898_v51  ;;  %2531 = vmatpush1.bf16.msra.mxu1 %v4900_v30 }
 0x9cb   :  { %2491 = vmatprep.subr.bf16.mxu0 %v4906_v31  ;;  %2532 = vmatprep.subr.bf16.mxu1 %v4908_v29 }
 0x9cc   :  { %2521 = vmatprep.mubr.bf16.mxu0 %v5555_v50  ;;  %2562 = vmatprep.mubr.bf16.mxu1 %v5555_v50 }
 0x9ce   :  { %2492 = vmatpush1.bf16.msra.mxu0 %v4910_v61  ;;  %2533 = vmatpush1.bf16.msra.mxu1 %v4912_v62 }
 0x9cf   :  { %2493 = vmatprep.subr.bf16.mxu0 %v4918_v18  ;;  %2534 = vmatprep.subr.bf16.mxu1 %v4920_v63 }
 0x9d2   :  { %2494 = vmatpush1.bf16.msra.mxu0 %v4922_v1  ;;  %2535 = vmatpush1.bf16.msra.mxu1 %v4924_v2 }
 0x9d3   :  { %2495 = vmatprep.subr.bf16.mxu0 %v4930_v5  ;;  %2536 = vmatprep.subr.bf16.mxu1 %v4932_v38 }
 0x9d6   :  { %2496 = vmatpush1.bf16.msra.mxu0 %v4934_v6  ;;  %2537 = vmatpush1.bf16.msra.mxu1 %v4936_v20 }
 0x9d7   :  { %2497 = vmatprep.subr.bf16.mxu0 %v4942_v23  ;;  %2538 = vmatprep.subr.bf16.mxu1 %v4944_v44 }
 0x9da   :  { %2498 = vmatpush1.bf16.msra.mxu0 %v4946_v9  ;;  %2539 = vmatpush1.bf16.msra.mxu1 %v4948_v45 }
 0x9db   :  { %2499 = vmatprep.subr.bf16.mxu0 %v4954_v11  ;;  %2540 = vmatprep.subr.bf16.mxu1 %v4956_v46 }
 0x9de   :  { %2500 = vmatpush1.bf16.msra.mxu0 %v4958_v15  ;;  %2541 = vmatpush1.bf16.msra.mxu1 %v4960_v0 }
 0x9df   :  { %2501 = vmatprep.subr.bf16.mxu0 %v4966_v3  ;;  %2542 = vmatprep.subr.bf16.mxu1 %v4968_v43 }
 0x9e2   :  { %2502 = vmatpush1.bf16.msra.mxu0 %v4970_v53  ;;  %2543 = vmatpush1.bf16.msra.mxu1 %v4972_v40 }
 0x9e3   :  { %2503 = vmatprep.subr.bf16.mxu0 %v4978_v41  ;;  %2544 = vmatprep.subr.bf16.mxu1 %v4980_v19 }
 0x9e6   :  { %2504 = vmatpush1.bf16.msra.mxu0 %v4982_v39  ;;  %2545 = vmatpush1.bf16.msra.mxu1 %v4984_v21 }
 0x9e7   :  { %2605 = vmatprep.subr.bf16.mxu0 %v4894_v52  ;;  %2646 = vmatprep.subr.bf16.mxu1 %v4896_v8 }
 0xa9c   :  { %v2407_v13 = vpop.f32.mrb[52].mxu0  ;;  %v2448_v25 = vpop.f32.mrb[84].mxu1 }
 0xa9d   :  { %v2455_v26 = vadd.f32 %v2407_v13, %v1921_v22  ;;  %v2457_v55 = vadd.f32 %v2448_v25, %v1994_v7  ;;  %v2409_v37 = vpop.f32.mrb[53].mxu0  ;;  %v2450_v14 = vpop.f32.mrb[85].mxu1 }
 0xa9e   :  { %v2456_v56 = vadd.f32 %v2409_v37, %v1923_v47  ;;  %v2458_v28 = vadd.f32 %v2450_v14, %v1996_v60  ;;  %v2411_v42 = vpop.f32.mrb[54].mxu0  ;;  %v2452_v33 = vpop.f32.mrb[86].mxu1 }
 0xa9f   :  { %v3522_v16 = vmul.f32 -1.442695, %v2455_v26  ;;  %v2412_v4 = vpop.f32.mrb[55].mxu0  ;;  %v2453_v36 = vpop.f32.mrb[87].mxu1  ;;  %v5603_v33 = vld [vmem:[#allocation27_spill] sm:$0xff] }
 0xaa0   :  { %v3523_v35 = vmul.f32 -1.442695, %v2456_v56  ;;  %v3524_v27 = vmul.f32 -1.442695, %v2458_v28  ;;  %v5602_v28 = vld [vmem:[#allocation18_spill] sm:$0xff]  ;;  %v5604_v4 = vld [vmem:[#allocation19_spill] sm:$0xff] }
 0xaa1   :  { %3948 = vpow2.f32 %v3522_v16  ;;  %v2000_v42 = vadd.f32 %v5602_v28, %v5105_v57  ;;  %v1929_v16 = vadd.f32 %v5603_v33, %v5113_v54  ;;  %v2002_v36 = vadd.f32 %v5604_v4, %v5117_v34 }
 0xaa2   :  { %3950 = vpow2.f32 %v3523_v35 }
 0xaa3   :  { %3952 = vpow2.f32 %v3524_v27 }
 0xaa4   :  { %3954 = vtanh.f32 %v2457_v55 }
 0xaab   :  { %v3949_v24 = vpop.eup %3948 }
 0xaac   :  { %v3951_v17 = vpop.eup %3950  ;;  %v2462_v49 = vadd.f32 1.0, %v3949_v24 }
 0xaad   :  { %v2468_v58 = vadd.f32 1.0, %v3951_v17  ;;  %v3953_v10 = vpop.eup %3952 }
 0xaae   :  { %3956 = vrcp.f32 %v2462_v49  ;;  %v3955_v22 = vpop.eup %3954  ;;  %v2475_v13 = vadd.f32 1.0, %v3953_v10 }
 0xaaf   :  { %3958 = vrcp.f32 %v2468_v58 }
 0xab0   :  { %3960 = vrcp.f32 %v2475_v13 }
 0xab8   :  { %v3957_v7 = vpop.eup %3956 }
 0xab9   :  { %v3959_v47 = vpop.eup %3958  ;;  %v2479_v60 = vmul.f32 %v3957_v7, %v3955_v22 }
 0xaba   :  { %v2478_v25 = vmul.f32 %v3959_v47, %v5127_v32  ;;  %v3961_v37 = vpop.eup %3960  ;;  %v1927_v32 = vadd.f32 %v5013_v48, %v5101_v59 }
 0xabc   :  { %v5177_v26 = vadd.f32 %v2479_v60, %v2478_v25 }
 0xabe   :  { %3962 = vtanh.f32 %v5177_v26 }
 0xac8   :  { %v3963_v14 = vpop.eup %3962 }
 0xac9   :  { %v5180_v56 = vmul.f32 %v3963_v14, %v3961_v37 }
 0xacb   :  { %v2488_v55 = vpack.c.bf16 %v5180_v56, %v5180_v56 }
 0xacd   :  { %2522 = vmatmul.mubr.bf16.vlgmr.msra.gmra.mrb[56].mxu0 %v2488_v55  ;;  %2563 = vmatmul.mubr.bf16.vlgmr.msra.gmra.mrb[88].mxu1 %v2488_v55 }
 0xace   :  { %2606 = vmatpush1.bf16.msra.mxu0 %v4898_v51  ;;  %2647 = vmatpush1.bf16.msra.mxu1 %v4900_v30 }
 0xacf   :  { %2607 = vmatprep.subr.bf16.mxu0 %v4906_v31  ;;  %2648 = vmatprep.subr.bf16.mxu1 %v4908_v29 }
 0xad0   :  { %2637 = vmatprep.mubr.bf16.mxu0 %v5555_v50  ;;  %2678 = vmatprep.mubr.bf16.mxu1 %v5555_v50 }
 0xad2   :  { %2608 = vmatpush1.bf16.msra.mxu0 %v4910_v61  ;;  %2649 = vmatpush1.bf16.msra.mxu1 %v4912_v62 }
 0xad3   :  { %2609 = vmatprep.subr.bf16.mxu0 %v4918_v18  ;;  %2650 = vmatprep.subr.bf16.mxu1 %v4920_v63 }
 0xad6   :  { %2610 = vmatpush1.bf16.msra.mxu0 %v4922_v1  ;;  %2651 = vmatpush1.bf16.msra.mxu1 %v4924_v2 }
 0xad7   :  { %2611 = vmatprep.subr.bf16.mxu0 %v4930_v5  ;;  %2652 = vmatprep.subr.bf16.mxu1 %v4932_v38 }
 0xada   :  { %2612 = vmatpush1.bf16.msra.mxu0 %v4934_v6  ;;  %2653 = vmatpush1.bf16.msra.mxu1 %v4936_v20 }
 0xadb   :  { %2613 = vmatprep.subr.bf16.mxu0 %v4942_v23  ;;  %2654 = vmatprep.subr.bf16.mxu1 %v4944_v44 }
 0xade   :  { %2614 = vmatpush1.bf16.msra.mxu0 %v4946_v9  ;;  %2655 = vmatpush1.bf16.msra.mxu1 %v4948_v45 }
 0xadf   :  { %2615 = vmatprep.subr.bf16.mxu0 %v4954_v11  ;;  %2656 = vmatprep.subr.bf16.mxu1 %v4956_v46 }
 0xae2   :  { %2616 = vmatpush1.bf16.msra.mxu0 %v4958_v15  ;;  %2657 = vmatpush1.bf16.msra.mxu1 %v4960_v0 }
 0xae3   :  { %2617 = vmatprep.subr.bf16.mxu0 %v4966_v3  ;;  %2658 = vmatprep.subr.bf16.mxu1 %v4968_v43 }
 0xae6   :  { %2618 = vmatpush1.bf16.msra.mxu0 %v4970_v53  ;;  %2659 = vmatpush1.bf16.msra.mxu1 %v4972_v40 }
 0xae7   :  { %2619 = vmatprep.subr.bf16.mxu0 %v4978_v41  ;;  %2660 = vmatprep.subr.bf16.mxu1 %v4980_v19 }
 0xaea   :  { %2620 = vmatpush1.bf16.msra.mxu0 %v4982_v39  ;;  %2661 = vmatpush1.bf16.msra.mxu1 %v4984_v21 }
 0xaeb   :  { %2721 = vmatprep.subr.bf16.mxu0 %v4894_v52  ;;  %2762 = vmatprep.subr.bf16.mxu1 %v4896_v8 }
 0xba0   :  { %v2523_v35 = vpop.f32.mrb[56].mxu0  ;;  %v2564_v27 = vpop.f32.mrb[88].mxu1 }
 0xba1   :  { %v2571_v24 = vadd.f32 %v2523_v35, %v1927_v32  ;;  %v2573_v17 = vadd.f32 %v2564_v27, %v2000_v42  ;;  %v2525_v49 = vpop.f32.mrb[57].mxu0  ;;  %v2566_v58 = vpop.f32.mrb[89].mxu1 }
 0xba2   :  { %v2572_v10 = vadd.f32 %v2525_v49, %v1929_v16  ;;  %v2574_v22 = vadd.f32 %v2566_v58, %v2002_v36  ;;  %v2527_v7 = vpop.f32.mrb[58].mxu0  ;;  %v2568_v47 = vpop.f32.mrb[90].mxu1 }
 0xba3   :  { %v3525_v48 = vmul.f32 -1.442695, %v2571_v24  ;;  %v2528_v60 = vpop.f32.mrb[59].mxu0  ;;  %v2569_v13 = vpop.f32.mrb[91].mxu1  ;;  %v5606_v7 = vld [vmem:[#allocation20_spill] sm:$0xff] }
 0xba4   :  { %v3526_v25 = vmul.f32 -1.442695, %v2572_v10  ;;  %v3527_v37 = vmul.f32 -1.442695, %v2574_v22  ;;  %v2004_v47 = vadd.f32 %v5606_v7, %v5105_v57  ;;  %v5608_v13 = vld [vmem:[#allocation21_spill] sm:$0xff] }
 0xba5   :  { %3964 = vpow2.f32 %v3525_v48  ;;  %v5607_v48 = vld [vmem:[#allocation29_spill] sm:$0xff] }
 0xba6   :  { %3966 = vpow2.f32 %v3526_v25  ;;  %v1933_v60 = vadd.f32 %v5607_v48, %v5113_v54  ;;  %v2006_v25 = vadd.f32 %v5608_v13, %v5117_v34 }
 0xba7   :  { %3968 = vpow2.f32 %v3527_v37 }
 0xba8   :  { %3970 = vtanh.f32 %v2573_v17 }
 0xbaf   :  { %v3965_v14 = vpop.eup %3964 }
 0xbb0   :  { %v3967_v55 = vpop.eup %3966  ;;  %v2578_v28 = vadd.f32 1.0, %v3965_v14 }
 0xbb1   :  { %v2584_v32 = vadd.f32 1.0, %v3967_v55  ;;  %v3969_v42 = vpop.eup %3968 }
 0xbb2   :  { %3972 = vrcp.f32 %v2578_v28  ;;  %v3971_v33 = vpop.eup %3970  ;;  %v2591_v35 = vadd.f32 1.0, %v3969_v42 }
 0xbb3   :  { %3974 = vrcp.f32 %v2584_v32 }
 0xbb4   :  { %3976 = vrcp.f32 %v2591_v35 }
 0xbbc   :  { %v3973_v16 = vpop.eup %3972 }
 0xbbd   :  { %v3975_v4 = vpop.eup %3974  ;;  %v2595_v36 = vmul.f32 %v3973_v16, %v3971_v33 }
 0xbbe   :  { %v2594_v27 = vmul.f32 %v3975_v4, %v5177_v26  ;;  %v3977_v49 = vpop.eup %3976  ;;  %v5605_v26 = vld [vmem:[#allocation28_spill] sm:$0xff] }
 0xbbf   :  { %v1931_v22 = vadd.f32 %v5605_v26, %v5101_v59 }
 0xbc0   :  { %v5227_v24 = vadd.f32 %v2595_v36, %v2594_v27 }
 0xbc2   :  { %3978 = vtanh.f32 %v5227_v24 }
 0xbcc   :  { %v3979_v58 = vpop.eup %3978 }
 0xbcd   :  { %v5230_v10 = vmul.f32 %v3979_v58, %v3977_v49 }
 0xbcf   :  { %v2604_v17 = vpack.c.bf16 %v5230_v10, %v5230_v10 }
 0xbd1   :  { %2638 = vmatmul.mubr.bf16.vlgmr.msra.gmra.mrb[60].mxu0 %v2604_v17  ;;  %2679 = vmatmul.mubr.bf16.vlgmr.msra.gmra.mrb[92].mxu1 %v2604_v17 }
 0xbd2   :  { %2722 = vmatpush1.bf16.msra.mxu0 %v4898_v51  ;;  %2763 = vmatpush1.bf16.msra.mxu1 %v4900_v30 }
 0xbd3   :  { %2723 = vmatprep.subr.bf16.mxu0 %v4906_v31  ;;  %2764 = vmatprep.subr.bf16.mxu1 %v4908_v29 }
 0xbd4   :  { %2753 = vmatprep.mubr.bf16.mxu0 %v5555_v50  ;;  %2794 = vmatprep.mubr.bf16.mxu1 %v5555_v50 }
 0xbd6   :  { %2724 = vmatpush1.bf16.msra.mxu0 %v4910_v61  ;;  %2765 = vmatpush1.bf16.msra.mxu1 %v4912_v62 }
 0xbd7   :  { %2725 = vmatprep.subr.bf16.mxu0 %v4918_v18  ;;  %2766 = vmatprep.subr.bf16.mxu1 %v4920_v63 }
 0xbda   :  { %2726 = vmatpush1.bf16.msra.mxu0 %v4922_v1  ;;  %2767 = vmatpush1.bf16.msra.mxu1 %v4924_v2 }
 0xbdb   :  { %2727 = vmatprep.subr.bf16.mxu0 %v4930_v5  ;;  %2768 = vmatprep.subr.bf16.mxu1 %v4932_v38 }
 0xbde   :  { %2728 = vmatpush1.bf16.msra.mxu0 %v4934_v6  ;;  %2769 = vmatpush1.bf16.msra.mxu1 %v4936_v20 }
 0xbdf   :  { %2729 = vmatprep.subr.bf16.mxu0 %v4942_v23  ;;  %2770 = vmatprep.subr.bf16.mxu1 %v4944_v44 }
 0xbe2   :  { %2730 = vmatpush1.bf16.msra.mxu0 %v4946_v9  ;;  %2771 = vmatpush1.bf16.msra.mxu1 %v4948_v45 }
 0xbe3   :  { %2731 = vmatprep.subr.bf16.mxu0 %v4954_v11  ;;  %2772 = vmatprep.subr.bf16.mxu1 %v4956_v46 }
 0xbe6   :  { %2732 = vmatpush1.bf16.msra.mxu0 %v4958_v15  ;;  %2773 = vmatpush1.bf16.msra.mxu1 %v4960_v0 }
 0xbe7   :  { %2733 = vmatprep.subr.bf16.mxu0 %v4966_v3  ;;  %2774 = vmatprep.subr.bf16.mxu1 %v4968_v43 }
 0xbea   :  { %2734 = vmatpush1.bf16.msra.mxu0 %v4970_v53  ;;  %2775 = vmatpush1.bf16.msra.mxu1 %v4972_v40 }
 0xbeb   :  { %2735 = vmatprep.subr.bf16.mxu0 %v4978_v41  ;;  %2776 = vmatprep.subr.bf16.mxu1 %v4980_v19 }
 0xbee   :  { %2736 = vmatpush1.bf16.msra.mxu0 %v4982_v39  ;;  %2777 = vmatpush1.bf16.msra.mxu1 %v4984_v21 }
 0xbef   :  { %2837 = vmatprep.subr.bf16.mxu0 %v4894_v52  ;;  %2878 = vmatprep.subr.bf16.mxu1 %v4896_v8 }
 0xca4   :  { %v2639_v37 = vpop.f32.mrb[60].mxu0  ;;  %v2680_v14 = vpop.f32.mrb[92].mxu1 }
 0xca5   :  { %v2687_v55 = vadd.f32 %v2639_v37, %v1931_v22  ;;  %v2689_v28 = vadd.f32 %v2680_v14, %v2004_v47  ;;  %v2641_v32 = vpop.f32.mrb[61].mxu0  ;;  %v2682_v42 = vpop.f32.mrb[93].mxu1 }
 0xca6   :  { %v2688_v33 = vadd.f32 %v2641_v32, %v1933_v60  ;;  %v2690_v16 = vadd.f32 %v2682_v42, %v2006_v25  ;;  %v2643_v4 = vpop.f32.mrb[62].mxu0  ;;  %v2684_v36 = vpop.f32.mrb[94].mxu1 }
 0xca7   :  { %v3528_v35 = vmul.f32 -1.442695, %v2687_v55  ;;  %v2644_v27 = vpop.f32.mrb[63].mxu0  ;;  %v2685_v49 = vpop.f32.mrb[95].mxu1 }
 0xca8   :  { %v3529_v58 = vmul.f32 -1.442695, %v2688_v33  ;;  %v3530_v17 = vmul.f32 -1.442695, %v2690_v16 }
 0xca9   :  { %3980 = vpow2.f32 %v3528_v35 }
 0xcaa   :  { %3982 = vpow2.f32 %v3529_v58 }
 0xcab   :  { %3984 = vpow2.f32 %v3530_v17  ;;  %v5334_v17 = vld [vmem:[#allocation9 + $0x100] ss:$16 sps:$4 sm:$0xff]  }
 0xcac   :  { %3986 = vtanh.f32 %v2689_v28 }
 0xcb3   :  { %v3981_v26 = vpop.eup %3980 }
 0xcb4   :  { %v3983_v7 = vpop.eup %3982  ;;  %v2694_v48 = vadd.f32 1.0, %v3981_v26  ;;  %v5337_v26 = vld [vmem:[#allocation9 + $0x108] ss:$16 sps:$4 sm:$0xff]  }
 0xcb5   :  { %v2700_v22 = vadd.f32 1.0, %v3983_v7  ;;  %v3985_v47 = vpop.eup %3984  ;;  %v5340_v7 = vld [vmem:[#allocation9 + $0x124] ss:$16 sps:$4 sm:$0xff]  }
 0xcb6   :  { %3988 = vrcp.f32 %v2694_v48  ;;  %v3987_v60 = vpop.eup %3986  ;;  %v2707_v14 = vadd.f32 1.0, %v3985_v47  ;;  %v5343_v48 = vld [vmem:[#allocation9 + $0x12c] ss:$16 sps:$4 sm:$0xff]   ;;  %v5351_v47 = vld [vmem:[#allocation9 + $0x128] ss:$16 sps:$4 sm:$0xff]  }
 0xcb7   :  { %3990 = vrcp.f32 %v2700_v22  ;;  %v5348_v22 = vld [vmem:[#allocation9 + $0x120] ss:$16 sps:$4 sm:$0xff]  }
 0xcb8   :  { %3992 = vrcp.f32 %v2707_v14  ;;  %v5366_v14 = vld [vmem:[#allocation9 + $0x164] ss:$16 sps:$4 sm:$0xff]  }
 0xcc0   :  { %v3989_v13 = vpop.eup %3988 }
 0xcc1   :  { %v3991_v25 = vpop.eup %3990  ;;  %v2711_v37 = vmul.f32 %v3989_v13, %v3987_v60  ;;  %v5354_v60 = vld [vmem:[#allocation9 + $0x144] ss:$16 sps:$4 sm:$0xff]   ;;  %v5357_v13 = vld [vmem:[#allocation9 + $0x14c] ss:$16 sps:$4 sm:$0xff]  }
 0xcc2   :  { %v2710_v55 = vmul.f32 %v3991_v25, %v5227_v24  ;;  %v3993_v42 = vpop.eup %3992  ;;  %v5360_v25 = vld [vmem:[#allocation9 + $0x140] ss:$16 sps:$4 sm:$0xff]  }
 0xcc4   :  { %v5277_v32 = vadd.f32 %v2711_v37, %v2710_v55  ;;  %v5363_v37 = vld [vmem:[#allocation9 + $0x148] ss:$16 sps:$4 sm:$0xff]   ;;  %v5369_v55 = vld [vmem:[#allocation9 + $0x16c] ss:$16 sps:$4 sm:$0xff]  }
 0xcc6   :  { %3994 = vtanh.f32 %v5277_v32 }
 0xcd0   :  { %v3995_v33 = vpop.eup %3994 }
 0xcd1   :  { %v5280_v16 = vmul.f32 %v3995_v33, %v3993_v42  ;;  %v5375_v42 = vld [vmem:[#allocation9 + $0x168] ss:$16 sps:$4 sm:$0xff]   ;;  %v5378_v33 = vld [vmem:[#allocation9 + $0x184] ss:$16 sps:$4 sm:$0xff]  }
 0xcd3   :  { %v2720_v28 = vpack.c.bf16 %v5280_v16, %v5280_v16 }
 0xcd5   :  { %2754 = vmatmul.mubr.bf16.vlgmr.msra.gmra.mrb[64].mxu0 %v2720_v28  ;;  %2795 = vmatmul.mubr.bf16.vlgmr.msra.gmra.mrb[96].mxu1 %v2720_v28  ;;  %v5381_v28 = vld [vmem:[#allocation9 + $0x18c] ss:$16 sps:$4 sm:$0xff]  }
 0xcd6   :  { %2838 = vmatpush1.bf16.msra.mxu0 %v4898_v51  ;;  %2879 = vmatpush1.bf16.msra.mxu1 %v4900_v30  ;;  %v5609_v51 = vld [vmem:[#allocation30_spill] sm:$0xff] }
 0xcd7   :  { %2839 = vmatprep.subr.bf16.mxu0 %v4906_v31  ;;  %2880 = vmatprep.subr.bf16.mxu1 %v4908_v29  ;;  %v1937_v30 = vadd.f32 %v5609_v51, %v5101_v59  ;;  %v5610_v31 = vld [vmem:[#allocation22_spill] sm:$0xff]  ;;  %v5384_v51 = vld [vmem:[#allocation9 + $0x180] ss:$16 sps:$4 sm:$0xff]  }
 0xcd8   :  { %2869 = vmatprep.mubr.bf16.mxu0 %v5555_v50  ;;  %2910 = vmatprep.mubr.bf16.mxu1 %v5555_v50  ;;  %v2010_v29 = vadd.f32 %v5610_v31, %v5105_v57  ;;  %v5390_v31 = vld [vmem:[#allocation9 + $0x1a4] ss:$16 sps:$4 sm:$0xff]  }
 0xcda   :  { %2840 = vmatpush1.bf16.msra.mxu0 %v4910_v61  ;;  %2881 = vmatpush1.bf16.msra.mxu1 %v4912_v62  ;;  %v5611_v61 = vld [vmem:[#allocation31_spill] sm:$0xff] }
 0xcdb   :  { %2841 = vmatprep.subr.bf16.mxu0 %v4918_v18  ;;  %2882 = vmatprep.subr.bf16.mxu1 %v4920_v63  ;;  %v1939_v62 = vadd.f32 %v5611_v61, %v5113_v54  ;;  %v5612_v18 = vld [vmem:[#allocation23_spill] sm:$0xff] }
 0xcdc   :  { %v2012_v63 = vadd.f32 %v5612_v18, %v5117_v34  ;;  %v5396_v61 = vld [vmem:[#allocation9 + $0x1a0] ss:$16 sps:$4 sm:$0xff]   ;;  %v5402_v18 = vld [vmem:[#allocation9 + $0x1c4] ss:$16 sps:$4 sm:$0xff]  }
 0xcde   :  { %2842 = vmatpush1.bf16.msra.mxu0 %v4922_v1  ;;  %2883 = vmatpush1.bf16.msra.mxu1 %v4924_v2 }
 0xcdf   :  { %2843 = vmatprep.subr.bf16.mxu0 %v4930_v5  ;;  %2884 = vmatprep.subr.bf16.mxu1 %v4932_v38 }
 0xce2   :  { %2844 = vmatpush1.bf16.msra.mxu0 %v4934_v6  ;;  %2885 = vmatpush1.bf16.msra.mxu1 %v4936_v20 }
 0xce3   :  { %2845 = vmatprep.subr.bf16.mxu0 %v4942_v23  ;;  %2886 = vmatprep.subr.bf16.mxu1 %v4944_v44 }
 0xce6   :  { %2846 = vmatpush1.bf16.msra.mxu0 %v4946_v9  ;;  %2887 = vmatpush1.bf16.msra.mxu1 %v4948_v45 }
 0xce7   :  { %2847 = vmatprep.subr.bf16.mxu0 %v4954_v11  ;;  %2888 = vmatprep.subr.bf16.mxu1 %v4956_v46 }
 0xcea   :  { %2848 = vmatpush1.bf16.msra.mxu0 %v4958_v15  ;;  %2889 = vmatpush1.bf16.msra.mxu1 %v4960_v0 }
 0xceb   :  { %2849 = vmatprep.subr.bf16.mxu0 %v4966_v3  ;;  %2890 = vmatprep.subr.bf16.mxu1 %v4968_v43 }
 0xcee   :  { %2850 = vmatpush1.bf16.msra.mxu0 %v4970_v53  ;;  %2891 = vmatpush1.bf16.msra.mxu1 %v4972_v40 }
 0xcef   :  { %2851 = vmatprep.subr.bf16.mxu0 %v4978_v41  ;;  %2892 = vmatprep.subr.bf16.mxu1 %v4980_v19 }
 0xcf2   :  { %2852 = vmatpush1.bf16.msra.mxu0 %v4982_v39  ;;  %2893 = vmatpush1.bf16.msra.mxu1 %v4984_v21 }
 0xcf3   :  { %2953 = vmatprep.subr.bf16.mxu0 %v4894_v52  ;;  %2994 = vmatprep.subr.bf16.mxu1 %v4896_v8 }
 0xda8   :  { %v2755_v1 = vpop.f32.mrb[64].mxu0  ;;  %v2796_v2 = vpop.f32.mrb[96].mxu1 }
 0xda9   :  { %v2803_v5 = vadd.f32 %v2755_v1, %v1937_v30  ;;  %v2805_v38 = vadd.f32 %v2796_v2, %v2010_v29  ;;  %v2757_v6 = vpop.f32.mrb[65].mxu0  ;;  %v2798_v52 = vpop.f32.mrb[97].mxu1  ;;  %v5387_v30 = vld [vmem:[#allocation9 + $0x188] ss:$16 sps:$4 sm:$0xff]   ;;  %v5393_v29 = vld [vmem:[#allocation9 + $0x1ac] ss:$16 sps:$4 sm:$0xff]  }
 0xdaa   :  { %v2804_v20 = vadd.f32 %v2757_v6, %v1939_v62  ;;  %v2806_v8 = vadd.f32 %v2798_v52, %v2012_v63  ;;  %v2759_v23 = vpop.f32.mrb[66].mxu0  ;;  %v2800_v44 = vpop.f32.mrb[98].mxu1  ;;  %v5399_v62 = vld [vmem:[#allocation9 + $0x1a8] ss:$16 sps:$4 sm:$0xff]   ;;  %v5405_v63 = vld [vmem:[#allocation9 + $0x1cc] ss:$16 sps:$4 sm:$0xff]  }
 0xdab   :  { %v3531_v9 = vmul.f32 -1.442695, %v2803_v5  ;;  %v2760_v45 = vpop.f32.mrb[67].mxu0  ;;  %v2801_v11 = vpop.f32.mrb[99].mxu1  ;;  %v5408_v1 = vld [vmem:[#allocation9 + $0x1c0] ss:$16 sps:$4 sm:$0xff]  }
 0xdac   :  { %v3532_v46 = vmul.f32 -1.442695, %v2804_v20  ;;  %v3533_v15 = vmul.f32 -1.442695, %v2806_v8  ;;  %v5411_v2 = vld [vmem:[#allocation9 + $0x1c8] ss:$16 sps:$4 sm:$0xff]  }
 0xdad   :  { %3996 = vpow2.f32 %v3531_v9  ;;  %v5414_v5 = vld [vmem:[#allocation9 + $0x1e4] ss:$16 sps:$4 sm:$0xff]   ;;  %v5420_v6 = vld [vmem:[#allocation9 + $0x1e0] ss:$16 sps:$4 sm:$0xff]   ;;  %v5423_v52 = vld [vmem:[#allocation9 + $0x1e8] ss:$16 sps:$4 sm:$0xff]  }
 0xdae   :  { %3998 = vpow2.f32 %v3532_v46  ;;  %v4122_v20 = vld [vmem:[#allocation9 + $0x104] ss:$16 sps:$4 sm:$0xff]   ;;  %v4123_v8 = vld [vmem:[#allocation9 + $0x10c] ss:$16 sps:$4 sm:$0xff]  }
 0xdaf   :  { %4000 = vpow2.f32 %v3533_v15  ;;  %v5613_v23 = vld [vmem:[#allocation32_spill] sm:$0xff]  ;;  %v5615_v11 = vld [vmem:[#allocation33_spill] sm:$0xff] }
 0xdb0   :  { %4002 = vtanh.f32 %v2805_v38  ;;  %v5417_v38 = vld [vmem:[#allocation9 + $0x1ec] ss:$16 sps:$4 sm:$0xff]   ;;  %v1941_v44 = vadd.f32 %v5613_v23, %v5101_v59  ;;  %v1943_v46 = vadd.f32 %v5615_v11, %v5113_v54  ;;  %v5616_v15 = vld [vmem:[#allocation25_spill] sm:$0xff] }
 0xdb1   :  { %v5614_v9 = vld [vmem:[#allocation24_spill] sm:$0xff] }
 0xdb2   :  { %v2014_v45 = vadd.f32 %v5614_v9, %v5105_v57 }
 0xdb7   :  { %v3997_v0 = vpop.eup %3996 }
 0xdb8   :  { %v3999_v3 = vpop.eup %3998  ;;  %v2810_v43 = vadd.f32 1.0, %v3997_v0  ;;  %v2016_v0 = vadd.f32 %v5616_v15, %v5117_v34 }
 0xdb9   :  { %v2816_v53 = vadd.f32 1.0, %v3999_v3  ;;  %v4001_v40 = vpop.eup %4000 }
 0xdba   :  { %4004 = vrcp.f32 %v2810_v43  ;;  %v4003_v41 = vpop.eup %4002  ;;  %v2823_v24 = vadd.f32 1.0, %v4001_v40 }
 0xdbb   :  { %4006 = vrcp.f32 %v2816_v53 }
 0xdbc   :  { %4008 = vrcp.f32 %v2823_v24 }
 0xdc4   :  { %v4005_v19 = vpop.eup %4004 }
 0xdc5   :  { %v4007_v39 = vpop.eup %4006  ;;  %v2827_v21 = vmul.f32 %v4005_v19, %v4003_v41 }
 0xdc6   :  { %v2826_v4 = vmul.f32 %v4007_v39, %v5277_v32  ;;  %v4009_v35 = vpop.eup %4008  ;;  %v5372_v32 = vld [vmem:[#allocation9 + $0x160] ss:$16 sps:$4 sm:$0xff]  }
 0xdc8   :  { %v5327_v36 = vadd.f32 %v2827_v21, %v2826_v4 }
 0xdca   :  { %4010 = vtanh.f32 %v5327_v36 }
 0xdd4   :  { %v4011_v27 = vpop.eup %4010 }
 0xdd5   :  { %v5330_v49 = vmul.f32 %v4011_v27, %v4009_v35 }
 0xdd7   :  { %v2836_v58 = vpack.c.bf16 %v5330_v49, %v5330_v49 }
 0xdd9   :  { %2870 = vmatmul.mubr.bf16.vlgmr.msra.gmra.mrb[68].mxu0 %v2836_v58  ;;  %2911 = vmatmul.mubr.bf16.vlgmr.msra.gmra.mrb[100].mxu1 %v2836_v58 }
 0xdda   :  { %2954 = vmatpush1.bf16.msra.mxu0 %v5334_v17  ;;  %2995 = vmatpush1.bf16.msra.mxu1 %v5337_v26 }
 0xddb   :  { %2955 = vmatprep.subr.bf16.mxu0 %v5340_v7  ;;  %2996 = vmatprep.subr.bf16.mxu1 %v5343_v48 }
 0xddc   :  { %2985 = vmatprep.mubr.bf16.mxu0 %v5555_v50  ;;  %3026 = vmatprep.mubr.bf16.mxu1 %v5555_v50 }
 0xdde   :  { %2956 = vmatpush1.bf16.msra.mxu0 %v5348_v22  ;;  %2997 = vmatpush1.bf16.msra.mxu1 %v5351_v47 }
 0xddf   :  { %2957 = vmatprep.subr.bf16.mxu0 %v5354_v60  ;;  %2998 = vmatprep.subr.bf16.mxu1 %v5357_v13 }
 0xde2   :  { %2958 = vmatpush1.bf16.msra.mxu0 %v5360_v25  ;;  %2999 = vmatpush1.bf16.msra.mxu1 %v5363_v37 }
 0xde3   :  { %2959 = vmatprep.subr.bf16.mxu0 %v5366_v14  ;;  %3000 = vmatprep.subr.bf16.mxu1 %v5369_v55 }
 0xde6   :  { %2960 = vmatpush1.bf16.msra.mxu0 %v5372_v32  ;;  %3001 = vmatpush1.bf16.msra.mxu1 %v5375_v42 }
 0xde7   :  { %2961 = vmatprep.subr.bf16.mxu0 %v5378_v33  ;;  %3002 = vmatprep.subr.bf16.mxu1 %v5381_v28 }
 0xdea   :  { %2962 = vmatpush1.bf16.msra.mxu0 %v5384_v51  ;;  %3003 = vmatpush1.bf16.msra.mxu1 %v5387_v30 }
 0xdeb   :  { %2963 = vmatprep.subr.bf16.mxu0 %v5390_v31  ;;  %3004 = vmatprep.subr.bf16.mxu1 %v5393_v29 }
 0xdee   :  { %2964 = vmatpush1.bf16.msra.mxu0 %v5396_v61  ;;  %3005 = vmatpush1.bf16.msra.mxu1 %v5399_v62 }
 0xdef   :  { %2965 = vmatprep.subr.bf16.mxu0 %v5402_v18  ;;  %3006 = vmatprep.subr.bf16.mxu1 %v5405_v63 }
 0xdf2   :  { %2966 = vmatpush1.bf16.msra.mxu0 %v5408_v1  ;;  %3007 = vmatpush1.bf16.msra.mxu1 %v5411_v2 }
 0xdf3   :  { %2967 = vmatprep.subr.bf16.mxu0 %v5414_v5  ;;  %3008 = vmatprep.subr.bf16.mxu1 %v5417_v38 }
 0xdf6   :  { %2968 = vmatpush1.bf16.msra.mxu0 %v5420_v6  ;;  %3009 = vmatpush1.bf16.msra.mxu1 %v5423_v52 }
 0xdf7   :  { %3069 = vmatprep.subr.bf16.mxu0 %v4122_v20  ;;  %3110 = vmatprep.subr.bf16.mxu1 %v4123_v8 }
 0xeac   :  { %v2871_v3 = vpop.f32.mrb[68].mxu0  ;;  %v2912_v43 = vpop.f32.mrb[100].mxu1 }
 0xead   :  { %v2919_v53 = vadd.f32 %v2871_v3, %v1941_v44  ;;  %v2921_v40 = vadd.f32 %v2912_v43, %v2014_v45  ;;  %v2873_v41 = vpop.f32.mrb[69].mxu0  ;;  %v2914_v19 = vpop.f32.mrb[101].mxu1 }
 0xeae   :  { %v2920_v39 = vadd.f32 %v2873_v41, %v1943_v46  ;;  %v2922_v21 = vadd.f32 %v2914_v19, %v2016_v0  ;;  %v2875_v24 = vpop.f32.mrb[70].mxu0  ;;  %v2916_v4 = vpop.f32.mrb[102].mxu1 }
 0xeaf   :  { %v3534_v35 = vmul.f32 -1.442695, %v2919_v53  ;;  %v2876_v27 = vpop.f32.mrb[71].mxu0  ;;  %v2917_v58 = vpop.f32.mrb[103].mxu1 }
 0xeb0   :  { %v3535_v20 = vmul.f32 -1.442695, %v2920_v39  ;;  %v3536_v8 = vmul.f32 -1.442695, %v2922_v21 }
 0xeb1   :  { %4012 = vpow2.f32 %v3534_v35 }
 0xeb2   :  { %4014 = vpow2.f32 %v3535_v20 }
 0xeb3   :  { %4016 = vpow2.f32 %v3536_v8 }
 0xeb4   :  { %4018 = vtanh.f32 %v2921_v40 }
 0xebb   :  { %v4013_v23 = vpop.eup %4012 }
 0xebc   :  { %v4015_v9 = vpop.eup %4014  ;;  %v2926_v11 = vadd.f32 1.0, %v4013_v23 }
 0xebd   :  { %v2932_v44 = vadd.f32 1.0, %v4015_v9  ;;  %v4017_v45 = vpop.eup %4016  ;;  %v3797_v9 = vld [vmem:[#allocation10 + $0x8] sm:$0xff]  }
 0xebe   :  { %4020 = vrcp.f32 %v2926_v11  ;;  %v4019_v46 = vpop.eup %4018  ;;  %v2939_v43 = vadd.f32 1.0, %v4017_v45  ;;  %v3188_v11 = vpack.c.bf16 %v5180_v56, %v5130_v12  ;;  %v3799_v45 = vld [vmem:[#allocation10 + $0x18] sm:$0xff]   ;;  %v3189_v56 = vpack.c.bf16 %v5280_v16, %v5230_v10 }
 0xebf   :  { %4022 = vrcp.f32 %v2932_v44  ;;  %v3798_v44 = vld [vmem:[#allocation10 + $0x10] sm:$0xff]   ;;  %v3803_v12 = vld [vmem:[#allocation10 + $0x38] sm:$0xff]  }
 0xec0   :  { %4024 = vrcp.f32 %v2939_v43  ;;  %v5621_v43 = vld [vmem:[#allocation37_spill] sm:$0xff] }
 0xec8   :  { %v4021_v15 = vpop.eup %4020 }
 0xec9   :  { %v4023_v0 = vpop.eup %4022  ;;  %v2943_v3 = vmul.f32 %v4021_v15, %v4019_v46  ;;  %v3800_v46 = vld [vmem:[#allocation10 + $0x20] sm:$0xff]   ;;  %v3801_v15 = vld [vmem:[#allocation10 + $0x28] sm:$0xff]  }
 0xeca   :  { %v2942_v53 = vmul.f32 %v4023_v0, %v5327_v36  ;;  %v4025_v19 = vpop.eup %4024  ;;  %v5617_v36 = vld [vmem:[#allocation34_spill] sm:$0xff]  ;;  %v3802_v0 = vld [vmem:[#allocation10 + $0x30] sm:$0xff]  }
 0xecc   :  { %v5435_v41 = vadd.f32 %v2943_v3, %v2942_v53  ;;  %v1951_v53 = vadd.f32 %v5621_v43, %v5101_v59 }
 0xece   :  { %4026 = vtanh.f32 %v5435_v41 }
 0xed8   :  { %v4027_v39 = vpop.eup %4026 }
 0xed9   :  { %v5438_v21 = vmul.f32 %v4027_v39, %v4025_v19  ;;  %v5623_v39 = vld [vmem:[#allocation17_spill] sm:$0xff] }
 0xedb   :  { %v2952_v40 = vpack.c.bf16 %v5438_v21, %v5438_v21  ;;  %v3190_v3 = vpack.c.bf16 %v5438_v21, %v5330_v49 }
 0xedd   :  { %2986 = vmatmul.mubr.bf16.vlgmr.msra.gmra.mrb[72].mxu0 %v2952_v40  ;;  %3027 = vmatmul.mubr.bf16.vlgmr.msra.gmra.mrb[104].mxu1 %v2952_v40  ;;  %v1953_v40 = vadd.f32 %v5623_v39, %v5113_v54 }
 0xede   :  { %3070 = vmatpush1.bf16.msra.mxu0 %v5334_v17  ;;  %3111 = vmatpush1.bf16.msra.mxu1 %v5337_v26  ;;  %v1947_v17 = vadd.f32 %v5617_v36, %v5101_v59  ;;  %v5618_v26 = vld [vmem:[#allocation26_spill] sm:$0xff] }
 0xedf   :  { %3071 = vmatprep.subr.bf16.mxu0 %v5340_v7  ;;  %3112 = vmatprep.subr.bf16.mxu1 %v5343_v48  ;;  %v2020_v7 = vadd.f32 %v5618_v26, %v5105_v57  ;;  %v5619_v48 = vld [vmem:[#allocation35_spill] sm:$0xff] }
 0xee0   :  { %3101 = vmatprep.mubr.bf16.mxu0 %v5555_v50  ;;  %3142 = vmatprep.mubr.bf16.mxu1 %v5555_v50  ;;  %v3796_v50 = vld [vmem:[#allocation10] sm:$0xff]  }
 0xee2   :  { %3072 = vmatpush1.bf16.msra.mxu0 %v5348_v22  ;;  %3113 = vmatpush1.bf16.msra.mxu1 %v5351_v47  ;;  %v1949_v22 = vadd.f32 %v5619_v48, %v5113_v54  ;;  %v5620_v47 = vld [vmem:[#allocation36_spill] sm:$0xff] }
 0xee3   :  { %3073 = vmatprep.subr.bf16.mxu0 %v5354_v60  ;;  %3114 = vmatprep.subr.bf16.mxu1 %v5357_v13  ;;  %v2022_v60 = vadd.f32 %v5620_v47, %v5117_v34 }
 0xee6   :  { %3074 = vmatpush1.bf16.msra.mxu0 %v5360_v25  ;;  %3115 = vmatpush1.bf16.msra.mxu1 %v5363_v37 }
 0xee7   :  { %3075 = vmatprep.subr.bf16.mxu0 %v5366_v14  ;;  %3116 = vmatprep.subr.bf16.mxu1 %v5369_v55 }
 0xeea   :  { %3076 = vmatpush1.bf16.msra.mxu0 %v5372_v32  ;;  %3117 = vmatpush1.bf16.msra.mxu1 %v5375_v42 }
 0xeeb   :  { %3077 = vmatprep.subr.bf16.mxu0 %v5378_v33  ;;  %3118 = vmatprep.subr.bf16.mxu1 %v5381_v28 }
 0xeee   :  { %3078 = vmatpush1.bf16.msra.mxu0 %v5384_v51  ;;  %3119 = vmatpush1.bf16.msra.mxu1 %v5387_v30 }
 0xeef   :  { %3079 = vmatprep.subr.bf16.mxu0 %v5390_v31  ;;  %3120 = vmatprep.subr.bf16.mxu1 %v5393_v29 }
 0xef2   :  { %3080 = vmatpush1.bf16.msra.mxu0 %v5396_v61  ;;  %3121 = vmatpush1.bf16.msra.mxu1 %v5399_v62 }
 0xef3   :  { %3081 = vmatprep.subr.bf16.mxu0 %v5402_v18  ;;  %3122 = vmatprep.subr.bf16.mxu1 %v5405_v63 }
 0xef6   :  { %3082 = vmatpush1.bf16.msra.mxu0 %v5408_v1  ;;  %3123 = vmatpush1.bf16.msra.mxu1 %v5411_v2 }
 0xef7   :  { %3083 = vmatprep.subr.bf16.mxu0 %v5414_v5  ;;  %3124 = vmatprep.subr.bf16.mxu1 %v5417_v38 }
 0xefa   :  { %3084 = vmatpush1.bf16.msra.mxu0 %v5420_v6  ;;  %3125 = vmatpush1.bf16.msra.mxu1 %v5423_v52 }
 0xefb   :  { %3564 = vmatprep.subr.bf16.mxu0 %v3796_v50 }
 0xfb0   :  { %v2987_v13 = vpop.f32.mrb[72].mxu0  ;;  %v3028_v25 = vpop.f32.mrb[104].mxu1 }
 0xfb1   :  { %v3035_v37 = vadd.f32 %v2987_v13, %v1947_v17  ;;  %v3037_v14 = vadd.f32 %v3028_v25, %v2020_v7  ;;  %v2989_v55 = vpop.f32.mrb[73].mxu0  ;;  %v3030_v32 = vpop.f32.mrb[105].mxu1 }
 0xfb2   :  { %v3036_v42 = vadd.f32 %v2989_v55, %v1949_v22  ;;  %v3038_v33 = vadd.f32 %v3030_v32, %v2022_v60  ;;  %v2991_v28 = vpop.f32.mrb[74].mxu0  ;;  %v3032_v51 = vpop.f32.mrb[106].mxu1 }
 0xfb3   :  { %v3537_v30 = vmul.f32 -1.442695, %v3035_v37  ;;  %v2992_v31 = vpop.f32.mrb[75].mxu0  ;;  %v3033_v29 = vpop.f32.mrb[107].mxu1 }
 0xfb4   :  { %v3538_v61 = vmul.f32 -1.442695, %v3036_v42  ;;  %v3539_v62 = vmul.f32 -1.442695, %v3038_v33  ;;  %v3543_v31 = vld [vmem:[%s5526_s5] ss:$0 sm:$0xff] }
 0xfb5   :  { %4028 = vpow2.f32 %v3537_v30  ;;  %s4251_s5 = smov [#allocation12]  }
 0xfb6   :  { %4030 = vpow2.f32 %v3538_v61  ;;  %s3341_s25 = sshll.u32 %s4251_s5, 4  ;;  %s3342_s25 = int_to_ptr.vmem [resolvable:$true] %s3341_s25 }
 0xfb7   :  { %4032 = vpow2.f32 %v3539_v62  ;;  %s4212_s26 = scalar_lea.vmem %s3342_s25, 1024  ;;  %p4217_p5 = scmp.lt.s32.totalorder %s3342_s25, %s3342_s25 }
 0xfb8   :  { %4034 = vtanh.f32 %v3037_v14  ;;  %p4213_p4 = scmp.ne.s32.totalorder %s3342_s25, %s4212_s26  ;;  %p4218_p6 = scmp.lt.s32.totalorder %s4212_s26, %s4212_s26 }
 0xfba   :  { %p4219_p7 = por %p4218_p6, %p4217_p5 }
 0xfbc   :  { %p4220_p8 = pnand %p4219_p7, %p4213_p4 }
 0xfbf   :  { %v4029_v18 = vpop.eup %4028 }
 0xfc0   :  { %v4031_v63 = vpop.eup %4030  ;;  %v3042_v1 = vadd.f32 1.0, %v4029_v18 }
 0xfc1   :  { %v3048_v2 = vadd.f32 1.0, %v4031_v63  ;;  %v4033_v5 = vpop.eup %4032 }
 0xfc2   :  { %4036 = vrcp.f32 %v3042_v1  ;;  %v4035_v38 = vpop.eup %4034  ;;  %v3055_v4 = vadd.f32 1.0, %v4033_v5 }
 0xfc3   :  { %4038 = vrcp.f32 %v3048_v2 }
 0xfc4   :  { %4040 = vrcp.f32 %v3055_v4 }
 0xfcc   :  { %v4037_v6 = vpop.eup %4036 }
 0xfcd   :  { %v4039_v52 = vpop.eup %4038  ;;  %v3059_v24 = vmul.f32 %v4037_v6, %v4035_v38 }
 0xfce   :  { %v3058_v35 = vmul.f32 %v4039_v52, %v5435_v41  ;;  %v4041_v58 = vpop.eup %4040  ;;  %v5622_v41 = vld [vmem:[#allocation38_spill] sm:$0xff] }
 0xfcf   :  { %v2024_v19 = vadd.f32 %v5622_v41, %v5105_v57 }
 0xfd0   :  { %v5483_v27 = vadd.f32 %v3059_v24, %v3058_v35 }
 0xfd2   :  { %4042 = vtanh.f32 %v5483_v27 }
 0xfdc   :  { %v4043_v20 = vpop.eup %4042 }
 0xfdd   :  { %v5486_v8 = vmul.f32 %v4043_v20, %v4041_v58 }
 0xfdf   :  { %v3068_v23 = vpack.c.bf16 %v5486_v8, %v5486_v8 }
 0xfe1   :  { %3102 = vmatmul.mubr.bf16.vlgmr.msra.gmra.mrb[76].mxu0 %v3068_v23  ;;  %3143 = vmatmul.mubr.bf16.vlgmr.msra.gmra.mrb[108].mxu1 %v3068_v23 }
 0xfe2   :  { %3565 = vmatpush3.bf16.msra.mxu0 %v3796_v50  ;;  %3580 = vmatprep.mubr.bf16.mxu0 %v3188_v11  ;;  %v5624_v50 = vld [vmem:[#allocation39_spill] sm:$0xff] }
 0xfe3   :  { %3566 = vmatprep.subr.bf16.mxu0 %v3797_v9  ;;  %v2026_v36 = vadd.f32 %v5624_v50, %v5117_v34 }
 0xfe6   :  { %3567 = vmatpush3.bf16.msra.mxu0 %v3797_v9 }
 0xfe7   :  { %3568 = vmatprep.subr.bf16.mxu0 %v3798_v44 }
 0xfea   :  { %3569 = vmatpush3.bf16.msra.mxu0 %v3798_v44 }
 0xfeb   :  { %3570 = vmatprep.subr.bf16.mxu0 %v3799_v45 }
 0xfee   :  { %3571 = vmatpush3.bf16.msra.mxu0 %v3799_v45 }
 0xfef   :  { %3572 = vmatprep.subr.bf16.mxu0 %v3800_v46 }
 0xff2   :  { %3573 = vmatpush3.bf16.msra.mxu0 %v3800_v46 }
 0xff3   :  { %3574 = vmatprep.subr.bf16.mxu0 %v3801_v15 }
 0xff6   :  { %3575 = vmatpush3.bf16.msra.mxu0 %v3801_v15 }
 0xff7   :  { %3576 = vmatprep.subr.bf16.mxu0 %v3802_v0 }
 0xffa   :  { %3577 = vmatpush3.bf16.msra.mxu0 %v3802_v0 }
 0xffb   :  { %3578 = vmatprep.subr.bf16.mxu0 %v3803_v12 }
 0xffe   :  { %3579 = vmatpush3.bf16.msra.mxu0 %v3803_v12 }
0x1001   :  { %3581 = vmatmul.mubr.bf16.vlgmr.msra.gmra.mrb[80].mxu0 %v3189_v56 }
0x1002   :  { %3584 = vmatprep.mubr.bf16.mxu0 %v3190_v3 }
0x10b4   :  { %v3103_v17 = vpop.f32.mrb[76].mxu0  ;;  %v3144_v26 = vpop.f32.mrb[108].mxu1 }
0x10b5   :  { %v3151_v10 = vadd.f32 %v3103_v17, %v1951_v53  ;;  %v3153_v16 = vadd.f32 %v3144_v26, %v2024_v19  ;;  %v3105_v7 = vpop.f32.mrb[77].mxu0  ;;  %v3146_v49 = vpop.f32.mrb[109].mxu1 }
0x10b6   :  { %v3152_v21 = vadd.f32 %v3105_v7, %v1953_v40  ;;  %v3154_v48 = vadd.f32 %v3146_v49, %v2026_v36  ;;  %v3107_v22 = vpop.f32.mrb[78].mxu0  ;;  %v3148_v47 = vpop.f32.mrb[110].mxu1 }
0x10b7   :  { %v3540_v59 = vmul.f32 -1.442695, %v3151_v10  ;;  %v3108_v60 = vpop.f32.mrb[79].mxu0  ;;  %v3149_v13 = vpop.f32.mrb[111].mxu1 }
0x10b8   :  { %v3541_v57 = vmul.f32 -1.442695, %v3152_v21  ;;  %v3542_v54 = vmul.f32 -1.442695, %v3154_v48 }
0x10b9   :  { %4044 = vpow2.f32 %v3540_v59 }
0x10ba   :  { %4046 = vpow2.f32 %v3541_v57 }
0x10bb   :  { %4048 = vpow2.f32 %v3542_v54 }
0x10bc   :  { %4050 = vtanh.f32 %v3153_v16 }
0x10c3   :  { %v4045_v25 = vpop.eup %4044 }
0x10c4   :  { %v4047_v37 = vpop.eup %4046  ;;  %v3158_v34 = vadd.f32 1.0, %v4045_v25 }
0x10c5   :  { %v3164_v14 = vadd.f32 1.0, %v4047_v37  ;;  %v4049_v55 = vpop.eup %4048 }
0x10c6   :  { %4052 = vrcp.f32 %v3158_v34  ;;  %v4051_v32 = vpop.eup %4050  ;;  %v3171_v51 = vadd.f32 1.0, %v4049_v55 }
0x10c7   :  { %4054 = vrcp.f32 %v3164_v14 }
0x10c8   :  { %4056 = vrcp.f32 %v3171_v51 }
0x10d0   :  { %v4053_v42 = vpop.eup %4052 }
0x10d1   :  { %v4055_v33 = vpop.eup %4054  ;;  %v3175_v28 = vmul.f32 %v4053_v42, %v4051_v32 }
0x10d2   :  { %v3174_v30 = vmul.f32 %v4055_v33, %v5483_v27  ;;  %v4057_v6 = vpop.eup %4056 }
0x10d4   :  { %v3582_v29 = vpop.f32.mrb[80].mxu0  ;;  %v3176_v61 = vadd.f32 %v3175_v28, %v3174_v30 }
0x10d5   :  { %v3306_v62 = vadd.f32 %v3582_v29, %v3543_v31  ;;  %v3297_v18 = vpop.f32.mrb[81].mxu0 }
0x10d6   :  { %v3298_v63 = vadd.f32 %v3543_v31, %v3297_v18  ;;  %v3583_v1 = vpop.f32.mrb[82].mxu0  ;;  %4058 = vtanh.f32 %v3176_v61 }
0x10d7   :  { %3330 = vst [vmem:[#allocation12 + $0x10] sm:$0xff] %v3306_v62  ;;  %v3309_v2 = vadd.f32 %v3583_v1, %v3543_v31  ;;  %v3300_v5 = vpop.f32.mrb[83].mxu0 }
0x10d8   :  { %3328 = vst [vmem:[#allocation12] sm:$0xff] %v3298_v63  ;;  %v3301_v38 = vadd.f32 %v3543_v31, %v3300_v5 }
0x10d9   :  { %3331 = vst [vmem:[#allocation12 + $0x18] sm:$0xff] %v3309_v2 }
0x10da   :  { %3329 = vst [vmem:[#allocation12 + $0x8] sm:$0xff] %v3301_v38 }
0x10e0   :  { %v4059_v52 = vpop.eup %4058 }
0x10e1   :  { %v3178_v24 = vmul.f32 %v4059_v52, %v4057_v6 }
0x10e3   :  { %v3191_v4 = vpack.c.bf16 %v3178_v24, %v5486_v8 }
0x10e5   :  { %3585 = vmatmul.mubr.bf16.gmra.mrb[84].mxu0 %v3191_v4 }
0x11b8   :  { %v3586_v35 = vpop.f32.mrb[84].mxu0 }
0x11b9   :  { %v3322_v27 = vadd.f32 %v3586_v35, %v3543_v31  ;;  %v3313_v58 = vpop.f32.mrb[85].mxu0 }
0x11ba   :  { %v3314_v20 = vadd.f32 %v3543_v31, %v3313_v58  ;;  %v3587_v23 = vpop.f32.mrb[86].mxu0 }
0x11bb   :  { %3334 = vst [vmem:[#allocation12 + $0x30] sm:$0xff] %v3322_v27  ;;  %v3325_v9 = vadd.f32 %v3587_v23, %v3543_v31  ;;  %v3316_v11 = vpop.f32.mrb[87].mxu0 }
0x11bc   :  { %3332 = vst [vmem:[#allocation12 + $0x20] sm:$0xff] %v3314_v20  ;;  %v3317_v44 = vadd.f32 %v3543_v31, %v3316_v11 }
0x11bd   :  { %3335 = vst [vmem:[#allocation12 + $0x38] sm:$0xff] %v3325_v9 }
0x11be   :  { %3333 = vst [vmem:[#allocation12 + $0x28] sm:$0xff] %v3317_v44 }
0x11bf   :  { %4223 = shalt.err (!%p4220_p8)
}
0x11c0   :  { %s4224_s29 = scalar_lea.hbm %s5527_s6, 1024 }
0x11c1   :  { %p4225_p9 = scmp.ne.s32.totalorder %s5527_s6, %s4224_s29  ;;  %p4228_p10 = scmp.lt.u32.totalorder %s4224_s29, %s5527_s6 }
0x11c3   :  { %p4230_p11 = pnand %p4228_p10, %p4225_p9 }
0x11c5   :  { %4233 = shalt.err (!%p4230_p11)
}
0x11c6   :  { %s4252_s13 = smov 128   ;;  %s4253_s0 = smov 8  }
0x11c7   :  { %3347 = dma.vmem_to_hbm [thread:$0]  %s3342_s25, 1024, %s5527_s6, [#allocation6], %s4252_s13, %s4252_s13, %s4253_s0  }
0x11c8   :  { %4240 = dma.done.wait [#allocation6], 1024  }
0x11c9   :  { %4241 = vsyncadd [#allocation6], 4294966272 }
0x11ca   :  { %3351 = vsyncpa [#allocation5], 1 }
0x11cb   :  { %3352 = vsyncpa [#allocation8], 1 }
0x11cc   :  { %3353 = vsyncpa [#allocation11], 1 }
0x11cd   :  { %3354 = vsyncpa [#allocation6], 1 }

</bundles_post_ra>
